<compile_context>
chip_gen: v6e
topology: v6e:2x2x1
jax: 0.10.0
libtpu: 0.0.40
codegen_flags: <defaults>
</compile_context>

<pallas_src>
import jax
import jax.numpy as jnp
from jax.experimental import pallas as pl
from jax.experimental.pallas import tpu as pltpu


# ---------------------------------------------------------------------------
# Miniature DenseNet-style configuration (deterministic synthetic weights).
# ---------------------------------------------------------------------------
H0 = W0 = 16          # input spatial resolution
C_IN = 3              # RGB
K = 3                 # conv kernel size
STEM_C = 16           # stem channels
BOTTLENECK_C = 16     # dense-layer 1x1 bottleneck channels
GROWTH_C = 8          # dense-layer growth rate
NUM_DENSE_LAYERS = 2
FEAT_C = STEM_C + NUM_DENSE_LAYERS * GROWTH_C   # 32 channels after the block
TRANS_C = 16          # transition (output feature) channels
H1 = W1 = H0 // 2     # after stem max-pool  (8)
H2 = W2 = H1 // 2     # after final avg-pool (4)


# ---------------------------------------------------------------------------
# In-kernel helpers (trace-time Python, all data stays in VMEM)
# ---------------------------------------------------------------------------
def _im2col_3x3(pad_ref, H, W, Cin):
    """Gather the 9 shifted (H, W, Cin) windows of a zero-padded (H+2, W+2, Cin)
    VMEM buffer into one (H*W, 9*Cin) im2col matrix -> one deep MXU matmul per
    conv instead of 9 shallow accumulating ones."""
    cols = []
    for kh in range(K):
        for kw in range(K):
            win = pad_ref[pl.ds(kh, H), pl.ds(kw, W), :]
            cols.append(win.reshape(H * W, Cin))
    return jnp.concatenate(cols, axis=-1)


def _pool2x2(y_flat, row_ref, W, Ho, Wo, mode):
    """Fused 2x2 / stride-2 pool of a row-major (H*W, C) conv output.
    Row pairs are separated with a tile-aligned leading-dim reshape; column
    pairs with sublane-strided reads (stride=2) staged through VMEM scratch."""
    C = y_flat.shape[-1]
    g = y_flat.reshape(Ho, 2 * W, C)                     # rows (2i, 2i+1) grouped
    top, bot = g[:, 0:W, :], g[:, W:2 * W, :]
    row_ref[...] = jnp.maximum(top, bot) if mode == "max" else top + bot
    left = row_ref[:, pl.ds(0, Wo, stride=2), :]
    right = row_ref[:, pl.ds(1, Wo, stride=2), :]
    if mode == "max":
        return jnp.maximum(left, right)
    return (left + right) * 0.25                         # (Ho, Wo, C)


# ---------------------------------------------------------------------------
# Fused forward-pass kernel: one grid step == one image, end to end.
# ---------------------------------------------------------------------------
def _fused_extractor_kernel(*refs):
    n_in = 3 + 4 * NUM_DENSE_LAYERS + 2
    x_ref = refs[0]
    stem_w, stem_b = refs[1], refs[2]
    layer_refs = [tuple(refs[3 + 4 * i: 3 + 4 * i + 4])
                  for i in range(NUM_DENSE_LAYERS)]
    tr_w, tr_b = refs[n_in - 2], refs[n_in - 1]
    o_ref = refs[n_in]
    pad_stem, row_a, feat, pad_grow, row_b = refs[n_in + 1:]

    f32, bf16 = jnp.float32, jnp.bfloat16

    # --- stem: 3x3 conv (halo zero-filled in VMEM) + folded-BN bias + ReLU ----
    pad_stem[...] = jnp.zeros_like(pad_stem)
    pad_stem[pl.ds(1, H0), pl.ds(1, W0), :] = x_ref[0].astype(f32)
    cols = _im2col_3x3(pad_stem, H0, W0, C_IN).astype(bf16)         # (256, 27)
    y = jnp.dot(cols, stem_w[...], preferred_element_type=f32)      # bf16 MXU
    y = jnp.maximum(y + stem_b[...], 0.0)                           # (256, 16) f32

    # --- fused 2x2 max-pool; write into channel slice 0 of the feature slab --
    pooled = _pool2x2(y, row_a, W0, H1, W1, "max")                  # (8, 8, 16)
    feat[:, 0:STEM_C] = pooled.reshape(H1 * W1, STEM_C)

    # --- dense block: "concat" == writes into channel slices of `feat` -------
    pad_grow[...] = jnp.zeros_like(pad_grow)                        # zero halo once
    for i, (w1, b1, w2, b2) in enumerate(layer_refs):
        cin = STEM_C + i * GROWTH_C
        lhs = feat[:, 0:cin].astype(bf16)                           # (64, cin)
        h = jnp.dot(lhs, w1[...], preferred_element_type=f32)       # 1x1 bottleneck
        h = jnp.maximum(h + b1[...], 0.0)                           # (64, 16)
        pad_grow[pl.ds(1, H1), pl.ds(1, W1), :] = h.reshape(H1, W1, BOTTLENECK_C)
        gcols = _im2col_3x3(pad_grow, H1, W1, BOTTLENECK_C).astype(bf16)  # (64,144)
        g = jnp.dot(gcols, w2[...], preferred_element_type=f32)     # 3x3 growth
        g = jnp.maximum(g + b2[...], 0.0)                           # (64, 8)
        feat[:, cin:cin + GROWTH_C] = g

    # --- transition 1x1 conv + fused 2x2 avg-pool -----------------------------
    t = jnp.dot(feat[...].astype(bf16), tr_w[...], preferred_element_type=f32)
    t = jnp.maximum(t + tr_b[...], 0.0)                             # (64, 16)
    out = _pool2x2(t, row_b, W1, H2, W2, "avg")                     # (4, 4, 16)
    # NOTE: final store is only 1 KiB/image, so lane-densifying it (C*H*W on the
    # lane axis) is not worth an in-kernel transpose at this size.
    o_ref[...] = out.reshape(1, H2, W2, TRANS_C).astype(o_ref.dtype)


# ---------------------------------------------------------------------------
# Parameters (deterministic synthetic) + BN folding / im2col pre-reshape
# ---------------------------------------------------------------------------
def _conv_w(key, k, cin, cout):
    fan_in = k * k * cin
    return (jax.random.normal(key, (k, k, cin, cout), jnp.float32)
            / jnp.sqrt(jnp.float32(fan_in)))


def _bn(key, cout):
    ks, kb = jax.random.split(key)
    scale = 1.0 + 0.1 * jax.random.normal(ks, (1, cout), jnp.float32)
    bias = 0.1 * jax.random.normal(kb, (1, cout), jnp.float32)
    return scale, bias


def init_params(key):
    keys = jax.random.split(key, 2 + 4 * NUM_DENSE_LAYERS + 2)
    it = iter(keys)
    p = {}
    p["stem_w"] = _conv_w(next(it), K, C_IN, STEM_C)
    p["stem_s"], p["stem_b"] = _bn(next(it), STEM_C)
    cin = STEM_C
    for i in range(NUM_DENSE_LAYERS):
        p[f"l{i}_w1"] = _conv_w(next(it), 1, cin, BOTTLENECK_C)
        p[f"l{i}_s1"], p[f"l{i}_b1"] = _bn(next(it), BOTTLENECK_C)
        p[f"l{i}_w2"] = _conv_w(next(it), K, BOTTLENECK_C, GROWTH_C)
        p[f"l{i}_s2"], p[f"l{i}_b2"] = _bn(next(it), GROWTH_C)
        cin += GROWTH_C
    p["tr_w"] = _conv_w(next(it), 1, cin, TRANS_C)
    p["tr_s"], p["tr_b"] = _bn(next(it), TRANS_C)
    return p


def prepare_params(params):
    """Fold BN scale into the conv weights (w' = w * scale), cast to bf16, and
    pre-reshape every kernel into its im2col matrix form for the Pallas call."""
    def fold(w, s):
        return (w * s.reshape(1, 1, 1, -1)).astype(jnp.bfloat16)

    prep = {}
    prep["stem_w4"] = fold(params["stem_w"], params["stem_s"])
    prep["stem_wm"] = prep["stem_w4"].reshape(K * K * C_IN, STEM_C)
    prep["stem_b"] = params["stem_b"]
    for i in range(NUM_DENSE_LAYERS):
        cin = STEM_C + i * GROWTH_C
        prep[f"l{i}_w1_4"] = fold(params[f"l{i}_w1"], params[f"l{i}_s1"])
        prep[f"l{i}_w1m"] = prep[f"l{i}_w1_4"].reshape(cin, BOTTLENECK_C)
        prep[f"l{i}_b1"] = params[f"l{i}_b1"]
        prep[f"l{i}_w2_4"] = fold(params[f"l{i}_w2"], params[f"l{i}_s2"])
        prep[f"l{i}_w2m"] = prep[f"l{i}_w2_4"].reshape(K * K * BOTTLENECK_C, GROWTH_C)
        prep[f"l{i}_b2"] = params[f"l{i}_b2"]
    prep["tr_w4"] = fold(params["tr_w"], params["tr_s"])
    prep["tr_wm"] = prep["tr_w4"].reshape(FEAT_C, TRANS_C)
    prep["tr_b"] = params["tr_b"]
    return prep


# ---------------------------------------------------------------------------
# Public wrapper (PyTorch-style NCHW in / NCHW out) + pure-JAX reference
# ---------------------------------------------------------------------------
def visual_feature_extractor(images_nchw, prep):
    """images_nchw: (B, 3, 16, 16) f32 NCHW.  Returns (B, TRANS_C, 4, 4) NCHW."""
    B = images_nchw.shape[0]
    # layout plumbing only: NCHW -> NHWC, bf16 for the HBM->VMEM DMA + MXU path
    x = jnp.transpose(images_nchw, (0, 2, 3, 1)).astype(jnp.bfloat16)

    operands = [x]
    in_specs = [pl.BlockSpec((1, H0, W0, C_IN), lambda b: (b, 0, 0, 0))]

    def add_param(arr):                       # all params are 2-D matrices
        operands.append(arr)
        # constant index_map: each weight/bias is DMA'd into VMEM once and
        # reused across the whole batch grid (no per-layer pallas_calls).
        in_specs.append(pl.BlockSpec(arr.shape, lambda b: (0, 0)))

    add_param(prep["stem_wm"])
    add_param(prep["stem_b"])
    for i in range(NUM_DENSE_LAYERS):
        add_param(prep[f"l{i}_w1m"])
        add_param(prep[f"l{i}_b1"])
        add_param(prep[f"l{i}_w2m"])
        add_param(prep[f"l{i}_b2"])
    add_param(prep["tr_wm"])
    add_param(prep["tr_b"])

    out_nhwc = pl.pallas_call(
        _fused_extractor_kernel,
        out_shape=jax.ShapeDtypeStruct((B, H2, W2, TRANS_C), jnp.float32),
        grid=(B,),
        in_specs=in_specs,
        out_specs=pl.BlockSpec((1, H2, W2, TRANS_C), lambda b: (b, 0, 0, 0)),
        scratch_shapes=[
            pltpu.VMEM((H0 + 2, W0 + 2, C_IN), jnp.float32),          # padded stem in
            pltpu.VMEM((H1, W0, STEM_C), jnp.float32),                # row-pooled stem
            pltpu.VMEM((H1 * W1, FEAT_C), jnp.float32),               # dense feature slab
            pltpu.VMEM((H1 + 2, W1 + 2, BOTTLENECK_C), jnp.float32),  # padded growth in
            pltpu.VMEM((H2, W1, TRANS_C), jnp.float32),               # row-pooled trans
        ],
        # batch stays "parallel": v7x megacore shards images across its 2 TCs;
        # on v5e/v6e it is just a cheap 2-step sequential loop.
        compiler_params=pltpu.CompilerParams(dimension_semantics=("parallel",)),
    )(*operands)
    return jnp.transpose(out_nhwc, (0, 3, 1, 2))                      # NHWC -> NCHW


def reference_extractor(images_nchw, prep):
    """Pure-JAX mirror of the fused kernel (same bf16 quantization points)."""
    def conv(x, w4, b):
        y = jax.lax.conv_general_dilated(
            x.astype(jnp.bfloat16), w4, window_strides=(1, 1),
            padding="SAME" if w4.shape[0] == K else "VALID",
            dimension_numbers=("NHWC", "HWIO", "NHWC"),
            preferred_element_type=jnp.float32)
        return jnp.maximum(y + b.reshape(1, 1, 1, -1), 0.0)

    def pool(x, mode):
        s = jnp.stack([x[:, i::2, j::2, :] for i in (0, 1) for j in (0, 1)], 0)
        return jnp.max(s, 0) if mode == "max" else jnp.mean(s, 0)

    x = jnp.transpose(images_nchw, (0, 2, 3, 1))
    feats = pool(conv(x, prep["stem_w4"], prep["stem_b"]), "max")
    for i in range(NUM_DENSE_LAYERS):
        h = conv(feats, prep[f"l{i}_w1_4"], prep[f"l{i}_b1"])
        g = conv(h, prep[f"l{i}_w2_4"], prep[f"l{i}_b2"])
        feats = jnp.concatenate([feats, g], axis=-1)
    t = conv(feats, prep["tr_w4"], prep["tr_b"])
    return jnp.transpose(pool(t, "avg"), (0, 3, 1, 2))


if __name__ == "__main__":
    key = jax.random.PRNGKey(0)
    pkey, xkey = jax.random.split(key)
    params = init_params(pkey)
    prep = prepare_params(params)

    # PyTorch-style NCHW image batch: (B=2, C=3, H=16, W=16)
    images = jax.random.normal(xkey, (2, C_IN, H0, W0), jnp.float32)

    fwd = jax.jit(lambda im: visual_feature_extractor(im, prep))
    feats = jax.block_until_ready(fwd(images))

    ref = reference_extractor(images, prep)
    assert feats.shape == (2, TRANS_C, H2, W2), feats.shape
    max_err = float(jnp.max(jnp.abs(feats - ref)))
    assert max_err < 1e-2, max_err
    print("KERNEL_OK")
</pallas_src>

<mosaic_0001>
module attributes {stable_mosaic.version = 11 : i64} {
  func.func @_fused_extractor_kernel(%arg0: i32, %arg1: memref<1x16x16x3xbf16, #tpu.memory_space<vmem>>, %arg2: memref<27x16xbf16, #tpu.memory_space<vmem>>, %arg3: memref<1x16xf32, #tpu.memory_space<vmem>>, %arg4: memref<16x16xbf16, #tpu.memory_space<vmem>>, %arg5: memref<1x16xf32, #tpu.memory_space<vmem>>, %arg6: memref<144x8xbf16, #tpu.memory_space<vmem>>, %arg7: memref<1x8xf32, #tpu.memory_space<vmem>>, %arg8: memref<24x16xbf16, #tpu.memory_space<vmem>>, %arg9: memref<1x16xf32, #tpu.memory_space<vmem>>, %arg10: memref<144x8xbf16, #tpu.memory_space<vmem>>, %arg11: memref<1x8xf32, #tpu.memory_space<vmem>>, %arg12: memref<32x16xbf16, #tpu.memory_space<vmem>>, %arg13: memref<1x16xf32, #tpu.memory_space<vmem>>, %arg14: memref<1x4x4x16xf32, #tpu.memory_space<vmem>>, %arg15: memref<18x18x3xf32, #tpu.memory_space<vmem>>, %arg16: memref<8x16x16xf32, #tpu.memory_space<vmem>>, %arg17: memref<64x32xf32, #tpu.memory_space<vmem>>, %arg18: memref<10x10x16xf32, #tpu.memory_space<vmem>>, %arg19: memref<4x8x16xf32, #tpu.memory_space<vmem>>) attributes {dimension_semantics = [#tpu.dimension_semantics<parallel>], iteration_bounds = array<i64: 2>, scalar_prefetch = 0 : i64, scratch_operands = 5 : i64, tpu.core_type = #tpu.core_type<tc>, window_params = [{transform_indices = @transform_0, window_bounds = array<i64: 1, 16, 16, 3>}, {pipeline_mode = #tpu.pipeline_mode<synchronous>, transform_indices = @transform_1, window_bounds = array<i64: 27, 16>}, {pipeline_mode = #tpu.pipeline_mode<synchronous>, transform_indices = @transform_2, window_bounds = array<i64: 1, 16>}, {pipeline_mode = #tpu.pipeline_mode<synchronous>, transform_indices = @transform_3, window_bounds = array<i64: 16, 16>}, {pipeline_mode = #tpu.pipeline_mode<synchronous>, transform_indices = @transform_4, window_bounds = array<i64: 1, 16>}, {pipeline_mode = #tpu.pipeline_mode<synchronous>, transform_indices = @transform_5, window_bounds = array<i64: 144, 8>}, {pipeline_mode = #tpu.pipeline_mode<synchronous>, transform_indices = @transform_6, window_bounds = array<i64: 1, 8>}, {pipeline_mode = #tpu.pipeline_mode<synchronous>, transform_indices = @transform_7, window_bounds = array<i64: 24, 16>}, {pipeline_mode = #tpu.pipeline_mode<synchronous>, transform_indices = @transform_8, window_bounds = array<i64: 1, 16>}, {pipeline_mode = #tpu.pipeline_mode<synchronous>, transform_indices = @transform_9, window_bounds = array<i64: 144, 8>}, {pipeline_mode = #tpu.pipeline_mode<synchronous>, transform_indices = @transform_10, window_bounds = array<i64: 1, 8>}, {pipeline_mode = #tpu.pipeline_mode<synchronous>, transform_indices = @transform_11, window_bounds = array<i64: 32, 16>}, {pipeline_mode = #tpu.pipeline_mode<synchronous>, transform_indices = @transform_12, window_bounds = array<i64: 1, 16>}, {transform_indices = @transform_13, window_bounds = array<i64: 1, 4, 4, 16>}]} {
    %cst = arith.constant 0.000000e+00 : f32
    %0 = vector.broadcast %cst : f32 to vector<18x18x3xf32>
    %c0 = arith.constant 0 : index
    %c0_0 = arith.constant 0 : index
    %c0_1 = arith.constant 0 : index
    %1 = vector.load %arg15[%c0, %c0_0, %c0_1] : memref<18x18x3xf32, #tpu.memory_space<vmem>>, vector<18x18x3xf32>
    tpu.vector_store %arg15[%c0, %c0_0, %c0_1], %0 {strides = array<i32>} : memref<18x18x3xf32, #tpu.memory_space<vmem>>, vector<18x18x3xf32>,
    %c0_2 = arith.constant 0 : index
    %c0_3 = arith.constant 0 : index
    %c0_4 = arith.constant 0 : index
    %c0_5 = arith.constant 0 : index
    %2 = vector.load %arg1[%c0_2, %c0_3, %c0_4, %c0_5] : memref<1x16x16x3xbf16, #tpu.memory_space<vmem>>, vector<1x16x16x3xbf16>
    %3 = vector.shape_cast %2 : vector<1x16x16x3xbf16> to vector<16x16x3xbf16>
    %4 = arith.extf %3 : vector<16x16x3xbf16> to vector<16x16x3xf32>
    %c1 = arith.constant 1 : index
    %c1_6 = arith.constant 1 : index
    %c0_7 = arith.constant 0 : index
    %5 = vector.load %arg15[%c1, %c1_6, %c0_7] : memref<18x18x3xf32, #tpu.memory_space<vmem>>, vector<16x16x3xf32>
    tpu.vector_store %arg15[%c1, %c1_6, %c0_7], %4 {strides = array<i32>} : memref<18x18x3xf32, #tpu.memory_space<vmem>>, vector<16x16x3xf32>,
    %c0_8 = arith.constant 0 : index
    %c0_9 = arith.constant 0 : index
    %c0_10 = arith.constant 0 : index
    %6 = vector.load %arg15[%c0_8, %c0_9, %c0_10] : memref<18x18x3xf32, #tpu.memory_space<vmem>>, vector<16x16x3xf32>
    %7 = vector.shape_cast %6 : vector<16x16x3xf32> to vector<256x3xf32>
    %c0_11 = arith.constant 0 : index
    %c1_12 = arith.constant 1 : index
    %c0_13 = arith.constant 0 : index
    %8 = vector.load %arg15[%c0_11, %c1_12, %c0_13] : memref<18x18x3xf32, #tpu.memory_space<vmem>>, vector<16x16x3xf32>
    %9 = vector.shape_cast %8 : vector<16x16x3xf32> to vector<256x3xf32>
    %c0_14 = arith.constant 0 : index
    %c2 = arith.constant 2 : index
    %c0_15 = arith.constant 0 : index
    %10 = vector.load %arg15[%c0_14, %c2, %c0_15] : memref<18x18x3xf32, #tpu.memory_space<vmem>>, vector<16x16x3xf32>
    %11 = vector.shape_cast %10 : vector<16x16x3xf32> to vector<256x3xf32>
    %c1_16 = arith.constant 1 : index
    %c0_17 = arith.constant 0 : index
    %c0_18 = arith.constant 0 : index
    %12 = vector.load %arg15[%c1_16, %c0_17, %c0_18] : memref<18x18x3xf32, #tpu.memory_space<vmem>>, vector<16x16x3xf32>
    %13 = vector.shape_cast %12 : vector<16x16x3xf32> to vector<256x3xf32>
    %c1_19 = arith.constant 1 : index
    %c1_20 = arith.constant 1 : index
    %c0_21 = arith.constant 0 : index
    %14 = vector.load %arg15[%c1_19, %c1_20, %c0_21] : memref<18x18x3xf32, #tpu.memory_space<vmem>>, vector<16x16x3xf32>
    %15 = vector.shape_cast %14 : vector<16x16x3xf32> to vector<256x3xf32>
    %c1_22 = arith.constant 1 : index
    %c2_23 = arith.constant 2 : index
    %c0_24 = arith.constant 0 : index
    %16 = vector.load %arg15[%c1_22, %c2_23, %c0_24] : memref<18x18x3xf32, #tpu.memory_space<vmem>>, vector<16x16x3xf32>
    %17 = vector.shape_cast %16 : vector<16x16x3xf32> to vector<256x3xf32>
    %c2_25 = arith.constant 2 : index
    %c0_26 = arith.constant 0 : index
    %c0_27 = arith.constant 0 : index
    %18 = vector.load %arg15[%c2_25, %c0_26, %c0_27] : memref<18x18x3xf32, #tpu.memory_space<vmem>>, vector<16x16x3xf32>
    %19 = vector.shape_cast %18 : vector<16x16x3xf32> to vector<256x3xf32>
    %c2_28 = arith.constant 2 : index
    %c1_29 = arith.constant 1 : index
    %c0_30 = arith.constant 0 : index
    %20 = vector.load %arg15[%c2_28, %c1_29, %c0_30] : memref<18x18x3xf32, #tpu.memory_space<vmem>>, vector<16x16x3xf32>
    %21 = vector.shape_cast %20 : vector<16x16x3xf32> to vector<256x3xf32>
    %c2_31 = arith.constant 2 : index
    %c2_32 = arith.constant 2 : index
    %c0_33 = arith.constant 0 : index
    %22 = vector.load %arg15[%c2_31, %c2_32, %c0_33] : memref<18x18x3xf32, #tpu.memory_space<vmem>>, vector<16x16x3xf32>
    %23 = vector.shape_cast %22 : vector<16x16x3xf32> to vector<256x3xf32>
    %24 = tpu.concatenate %7, %9, %11, %13, %15, %17, %19, %21, %23 in 1 : vector<256x3xf32>, vector<256x3xf32>, vector<256x3xf32>, vector<256x3xf32>, vector<256x3xf32>, vector<256x3xf32>, vector<256x3xf32>, vector<256x3xf32>, vector<256x3xf32> -> vector<256x27xf32>
    %25 = arith.truncf %24 : vector<256x27xf32> to vector<256x27xbf16>
    %c0_34 = arith.constant 0 : index
    %c0_35 = arith.constant 0 : index
    %26 = vector.load %arg2[%c0_34, %c0_35] : memref<27x16xbf16, #tpu.memory_space<vmem>>, vector<27x16xbf16>
    %cst_36 = arith.constant dense<0.000000e+00> : vector<256x16xf32>
    %27 = tpu.matmul %25, %26, %cst_36 {dimension_numbers = #tpu.dot_dimension_numbers<[1], [0], [0], [1], [0, 0, 1, 1], [], []>} : vector<256x27xbf16>, vector<27x16xbf16>, vector<256x16xf32> -> vector<256x16xf32>
    %c0_37 = arith.constant 0 : index
    %c0_38 = arith.constant 0 : index
    %28 = vector.load %arg3[%c0_37, %c0_38] : memref<1x16xf32, #tpu.memory_space<vmem>>, vector<1x16xf32>
    %29 = vector.broadcast %28 : vector<1x16xf32> to vector<256x16xf32>
    %30 = arith.addf %27, %29 : vector<256x16xf32>
    %cst_39 = arith.constant 0.000000e+00 : f32
    %31 = vector.broadcast %cst_39 : f32 to vector<256x16xf32>
    %32 = arith.maximumf %30, %31 : vector<256x16xf32>
    %33 = vector.shape_cast %32 : vector<256x16xf32> to vector<8x32x16xf32>
    %34 = vector.extract_strided_slice %33 {offsets = [0, 0, 0], sizes = [8, 16, 16], strides = [1, 1, 1]} : vector<8x32x16xf32> to vector<8x16x16xf32>
    %35 = vector.extract_strided_slice %33 {offsets = [0, 16, 0], sizes = [8, 16, 16], strides = [1, 1, 1]} : vector<8x32x16xf32> to vector<8x16x16xf32>
    %36 = arith.maximumf %34, %35 : vector<8x16x16xf32>
    %c0_40 = arith.constant 0 : index
    %c0_41 = arith.constant 0 : index
    %c0_42 = arith.constant 0 : index
    %37 = vector.load %arg16[%c0_40, %c0_41, %c0_42] : memref<8x16x16xf32, #tpu.memory_space<vmem>>, vector<8x16x16xf32>
    tpu.vector_store %arg16[%c0_40, %c0_41, %c0_42], %36 {strides = array<i32>} : memref<8x16x16xf32, #tpu.memory_space<vmem>>, vector<8x16x16xf32>,
    %c0_43 = arith.constant 0 : index
    %c0_44 = arith.constant 0 : index
    %c0_45 = arith.constant 0 : index
    %38 = tpu.strided_load %arg16[%c0_43, %c0_44, %c0_45] {strides = array<i32: 1, 2, 1>} : memref<8x16x16xf32, #tpu.memory_space<vmem>>, vector<8x8x16xf32>
    %c0_46 = arith.constant 0 : index
    %c1_47 = arith.constant 1 : index
    %c0_48 = arith.constant 0 : index
    %39 = tpu.strided_load %arg16[%c0_46, %c1_47, %c0_48] {strides = array<i32: 1, 2, 1>} : memref<8x16x16xf32, #tpu.memory_space<vmem>>, vector<8x8x16xf32>
    %40 = arith.maximumf %38, %39 : vector<8x8x16xf32>
    %41 = vector.shape_cast %40 : vector<8x8x16xf32> to vector<64x16xf32>
    %c0_49 = arith.constant 0 : index
    %c0_50 = arith.constant 0 : index
    %42 = vector.load %arg17[%c0_49, %c0_50] : memref<64x32xf32, #tpu.memory_space<vmem>>, vector<64x16xf32>
    tpu.vector_store %arg17[%c0_49, %c0_50], %41 {strides = array<i32>} : memref<64x32xf32, #tpu.memory_space<vmem>>, vector<64x16xf32>,
    %cst_51 = arith.constant 0.000000e+00 : f32
    %43 = vector.broadcast %cst_51 : f32 to vector<10x10x16xf32>
    %c0_52 = arith.constant 0 : index
    %c0_53 = arith.constant 0 : index
    %c0_54 = arith.constant 0 : index
    %44 = vector.load %arg18[%c0_52, %c0_53, %c0_54] : memref<10x10x16xf32, #tpu.memory_space<vmem>>, vector<10x10x16xf32>
    tpu.vector_store %arg18[%c0_52, %c0_53, %c0_54], %43 {strides = array<i32>} : memref<10x10x16xf32, #tpu.memory_space<vmem>>, vector<10x10x16xf32>,
    %c0_55 = arith.constant 0 : index
    %c0_56 = arith.constant 0 : index
    %45 = vector.load %arg17[%c0_55, %c0_56] : memref<64x32xf32, #tpu.memory_space<vmem>>, vector<64x16xf32>
    %46 = arith.truncf %45 : vector<64x16xf32> to vector<64x16xbf16>
    %c0_57 = arith.constant 0 : index
    %c0_58 = arith.constant 0 : index
    %47 = vector.load %arg4[%c0_57, %c0_58] : memref<16x16xbf16, #tpu.memory_space<vmem>>, vector<16x16xbf16>
    %cst_59 = arith.constant dense<0.000000e+00> : vector<64x16xf32>
    %48 = tpu.matmul %46, %47, %cst_59 {dimension_numbers = #tpu.dot_dimension_numbers<[1], [0], [0], [1], [0, 0, 1, 1], [], []>} : vector<64x16xbf16>, vector<16x16xbf16>, vector<64x16xf32> -> vector<64x16xf32>
    %c0_60 = arith.constant 0 : index
    %c0_61 = arith.constant 0 : index
    %49 = vector.load %arg5[%c0_60, %c0_61] : memref<1x16xf32, #tpu.memory_space<vmem>>, vector<1x16xf32>
    %50 = vector.broadcast %49 : vector<1x16xf32> to vector<64x16xf32>
    %51 = arith.addf %48, %50 : vector<64x16xf32>
    %cst_62 = arith.constant 0.000000e+00 : f32
    %52 = vector.broadcast %cst_62 : f32 to vector<64x16xf32>
    %53 = arith.maximumf %51, %52 : vector<64x16xf32>
    %54 = vector.shape_cast %53 : vector<64x16xf32> to vector<8x8x16xf32>
    %c1_63 = arith.constant 1 : index
    %c1_64 = arith.constant 1 : index
    %c0_65 = arith.constant 0 : index
    %55 = vector.load %arg18[%c1_63, %c1_64, %c0_65] : memref<10x10x16xf32, #tpu.memory_space<vmem>>, vector<8x8x16xf32>
    tpu.vector_store %arg18[%c1_63, %c1_64, %c0_65], %54 {strides = array<i32>} : memref<10x10x16xf32, #tpu.memory_space<vmem>>, vector<8x8x16xf32>,
    %c0_66 = arith.constant 0 : index
    %c0_67 = arith.constant 0 : index
    %c0_68 = arith.constant 0 : index
    %56 = vector.load %arg18[%c0_66, %c0_67, %c0_68] : memref<10x10x16xf32, #tpu.memory_space<vmem>>, vector<8x8x16xf32>
    %57 = vector.shape_cast %56 : vector<8x8x16xf32> to vector<64x16xf32>
    %c0_69 = arith.constant 0 : index
    %c1_70 = arith.constant 1 : index
    %c0_71 = arith.constant 0 : index
    %58 = vector.load %arg18[%c0_69, %c1_70, %c0_71] : memref<10x10x16xf32, #tpu.memory_space<vmem>>, vector<8x8x16xf32>
    %59 = vector.shape_cast %58 : vector<8x8x16xf32> to vector<64x16xf32>
    %c0_72 = arith.constant 0 : index
    %c2_73 = arith.constant 2 : index
    %c0_74 = arith.constant 0 : index
    %60 = vector.load %arg18[%c0_72, %c2_73, %c0_74] : memref<10x10x16xf32, #tpu.memory_space<vmem>>, vector<8x8x16xf32>
    %61 = vector.shape_cast %60 : vector<8x8x16xf32> to vector<64x16xf32>
    %c1_75 = arith.constant 1 : index
    %c0_76 = arith.constant 0 : index
    %c0_77 = arith.constant 0 : index
    %62 = vector.load %arg18[%c1_75, %c0_76, %c0_77] : memref<10x10x16xf32, #tpu.memory_space<vmem>>, vector<8x8x16xf32>
    %63 = vector.shape_cast %62 : vector<8x8x16xf32> to vector<64x16xf32>
    %c1_78 = arith.constant 1 : index
    %c1_79 = arith.constant 1 : index
    %c0_80 = arith.constant 0 : index
    %64 = vector.load %arg18[%c1_78, %c1_79, %c0_80] : memref<10x10x16xf32, #tpu.memory_space<vmem>>, vector<8x8x16xf32>
    %65 = vector.shape_cast %64 : vector<8x8x16xf32> to vector<64x16xf32>
    %c1_81 = arith.constant 1 : index
    %c2_82 = arith.constant 2 : index
    %c0_83 = arith.constant 0 : index
    %66 = vector.load %arg18[%c1_81, %c2_82, %c0_83] : memref<10x10x16xf32, #tpu.memory_space<vmem>>, vector<8x8x16xf32>
    %67 = vector.shape_cast %66 : vector<8x8x16xf32> to vector<64x16xf32>
    %c2_84 = arith.constant 2 : index
    %c0_85 = arith.constant 0 : index
    %c0_86 = arith.constant 0 : index
    %68 = vector.load %arg18[%c2_84, %c0_85, %c0_86] : memref<10x10x16xf32, #tpu.memory_space<vmem>>, vector<8x8x16xf32>
    %69 = vector.shape_cast %68 : vector<8x8x16xf32> to vector<64x16xf32>
    %c2_87 = arith.constant 2 : index
    %c1_88 = arith.constant 1 : index
    %c0_89 = arith.constant 0 : index
    %70 = vector.load %arg18[%c2_87, %c1_88, %c0_89] : memref<10x10x16xf32, #tpu.memory_space<vmem>>, vector<8x8x16xf32>
    %71 = vector.shape_cast %70 : vector<8x8x16xf32> to vector<64x16xf32>
    %c2_90 = arith.constant 2 : index
    %c2_91 = arith.constant 2 : index
    %c0_92 = arith.constant 0 : index
    %72 = vector.load %arg18[%c2_90, %c2_91, %c0_92] : memref<10x10x16xf32, #tpu.memory_space<vmem>>, vector<8x8x16xf32>
    %73 = vector.shape_cast %72 : vector<8x8x16xf32> to vector<64x16xf32>
    %74 = tpu.concatenate %57, %59, %61, %63, %65, %67, %69, %71, %73 in 1 : vector<64x16xf32>, vector<64x16xf32>, vector<64x16xf32>, vector<64x16xf32>, vector<64x16xf32>, vector<64x16xf32>, vector<64x16xf32>, vector<64x16xf32>, vector<64x16xf32> -> vector<64x144xf32>
    %75 = arith.truncf %74 : vector<64x144xf32> to vector<64x144xbf16>
    %c0_93 = arith.constant 0 : index
    %c0_94 = arith.constant 0 : index
    %76 = vector.load %arg6[%c0_93, %c0_94] : memref<144x8xbf16, #tpu.memory_space<vmem>>, vector<144x8xbf16>
    %cst_95 = arith.constant dense<0.000000e+00> : vector<64x8xf32>
    %77 = tpu.matmul %75, %76, %cst_95 {dimension_numbers = #tpu.dot_dimension_numbers<[1], [0], [0], [1], [0, 0, 1, 1], [], []>} : vector<64x144xbf16>, vector<144x8xbf16>, vector<64x8xf32> -> vector<64x8xf32>
    %c0_96 = arith.constant 0 : index
    %c0_97 = arith.constant 0 : index
    %78 = vector.load %arg7[%c0_96, %c0_97] : memref<1x8xf32, #tpu.memory_space<vmem>>, vector<1x8xf32>
    %79 = vector.broadcast %78 : vector<1x8xf32> to vector<64x8xf32>
    %80 = arith.addf %77, %79 : vector<64x8xf32>
    %cst_98 = arith.constant 0.000000e+00 : f32
    %81 = vector.broadcast %cst_98 : f32 to vector<64x8xf32>
    %82 = arith.maximumf %80, %81 : vector<64x8xf32>
    %c0_99 = arith.constant 0 : index
    %c16 = arith.constant 16 : index
    %83 = vector.load %arg17[%c0_99, %c16] : memref<64x32xf32, #tpu.memory_space<vmem>>, vector<64x8xf32>
    tpu.vector_store %arg17[%c0_99, %c16], %82 {strides = array<i32>} : memref<64x32xf32, #tpu.memory_space<vmem>>, vector<64x8xf32>,
    %c0_100 = arith.constant 0 : index
    %c0_101 = arith.constant 0 : index
    %84 = vector.load %arg17[%c0_100, %c0_101] : memref<64x32xf32, #tpu.memory_space<vmem>>, vector<64x24xf32>
    %85 = arith.truncf %84 : vector<64x24xf32> to vector<64x24xbf16>
    %c0_102 = arith.constant 0 : index
    %c0_103 = arith.constant 0 : index
    %86 = vector.load %arg8[%c0_102, %c0_103] : memref<24x16xbf16, #tpu.memory_space<vmem>>, vector<24x16xbf16>
    %cst_104 = arith.constant dense<0.000000e+00> : vector<64x16xf32>
    %87 = tpu.matmul %85, %86, %cst_104 {dimension_numbers = #tpu.dot_dimension_numbers<[1], [0], [0], [1], [0, 0, 1, 1], [], []>} : vector<64x24xbf16>, vector<24x16xbf16>, vector<64x16xf32> -> vector<64x16xf32>
    %c0_105 = arith.constant 0 : index
    %c0_106 = arith.constant 0 : index
    %88 = vector.load %arg9[%c0_105, %c0_106] : memref<1x16xf32, #tpu.memory_space<vmem>>, vector<1x16xf32>
    %89 = vector.broadcast %88 : vector<1x16xf32> to vector<64x16xf32>
    %90 = arith.addf %87, %89 : vector<64x16xf32>
    %cst_107 = arith.constant 0.000000e+00 : f32
    %91 = vector.broadcast %cst_107 : f32 to vector<64x16xf32>
    %92 = arith.maximumf %90, %91 : vector<64x16xf32>
    %93 = vector.shape_cast %92 : vector<64x16xf32> to vector<8x8x16xf32>
    %c1_108 = arith.constant 1 : index
    %c1_109 = arith.constant 1 : index
    %c0_110 = arith.constant 0 : index
    %94 = vector.load %arg18[%c1_108, %c1_109, %c0_110] : memref<10x10x16xf32, #tpu.memory_space<vmem>>, vector<8x8x16xf32>
    tpu.vector_store %arg18[%c1_108, %c1_109, %c0_110], %93 {strides = array<i32>} : memref<10x10x16xf32, #tpu.memory_space<vmem>>, vector<8x8x16xf32>,
    %c0_111 = arith.constant 0 : index
    %c0_112 = arith.constant 0 : index
    %c0_113 = arith.constant 0 : index
    %95 = vector.load %arg18[%c0_111, %c0_112, %c0_113] : memref<10x10x16xf32, #tpu.memory_space<vmem>>, vector<8x8x16xf32>
    %96 = vector.shape_cast %95 : vector<8x8x16xf32> to vector<64x16xf32>
    %c0_114 = arith.constant 0 : index
    %c1_115 = arith.constant 1 : index
    %c0_116 = arith.constant 0 : index
    %97 = vector.load %arg18[%c0_114, %c1_115, %c0_116] : memref<10x10x16xf32, #tpu.memory_space<vmem>>, vector<8x8x16xf32>
    %98 = vector.shape_cast %97 : vector<8x8x16xf32> to vector<64x16xf32>
    %c0_117 = arith.constant 0 : index
    %c2_118 = arith.constant 2 : index
    %c0_119 = arith.constant 0 : index
    %99 = vector.load %arg18[%c0_117, %c2_118, %c0_119] : memref<10x10x16xf32, #tpu.memory_space<vmem>>, vector<8x8x16xf32>
    %100 = vector.shape_cast %99 : vector<8x8x16xf32> to vector<64x16xf32>
    %c1_120 = arith.constant 1 : index
    %c0_121 = arith.constant 0 : index
    %c0_122 = arith.constant 0 : index
    %101 = vector.load %arg18[%c1_120, %c0_121, %c0_122] : memref<10x10x16xf32, #tpu.memory_space<vmem>>, vector<8x8x16xf32>
    %102 = vector.shape_cast %101 : vector<8x8x16xf32> to vector<64x16xf32>
    %c1_123 = arith.constant 1 : index
    %c1_124 = arith.constant 1 : index
    %c0_125 = arith.constant 0 : index
    %103 = vector.load %arg18[%c1_123, %c1_124, %c0_125] : memref<10x10x16xf32, #tpu.memory_space<vmem>>, vector<8x8x16xf32>
    %104 = vector.shape_cast %103 : vector<8x8x16xf32> to vector<64x16xf32>
    %c1_126 = arith.constant 1 : index
    %c2_127 = arith.constant 2 : index
    %c0_128 = arith.constant 0 : index
    %105 = vector.load %arg18[%c1_126, %c2_127, %c0_128] : memref<10x10x16xf32, #tpu.memory_space<vmem>>, vector<8x8x16xf32>
    %106 = vector.shape_cast %105 : vector<8x8x16xf32> to vector<64x16xf32>
    %c2_129 = arith.constant 2 : index
    %c0_130 = arith.constant 0 : index
    %c0_131 = arith.constant 0 : index
    %107 = vector.load %arg18[%c2_129, %c0_130, %c0_131] : memref<10x10x16xf32, #tpu.memory_space<vmem>>, vector<8x8x16xf32>
    %108 = vector.shape_cast %107 : vector<8x8x16xf32> to vector<64x16xf32>
    %c2_132 = arith.constant 2 : index
    %c1_133 = arith.constant 1 : index
    %c0_134 = arith.constant 0 : index
    %109 = vector.load %arg18[%c2_132, %c1_133, %c0_134] : memref<10x10x16xf32, #tpu.memory_space<vmem>>, vector<8x8x16xf32>
    %110 = vector.shape_cast %109 : vector<8x8x16xf32> to vector<64x16xf32>
    %c2_135 = arith.constant 2 : index
    %c2_136 = arith.constant 2 : index
    %c0_137 = arith.constant 0 : index
    %111 = vector.load %arg18[%c2_135, %c2_136, %c0_137] : memref<10x10x16xf32, #tpu.memory_space<vmem>>, vector<8x8x16xf32>
    %112 = vector.shape_cast %111 : vector<8x8x16xf32> to vector<64x16xf32>
    %113 = tpu.concatenate %96, %98, %100, %102, %104, %106, %108, %110, %112 in 1 : vector<64x16xf32>, vector<64x16xf32>, vector<64x16xf32>, vector<64x16xf32>, vector<64x16xf32>, vector<64x16xf32>, vector<64x16xf32>, vector<64x16xf32>, vector<64x16xf32> -> vector<64x144xf32>
    %114 = arith.truncf %113 : vector<64x144xf32> to vector<64x144xbf16>
    %c0_138 = arith.constant 0 : index
    %c0_139 = arith.constant 0 : index
    %115 = vector.load %arg10[%c0_138, %c0_139] : memref<144x8xbf16, #tpu.memory_space<vmem>>, vector<144x8xbf16>
    %cst_140 = arith.constant dense<0.000000e+00> : vector<64x8xf32>
    %116 = tpu.matmul %114, %115, %cst_140 {dimension_numbers = #tpu.dot_dimension_numbers<[1], [0], [0], [1], [0, 0, 1, 1], [], []>} : vector<64x144xbf16>, vector<144x8xbf16>, vector<64x8xf32> -> vector<64x8xf32>
    %c0_141 = arith.constant 0 : index
    %c0_142 = arith.constant 0 : index
    %117 = vector.load %arg11[%c0_141, %c0_142] : memref<1x8xf32, #tpu.memory_space<vmem>>, vector<1x8xf32>
    %118 = vector.broadcast %117 : vector<1x8xf32> to vector<64x8xf32>
    %119 = arith.addf %116, %118 : vector<64x8xf32>
    %cst_143 = arith.constant 0.000000e+00 : f32
    %120 = vector.broadcast %cst_143 : f32 to vector<64x8xf32>
    %121 = arith.maximumf %119, %120 : vector<64x8xf32>
    %c0_144 = arith.constant 0 : index
    %c24 = arith.constant 24 : index
    %122 = vector.load %arg17[%c0_144, %c24] : memref<64x32xf32, #tpu.memory_space<vmem>>, vector<64x8xf32>
    tpu.vector_store %arg17[%c0_144, %c24], %121 {strides = array<i32>} : memref<64x32xf32, #tpu.memory_space<vmem>>, vector<64x8xf32>,
    %c0_145 = arith.constant 0 : index
    %c0_146 = arith.constant 0 : index
    %123 = vector.load %arg17[%c0_145, %c0_146] : memref<64x32xf32, #tpu.memory_space<vmem>>, vector<64x32xf32>
    %124 = arith.truncf %123 : vector<64x32xf32> to vector<64x32xbf16>
    %c0_147 = arith.constant 0 : index
    %c0_148 = arith.constant 0 : index
    %125 = vector.load %arg12[%c0_147, %c0_148] : memref<32x16xbf16, #tpu.memory_space<vmem>>, vector<32x16xbf16>
    %cst_149 = arith.constant dense<0.000000e+00> : vector<64x16xf32>
    %126 = tpu.matmul %124, %125, %cst_149 {dimension_numbers = #tpu.dot_dimension_numbers<[1], [0], [0], [1], [0, 0, 1, 1], [], []>} : vector<64x32xbf16>, vector<32x16xbf16>, vector<64x16xf32> -> vector<64x16xf32>
    %c0_150 = arith.constant 0 : index
    %c0_151 = arith.constant 0 : index
    %127 = vector.load %arg13[%c0_150, %c0_151] : memref<1x16xf32, #tpu.memory_space<vmem>>, vector<1x16xf32>
    %128 = vector.broadcast %127 : vector<1x16xf32> to vector<64x16xf32>
    %129 = arith.addf %126, %128 : vector<64x16xf32>
    %cst_152 = arith.constant 0.000000e+00 : f32
    %130 = vector.broadcast %cst_152 : f32 to vector<64x16xf32>
    %131 = arith.maximumf %129, %130 : vector<64x16xf32>
    %132 = vector.shape_cast %131 : vector<64x16xf32> to vector<4x16x16xf32>
    %133 = vector.extract_strided_slice %132 {offsets = [0, 0, 0], sizes = [4, 8, 16], strides = [1, 1, 1]} : vector<4x16x16xf32> to vector<4x8x16xf32>
    %134 = vector.extract_strided_slice %132 {offsets = [0, 8, 0], sizes = [4, 8, 16], strides = [1, 1, 1]} : vector<4x16x16xf32> to vector<4x8x16xf32>
    %135 = arith.addf %133, %134 : vector<4x8x16xf32>
    %c0_153 = arith.constant 0 : index
    %c0_154 = arith.constant 0 : index
    %c0_155 = arith.constant 0 : index
    %136 = vector.load %arg19[%c0_153, %c0_154, %c0_155] : memref<4x8x16xf32, #tpu.memory_space<vmem>>, vector<4x8x16xf32>
    tpu.vector_store %arg19[%c0_153, %c0_154, %c0_155], %135 {strides = array<i32>} : memref<4x8x16xf32, #tpu.memory_space<vmem>>, vector<4x8x16xf32>,
    %c0_156 = arith.constant 0 : index
    %c0_157 = arith.constant 0 : index
    %c0_158 = arith.constant 0 : index
    %137 = tpu.strided_load %arg19[%c0_156, %c0_157, %c0_158] {strides = array<i32: 1, 2, 1>} : memref<4x8x16xf32, #tpu.memory_space<vmem>>, vector<4x4x16xf32>
    %c0_159 = arith.constant 0 : index
    %c1_160 = arith.constant 1 : index
    %c0_161 = arith.constant 0 : index
    %138 = tpu.strided_load %arg19[%c0_159, %c1_160, %c0_161] {strides = array<i32: 1, 2, 1>} : memref<4x8x16xf32, #tpu.memory_space<vmem>>, vector<4x4x16xf32>
    %139 = arith.addf %137, %138 : vector<4x4x16xf32>
    %cst_162 = arith.constant 2.500000e-01 : f32
    %140 = vector.broadcast %cst_162 : f32 to vector<4x4x16xf32>
    %141 = arith.mulf %139, %140 : vector<4x4x16xf32>
    %142 = vector.shape_cast %141 : vector<4x4x16xf32> to vector<1x4x4x16xf32>
    %c0_163 = arith.constant 0 : index
    %c0_164 = arith.constant 0 : index
    %c0_165 = arith.constant 0 : index
    %c0_166 = arith.constant 0 : index
    %143 = vector.load %arg14[%c0_163, %c0_164, %c0_165, %c0_166] : memref<1x4x4x16xf32, #tpu.memory_space<vmem>>, vector<1x4x4x16xf32>
    tpu.vector_store %arg14[%c0_163, %c0_164, %c0_165, %c0_166], %142 {strides = array<i32>} : memref<1x4x4x16xf32, #tpu.memory_space<vmem>>, vector<1x4x4x16xf32>,
    return
  }
  func.func @transform_0(%arg0: i32) -> (i32, i32, i32, i32) {
    %c0_i32 = arith.constant 0 : i32
    %c0_i32_0 = arith.constant 0 : i32
    %c0_i32_1 = arith.constant 0 : i32
    %c0_i32_2 = arith.constant 0 : i32
    return %arg0, %c0_i32, %c0_i32_0, %c0_i32_1 : i32, i32, i32, i32
  }
  func.func @transform_1(%arg0: i32) -> (i32, i32) {
    %c0_i32 = arith.constant 0 : i32
    %c0_i32_0 = arith.constant 0 : i32
    %c0_i32_1 = arith.constant 0 : i32
    return %c0_i32, %c0_i32_0 : i32, i32
  }
  func.func @transform_2(%arg0: i32) -> (i32, i32) {
    %c0_i32 = arith.constant 0 : i32
    %c0_i32_0 = arith.constant 0 : i32
    %c0_i32_1 = arith.constant 0 : i32
    return %c0_i32, %c0_i32_0 : i32, i32
  }
  func.func @transform_3(%arg0: i32) -> (i32, i32) {
    %c0_i32 = arith.constant 0 : i32
    %c0_i32_0 = arith.constant 0 : i32
    %c0_i32_1 = arith.constant 0 : i32
    return %c0_i32, %c0_i32_0 : i32, i32
  }
  func.func @transform_4(%arg0: i32) -> (i32, i32) {
    %c0_i32 = arith.constant 0 : i32
    %c0_i32_0 = arith.constant 0 : i32
    %c0_i32_1 = arith.constant 0 : i32
    return %c0_i32, %c0_i32_0 : i32, i32
  }
  func.func @transform_5(%arg0: i32) -> (i32, i32) {
    %c0_i32 = arith.constant 0 : i32
    %c0_i32_0 = arith.constant 0 : i32
    %c0_i32_1 = arith.constant 0 : i32
    return %c0_i32, %c0_i32_0 : i32, i32
  }
  func.func @transform_6(%arg0: i32) -> (i32, i32) {
    %c0_i32 = arith.constant 0 : i32
    %c0_i32_0 = arith.constant 0 : i32
    %c0_i32_1 = arith.constant 0 : i32
    return %c0_i32, %c0_i32_0 : i32, i32
  }
  func.func @transform_7(%arg0: i32) -> (i32, i32) {
    %c0_i32 = arith.constant 0 : i32
    %c0_i32_0 = arith.constant 0 : i32
    %c0_i32_1 = arith.constant 0 : i32
    return %c0_i32, %c0_i32_0 : i32, i32
  }
  func.func @transform_8(%arg0: i32) -> (i32, i32) {
    %c0_i32 = arith.constant 0 : i32
    %c0_i32_0 = arith.constant 0 : i32
    %c0_i32_1 = arith.constant 0 : i32
    return %c0_i32, %c0_i32_0 : i32, i32
  }
  func.func @transform_9(%arg0: i32) -> (i32, i32) {
    %c0_i32 = arith.constant 0 : i32
    %c0_i32_0 = arith.constant 0 : i32
    %c0_i32_1 = arith.constant 0 : i32
    return %c0_i32, %c0_i32_0 : i32, i32
  }
  func.func @transform_10(%arg0: i32) -> (i32, i32) {
    %c0_i32 = arith.constant 0 : i32
    %c0_i32_0 = arith.constant 0 : i32
    %c0_i32_1 = arith.constant 0 : i32
    return %c0_i32, %c0_i32_0 : i32, i32
  }
  func.func @transform_11(%arg0: i32) -> (i32, i32) {
    %c0_i32 = arith.constant 0 : i32
    %c0_i32_0 = arith.constant 0 : i32
    %c0_i32_1 = arith.constant 0 : i32
    return %c0_i32, %c0_i32_0 : i32, i32
  }
  func.func @transform_12(%arg0: i32) -> (i32, i32) {
    %c0_i32 = arith.constant 0 : i32
    %c0_i32_0 = arith.constant 0 : i32
    %c0_i32_1 = arith.constant 0 : i32
    return %c0_i32, %c0_i32_0 : i32, i32
  }
  func.func @transform_13(%arg0: i32) -> (i32, i32, i32, i32) {
    %c0_i32 = arith.constant 0 : i32
    %c0_i32_0 = arith.constant 0 : i32
    %c0_i32_1 = arith.constant 0 : i32
    %c0_i32_2 = arith.constant 0 : i32
    return %arg0, %c0_i32, %c0_i32_0, %c0_i32_1 : i32, i32, i32, i32
  }
}

</mosaic_0001>

<bundles_post_ra>
// kernel: _lambda_.1
= control target key start
LH: loop header
LB: loop body
LE: loop exit
PB: predicated region body
PF: predicated region fallthrough
CT: control target
= control target key end

     0   :  { %s7245_s0 = inlined_call_operand.vmem [shape: bf16[2,16,16,3], index: 0, kind: input, shape index: {}]   ;;  %s7246_s1 = inlined_call_operand.vmem [shape: bf16[27,16], index: 1, kind: input, shape index: {}]   ;;  %s7247_s2 = inlined_call_operand.vmem [shape: f32[1,16], index: 2, kind: input, shape index: {}]   ;;  %s7248_s3 = inlined_call_operand.vmem [shape: bf16[16,16], index: 3, kind: input, shape index: {}]   ;;  %s7249_s4 = inlined_call_operand.vmem [shape: f32[1,16], index: 4, kind: input, shape index: {}]   ;;  %s7250_s5 = inlined_call_operand.vmem [shape: bf16[144,8], index: 5, kind: input, shape index: {}]   ;;  %s7251_s6 = inlined_call_operand.vmem [shape: f32[1,8], index: 6, kind: input, shape index: {}]   ;;  %s7252_s7 = inlined_call_operand.vmem [shape: bf16[24,16], index: 7, kind: input, shape index: {}]   ;;  %s7253_s8 = inlined_call_operand.vmem [shape: f32[1,16], index: 8, kind: input, shape index: {}]   ;;  %s7254_s9 = inlined_call_operand.vmem [shape: bf16[144,8], index: 9, kind: input, shape index: {}]   ;;  %s7255_s10 = inlined_call_operand.vmem [shape: f32[1,8], index: 10, kind: input, shape index: {}]   ;;  %s7256_s11 = inlined_call_operand.vmem [shape: bf16[32,16], index: 11, kind: input, shape index: {}]   ;;  %s7257_s12 = inlined_call_operand.vmem [shape: f32[1,16], index: 12, kind: input, shape index: {}]   ;;  %s7258_s13 = inlined_call_operand.hbm [shape: f32[2,4,4,16], index: 13, kind: output, shape index: {}]  }
   0x1   :  { %7283 = sst [smem:[#allocation10_spill]] %s7245_s0 }
   0x2   :  { %7284 = sst [smem:[#allocation11_spill]] %s7246_s1 }
   0x3   :  { %7285 = sst [smem:[#allocation12_spill]] %s7247_s2 }
   0x4   :  { %7286 = sst [smem:[#allocation13_spill]] %s7248_s3 }
   0x5   :  { %18 = vsyncpa [#allocation8], 0 }
   0x6   :  { %20 = vsyncpa [#allocation8 + $0x1], 0  ;;  %s5602_s25 = smov 0   ;;  %s5604_s26 = smov 0  }
   0x7   :  { %s5606_s27 = smov 0   ;;  %s5608_s28 = smov 0  }
   0x8 LB: > { %s5623_s29 = sadd.s32 4294967295, %s5510_s28   ;;  %s4175_s30 = sadd.s32 4294967294, %s5510_s28   ;;  %s5510_s28 = sphi %s5608_s28, %s7308_s28   ;;  %s5506_s27 = sphi %s5606_s27, %s7307_s27   ;;  %s5502_s26 = sphi %s5604_s26, %s7306_s26   ;;  %s5498_s25 = sphi %s5602_s25, %s7305_s25  }
   0x9   : > { %s5627_s14 = sadd.s32 1, %s5510_s28   ;;  %s311_s15 = sadd.s32 1, %s5506_s27 }
   0xa   : > { %s308_s16 = ssub.s32 %s5510_s28, %s5627_s14  ;;  %p321_p0 = scmp.ne.s32.totalorder %s5506_s27, %s5502_s26 }
   0xb   : > { %p309_p1 = scmp.eq.s32.totalorder %s308_s16, 0  ;;  %p322_p2 = scmp.eq.s32.totalorder %s5623_s29, 1 }
   0xc   : > { %p327_p3 = scmp.ne.s32.totalorder %s5502_s26, %s5498_s25  ;;  %p328_p4 = scmp.eq.s32.totalorder %s4175_s30, 1 }
   0xd   : > { %s5638_s17 = scalar_select %p309_p1, %s5506_s27, %s311_s15  }
   0xe   : > { %p5640_p5 = por %p322_p2, %p321_p0  ;;  %p5644_p6 = por %p328_p4, %p327_p3 }
   0xf   : > { %p4178_p7 = scmp.ge.s32.totalorder %s5510_s28, 1  ;;  %p390_p8 = scmp.lt.s32.totalorder %s5510_s28, 3 }
  0x11   : > { %p391_p9 = pnand %p4178_p7, %p390_p8 }
  0x12   : > { %p434_p10 = scmp.lt.s32.totalorder (!%p391_p9), %s5623_s29, 1  ;;  %s7289_s0 = sld [smem:[#allocation10_spill]] (!%p391_p9) }
  0x13   : > { %394 = sbr.rel (%p391_p9) target bundleno = 2258 (0x8d2), region = 72  ;;  %s7263_s30 = smov (!%p391_p9), 6  }
  0x14   : > { %s5514_s15 = smov (!%p391_p9), 3   ;;  %s7261_s16 = smov (!%p391_p9), 9  }
  0x15   : > { %s5519_s22 = smov (!%p391_p9), 18   ;;  %s7290_s1 = sld [smem:[#allocation11_spill]] (!%p391_p9) }
  0x16   : > { %s7293_s23 = smov (!%p391_p9), 12   ;;  %s7296_s3 = sld [smem:[#allocation13_spill]] (!%p391_p9) }
  0x17   : > { %s7297_s2 = sld [smem:[#allocation12_spill]] (!%p391_p9) }
  0x18   : > { %vm440_vm0 = vcmask 23552   ;;  %vm443_vm1 = vcmask 17408   ;;  %v5512_v0 = vmov 0.0   ;;  %s435_s20 = scalar_select %p434_p10, %s5623_s29, 1  ;;  %vm2256_vm2 = vcmask 1044480  }
  0x19   : > { %441 = vst.msk [vmem:[#allocation2] sm:$0xff] %vm440_vm0, %v5512_v0  ;;  %442 = vst.msk [vmem:[#allocation2 + $0x8] sm:$0xff] %vm440_vm0, %v5512_v0  ;;  %vm2257_vm3 = vcmask 1045504   ;;  %v5518_v58 = vmov 65535   ;;  %vm1938_vm4 = vcmask 48128   ;;  %vm1971_vm5 = vcmask 72704  }
  0x1a   : > { %444 = vst.msk [vmem:[#allocation2 + $0x10] sm:$0x3] %vm443_vm1, %v5512_v0  ;;  %447 = vst.msk [vmem:[#allocation2 + $0x28] sm:$0x3] %vm443_vm1, %v5512_v0  ;;  %s4254_s21 = sshll.u32 %s435_s20, 7  ;;  %s7259_s20 = smov 12  }
  0x1b   : > { %445 = vst.msk [vmem:[#allocation2 + $0x18] sm:$0xff] %vm440_vm0, %v5512_v0  ;;  %446 = vst.msk [vmem:[#allocation2 + $0x20] sm:$0xff] %vm440_vm0, %v5512_v0  ;;  %s5763_s24 = scalar_lea.vmem %s7289_s0, %s4254_s21  ;;  %s7265_s21 = smov 15   ;;  %v2258_v59 = vsel %vm2256_vm2, 4294967295, %v5518_v58  ;;  %vm2004_vm6 = vcmask 97280   ;;  %vm2037_vm7 = vcmask 121856  }
  0x1c   : > { %448 = vst.msk [vmem:[#allocation2 + $0x30] sm:$0xff] %vm440_vm0, %v5512_v0  ;;  %449 = vst.msk [vmem:[#allocation2 + $0x38] sm:$0xff] %vm440_vm0, %v5512_v0  ;;  %v4257_v1 = vld [vmem:[%s5763_s24] sm:$0xff]   ;;  %v4320_v2 = vld [vmem:[%s5763_s24 + $0x8] sm:$0xff]   ;;  %v2259_v62 = vsel %vm2257_vm3, %v2258_v59, 0  ;;  %s7295_s0 = smov 24  }
  0x1d   : > { %450 = vst.msk [vmem:[#allocation2 + $0x40] sm:$0x3] %vm443_vm1, %v5512_v0  ;;  %453 = vst.msk [vmem:[#allocation2 + $0x58] sm:$0x3] %vm443_vm1, %v5512_v0  ;;  %v4321_v3 = vld [vmem:[%s5763_s24 + $0x10] sm:$0xff]   ;;  %v4258_v7 = vunpack.c.l.bf16 %v4257_v1  ;;  %v4259_v8 = vunpack.c.h.bf16 %v4257_v1  ;;  %v4262_v9 = vunpack.c.l.bf16 %v4320_v2  ;;  %v4263_v10 = vunpack.c.h.bf16 %v4320_v2  ;;  %v4322_v15 = vld [vmem:[%s5763_s24 + $0x18] sm:$0xff]  }
  0x1e   : > { %451 = vst.msk [vmem:[#allocation2 + $0x48] sm:$0xff] %vm440_vm0, %v5512_v0  ;;  %452 = vst.msk [vmem:[#allocation2 + $0x50] sm:$0xff] %vm440_vm0, %v5512_v0  ;;  %v4266_v13 = vunpack.c.l.bf16 %v4321_v3  ;;  %v4267_v14 = vunpack.c.h.bf16 %v4321_v3  ;;  %v4323_v16 = vld [vmem:[%s5763_s24 + $0x20] sm:$0xff]   ;;  %v4270_v18 = vunpack.c.l.bf16 %v4322_v15  ;;  %v4271_v19 = vunpack.c.h.bf16 %v4322_v15  ;;  %v4324_v21 = vld [vmem:[%s5763_s24 + $0x28] sm:$0xff]  }
  0x1f   : > { %454 = vst.msk [vmem:[#allocation2 + $0x60] sm:$0xff] %vm440_vm0, %v5512_v0  ;;  %455 = vst.msk [vmem:[#allocation2 + $0x68] sm:$0xff] %vm440_vm0, %v5512_v0  ;;  %v4274_v20 = vunpack.c.l.bf16 %v4323_v16  ;;  %v4325_v22 = vld [vmem:[%s5763_s24 + $0x30] sm:$0xff]   ;;  %v4326_v23 = vld [vmem:[%s5763_s24 + $0x38] sm:$0xff]   ;;  %v4275_v24 = vunpack.c.h.bf16 %v4323_v16  ;;  %v4278_v25 = vunpack.c.l.bf16 %v4324_v21  ;;  %v4279_v26 = vunpack.c.h.bf16 %v4324_v21 }
  0x20   : > { %456 = vst.msk [vmem:[#allocation2 + $0x70] sm:$0x3] %vm443_vm1, %v5512_v0  ;;  %459 = vst.msk [vmem:[#allocation2 + $0x88] sm:$0x3] %vm443_vm1, %v5512_v0  ;;  %v657_v4 = vld [vmem:[#allocation2 + $0x2] sm:$0xff]  ;;  %v4282_v27 = vunpack.c.l.bf16 %v4325_v22  ;;  %v4283_v29 = vunpack.c.h.bf16 %v4325_v22  ;;  %v4286_v30 = vunpack.c.l.bf16 %v4326_v23  ;;  %v4287_v31 = vunpack.c.h.bf16 %v4326_v23  ;;  %v4329_v3 = vld [vmem:[%s5763_s24 + $0x50] sm:$0xff]  }
  0x21   : > { %457 = vst.msk [vmem:[#allocation2 + $0x78] sm:$0xff] %vm440_vm0, %v5512_v0  ;;  %458 = vst.msk [vmem:[#allocation2 + $0x80] sm:$0xff] %vm440_vm0, %v5512_v0  ;;  %v658_v5 = vld [vmem:[#allocation2 + $0xa] sm:$0xff]  ;;  %v625_v6 = vld [vmem:[#allocation2 + $0x1] sm:$0xff]  ;;  %vm2070_vm8 = vcmask 146432   ;;  %vm2103_vm9 = vcmask 171008  }
  0x22   : > { %460 = vst.msk [vmem:[#allocation2 + $0x90] sm:$0xff] %vm440_vm0, %v5512_v0  ;;  %461 = vst.msk [vmem:[#allocation2 + $0x98] sm:$0xff] %vm440_vm0, %v5512_v0  ;;  %v4504_v11 = vpack.i.bf16 %v658_v5, %v657_v4  ;;  %v626_v12 = vld [vmem:[#allocation2 + $0x9] sm:$0xff]  ;;  %v4327_v28 = vld [vmem:[%s5763_s24 + $0x40] sm:$0xff]   ;;  %v4298_v5 = vunpack.c.l.bf16 %v4329_v3  ;;  %vm2136_vm10 = vcmask 195584   ;;  %vm2207_vm11 = vcmask 220160  }
  0x23   : > { %462 = vst.msk [vmem:[#allocation2 + $0xa0] sm:$0x3] %vm443_vm1, %v5512_v0  ;;  %465 = vst.msk [vmem:[#allocation2 + $0xb8] sm:$0x3] %vm443_vm1, %v5512_v0  ;;  %v4499_v17 = vpack.i.bf16 %v626_v12, %v625_v6  ;;  %v4290_v32 = vunpack.c.l.bf16 %v4327_v28  ;;  %v4328_v33 = vld [vmem:[%s5763_s24 + $0x48] sm:$0xff]   ;;  %v4291_v34 = vunpack.c.h.bf16 %v4327_v28  ;;  %v5420_v2 = vld [vmem:[%s7290_s1] sm:$0xff]   ;;  %v4299_v6 = vunpack.c.h.bf16 %v4329_v3 }
  0x24   : > { %463 = vst.msk [vmem:[#allocation2 + $0xa8] sm:$0xff] %vm440_vm0, %v5512_v0  ;;  %464 = vst.msk [vmem:[#allocation2 + $0xb0] sm:$0xff] %vm440_vm0, %v5512_v0  ;;  %4505 = vrot.lane.b32.xlu1 %v4504_v11, %s7263_s30  ;;  %v4294_v35 = vunpack.c.l.bf16 %v4328_v33  ;;  %v4295_v36 = vunpack.c.h.bf16 %v4328_v33  ;;  %v5419_v1 = vld [vmem:[%s7290_s1 + $0x8] sm:$0x3f]   ;;  %vm2472_vm12 = vcmask 130048   ;;  %vm2537_vm13 = vcmask 123904  }
  0x25   : > { %466 = vst.msk [vmem:[#allocation2 + $0xc0] sm:$0xff] %vm440_vm0, %v5512_v0  ;;  %467 = vst.msk [vmem:[#allocation2 + $0xc8] sm:$0xff] %vm440_vm0, %v5512_v0  ;;  %4500 = vrot.lane.b32.xlu0 %v4499_v17, %s5514_s15  ;;  %v2261_v4 = vand.u32 %v5419_v1, %v2259_v62  ;;  %v4332_v33 = vld [vmem:[%s5763_s24 + $0x68] sm:$0xff]   ;;  %vm2983_vm14 = vcmask 261120   ;;  %vm2992_vm15 = vcmask 392192   ;;  %vm3019_vm2 = vcmask 785408  }
  0x26   : > { %468 = vst.msk [vmem:[#allocation2 + $0xd0] sm:$0x3] %vm443_vm1, %v5512_v0  ;;  %471 = vst.msk [vmem:[#allocation2 + $0xe8] sm:$0x3] %vm443_vm1, %v5512_v0  ;;  %vm3028_vm3 = vcmask 916480  }
  0x27   : > { %469 = vst.msk [vmem:[#allocation2 + $0xd8] sm:$0xff] %vm440_vm0, %v5512_v0  ;;  %470 = vst.msk [vmem:[#allocation2 + $0xe0] sm:$0xff] %vm440_vm0, %v5512_v0  ;;  %4370 = vmatprep.subr.bf16.mxu0 %v2261_v4 }
  0x28   : > { %472 = vst.msk [vmem:[#allocation2 + $0xf0] sm:$0xff] %vm440_vm0, %v5512_v0  ;;  %473 = vst.msk [vmem:[#allocation2 + $0xf8] sm:$0xff] %vm440_vm0, %v5512_v0  ;;  %4371 = vmatpush3.bf16.msra.mxu0 %v2261_v4 }
  0x29   : > { %474 = vst.msk [vmem:[#allocation2 + $0x100] sm:$0x3] %vm443_vm1, %v5512_v0  ;;  %477 = vst.msk [vmem:[#allocation2 + $0x118] sm:$0x3] %vm443_vm1, %v5512_v0  ;;  %4372 = vmatprep.subr.bf16.mxu0 %v5420_v2 }
  0x2a   : > { %475 = vst.msk [vmem:[#allocation2 + $0x108] sm:$0xff] %vm440_vm0, %v5512_v0  ;;  %476 = vst.msk [vmem:[#allocation2 + $0x110] sm:$0xff] %vm440_vm0, %v5512_v0 }
  0x2b   : > { %478 = vst.msk [vmem:[#allocation2 + $0x120] sm:$0xff] %vm440_vm0, %v5512_v0  ;;  %479 = vst.msk [vmem:[#allocation2 + $0x128] sm:$0xff] %vm440_vm0, %v5512_v0 }
  0x2c   : > { %480 = vst.msk [vmem:[#allocation2 + $0x130] sm:$0x3] %vm443_vm1, %v5512_v0  ;;  %483 = vst.msk [vmem:[#allocation2 + $0x148] sm:$0x3] %vm443_vm1, %v5512_v0  ;;  %4373 = vmatpush3.bf16.msra.mxu0 %v5420_v2 }
  0x2d   : > { %481 = vst.msk [vmem:[#allocation2 + $0x138] sm:$0xff] %vm440_vm0, %v5512_v0  ;;  %482 = vst.msk [vmem:[#allocation2 + $0x140] sm:$0xff] %vm440_vm0, %v5512_v0 }
  0x2e   : > { %484 = vst.msk [vmem:[#allocation2 + $0x150] sm:$0xff] %vm440_vm0, %v5512_v0  ;;  %485 = vst.msk [vmem:[#allocation2 + $0x158] sm:$0xff] %vm440_vm0, %v5512_v0 }
  0x2f   : > { %486 = vst.msk [vmem:[#allocation2 + $0x160] sm:$0x3] %vm443_vm1, %v5512_v0  ;;  %489 = vst.msk [vmem:[#allocation2 + $0x178] sm:$0x3] %vm443_vm1, %v5512_v0 }
  0x30   : > { %487 = vst.msk [vmem:[#allocation2 + $0x168] sm:$0xff] %vm440_vm0, %v5512_v0  ;;  %488 = vst.msk [vmem:[#allocation2 + $0x170] sm:$0xff] %vm440_vm0, %v5512_v0 }
  0x31   : > { %490 = vst.msk [vmem:[#allocation2 + $0x180] sm:$0xff] %vm440_vm0, %v5512_v0  ;;  %491 = vst.msk [vmem:[#allocation2 + $0x188] sm:$0xff] %vm440_vm0, %v5512_v0 }
  0x32   : > { %492 = vst.msk [vmem:[#allocation2 + $0x190] sm:$0x3] %vm443_vm1, %v5512_v0  ;;  %495 = vst.msk [vmem:[#allocation2 + $0x1a8] sm:$0x3] %vm443_vm1, %v5512_v0  ;;  %vm3010_vm1 = vcmask 654336  }
  0x33   : > { %493 = vst.msk [vmem:[#allocation2 + $0x198] sm:$0xff] %vm440_vm0, %v5512_v0  ;;  %494 = vst.msk [vmem:[#allocation2 + $0x1a0] sm:$0xff] %vm440_vm0, %v5512_v0 }
  0x34   : > { %561 = vst.msk [vmem:[#allocation2 + $0x19] sm:$0xff] %vm440_vm0, %v4258_v7  ;;  %562 = vst.msk [vmem:[#allocation2 + $0x21] sm:$0xff] %vm440_vm0, %v4259_v8 }
  0x35   : > { %563 = vst.msk [vmem:[#allocation2 + $0x31] sm:$0xff] %vm440_vm0, %v4262_v9  ;;  %564 = vst.msk [vmem:[#allocation2 + $0x39] sm:$0xff] %vm440_vm0, %v4263_v10  ;;  %v4330_v9 = vld [vmem:[%s5763_s24 + $0x58] sm:$0xff]  }
  0x36   : > { %565 = vst.msk [vmem:[#allocation2 + $0x49] sm:$0xff] %vm440_vm0, %v4266_v13  ;;  %566 = vst.msk [vmem:[#allocation2 + $0x51] sm:$0xff] %vm440_vm0, %v4267_v14  ;;  %v4302_v11 = vunpack.c.l.bf16 %v4330_v9  ;;  %v4303_v12 = vunpack.c.h.bf16 %v4330_v9 }
  0x37   : > { %567 = vst.msk [vmem:[#allocation2 + $0x61] sm:$0xff] %vm440_vm0, %v4270_v18  ;;  %568 = vst.msk [vmem:[#allocation2 + $0x69] sm:$0xff] %vm440_vm0, %v4271_v19  ;;  %v4331_v19 = vld [vmem:[%s5763_s24 + $0x60] sm:$0xff]  }
  0x38   : > { %569 = vst.msk [vmem:[#allocation2 + $0x79] sm:$0xff] %vm440_vm0, %v4274_v20  ;;  %570 = vst.msk [vmem:[#allocation2 + $0x81] sm:$0xff] %vm440_vm0, %v4275_v24  ;;  %v4306_v22 = vunpack.c.l.bf16 %v4331_v19  ;;  %v4307_v23 = vunpack.c.h.bf16 %v4331_v19 }
  0x39   : > { %571 = vst.msk [vmem:[#allocation2 + $0x91] sm:$0xff] %vm440_vm0, %v4278_v25  ;;  %572 = vst.msk [vmem:[#allocation2 + $0x99] sm:$0xff] %vm440_vm0, %v4279_v26 }
  0x3a   : > { %573 = vst.msk [vmem:[#allocation2 + $0xa9] sm:$0xff] %vm440_vm0, %v4282_v27  ;;  %574 = vst.msk [vmem:[#allocation2 + $0xb1] sm:$0xff] %vm440_vm0, %v4283_v29 }
  0x3b   : > { %575 = vst.msk [vmem:[#allocation2 + $0xc1] sm:$0xff] %vm440_vm0, %v4286_v30  ;;  %576 = vst.msk [vmem:[#allocation2 + $0xc9] sm:$0xff] %vm440_vm0, %v4287_v31  ;;  %v659_v37 = vld [vmem:[#allocation2 + $0x1a] sm:$0xff]  ;;  %v660_v38 = vld [vmem:[#allocation2 + $0x22] sm:$0xff] }
  0x3c   : > { %577 = vst.msk [vmem:[#allocation2 + $0xd9] sm:$0xff] %vm440_vm0, %v4290_v32  ;;  %578 = vst.msk [vmem:[#allocation2 + $0xe1] sm:$0xff] %vm440_vm0, %v4291_v34  ;;  %v627_v39 = vld [vmem:[#allocation2 + $0x19] sm:$0xff]  ;;  %v4514_v40 = vpack.i.bf16 %v660_v38, %v659_v37  ;;  %v628_v41 = vld [vmem:[#allocation2 + $0x21] sm:$0xff] }
  0x3d   : > { %579 = vst.msk [vmem:[#allocation2 + $0xf1] sm:$0xff] %vm440_vm0, %v4294_v35  ;;  %580 = vst.msk [vmem:[#allocation2 + $0xf9] sm:$0xff] %vm440_vm0, %v4295_v36  ;;  %v5797_v42 = vld [vmem:[#allocation2 + $0x30] sm:$0xff]  ;;  %v5799_v43 = vld [vmem:[#allocation2 + $0x38] sm:$0xff]  ;;  %v4509_v44 = vpack.i.bf16 %v628_v41, %v627_v39  ;;  %v4310_v35 = vunpack.c.l.bf16 %v4332_v33  ;;  %v4311_v36 = vunpack.c.h.bf16 %v4332_v33 }
  0x3e   : > { %v5801_v45 = vld [vmem:[#allocation2 + $0x18] sm:$0xff]  ;;  %v5803_v46 = vld [vmem:[#allocation2 + $0x20] sm:$0xff]  ;;  %4515 = vrot.lane.b32.xlu1 %v4514_v40, %s7263_s30  ;;  %v4524_v47 = vpack.i.bf16 %v5799_v43, %v5797_v42  ;;  %v5815_v55 = vld [vmem:[#allocation2 + $0x48] sm:$0xff]  ;;  %581 = vst.msk [vmem:[#allocation2 + $0x109] sm:$0xff] %vm440_vm0, %v4298_v5  ;;  %s7267_s30 = smov 24  }
  0x3f   : > { %4510 = vrot.lane.b32.xlu0 %v4509_v44, %s5514_s15  ;;  %v4519_v48 = vpack.i.bf16 %v5803_v46, %v5801_v45  ;;  %v723_v49 = vld [vmem:[#allocation2 + $0x31] sm:$0xff]  ;;  %v724_v50 = vld [vmem:[#allocation2 + $0x39] sm:$0xff]  ;;  %v820_v60 = vld [vmem:[#allocation2 + $0x49] sm:$0xff]  ;;  %582 = vst.msk [vmem:[#allocation2 + $0x111] sm:$0xff] %vm440_vm0, %v4299_v6 }
  0x40   : > { %v4534_v51 = vpack.i.bf16 %v724_v50, %v723_v49  ;;  %v755_v52 = vld [vmem:[#allocation2 + $0x32] sm:$0xff]  ;;  %v756_v53 = vld [vmem:[#allocation2 + $0x3a] sm:$0xff]  ;;  %v852_v7 = vld [vmem:[#allocation2 + $0x4a] sm:$0xff]  ;;  %583 = vst.msk [vmem:[#allocation2 + $0x121] sm:$0xff] %vm440_vm0, %v4302_v11 }
  0x41   : > { %v4544_v54 = vpack.i.bf16 %v756_v53, %v755_v52  ;;  %v5817_v56 = vld [vmem:[#allocation2 + $0x50] sm:$0xff]  ;;  %584 = vst.msk [vmem:[#allocation2 + $0x129] sm:$0xff] %vm440_vm0, %v4303_v12  ;;  %v5843_v13 = vld [vmem:[#allocation2 + $0x60] sm:$0xff]  ;;  %v5845_v14 = vld [vmem:[#allocation2 + $0x68] sm:$0xff] }
  0x42   : > { %4525 = vrot.lane.b32.xlu1 %v4524_v47, %s7261_s16  ;;  %v4554_v57 = vpack.i.bf16 %v5817_v56, %v5815_v55  ;;  %v821_v61 = vld [vmem:[#allocation2 + $0x51] sm:$0xff]  ;;  %v4604_v15 = vpack.i.bf16 %v5845_v14, %v5843_v13  ;;  %v727_v16 = vld [vmem:[#allocation2 + $0x61] sm:$0xff]  ;;  %v728_v17 = vld [vmem:[#allocation2 + $0x69] sm:$0xff]  ;;  %585 = vst.msk [vmem:[#allocation2 + $0x139] sm:$0xff] %vm440_vm0, %v4306_v22 }
  0x43   : > { %4520 = vrot.lane.b32.xlu0 %v4519_v48, %s7261_s16  ;;  %v4564_v63 = vpack.i.bf16 %v821_v61, %v820_v60  ;;  %v853_v8 = vld [vmem:[#allocation2 + $0x52] sm:$0xff]  ;;  %s7291_s16 = smov 6   ;;  %v4614_v18 = vpack.i.bf16 %v728_v17, %v727_v16  ;;  %v759_v20 = vld [vmem:[#allocation2 + $0x62] sm:$0xff]  ;;  %v760_v21 = vld [vmem:[#allocation2 + $0x6a] sm:$0xff]  ;;  %586 = vst.msk [vmem:[#allocation2 + $0x141] sm:$0xff] %vm440_vm0, %v4307_v23 }
  0x44   : > { %v4579_v10 = vpack.i.bf16 %v853_v8, %v852_v7  ;;  %v4624_v24 = vpack.i.bf16 %v760_v21, %v759_v20  ;;  %v5858_v25 = vld [vmem:[#allocation2 + $0x78] sm:$0xff]  ;;  %v5860_v26 = vld [vmem:[#allocation2 + $0x80] sm:$0xff]  ;;  %587 = vst.msk [vmem:[#allocation2 + $0x151] sm:$0xff] %vm440_vm0, %v4310_v35  ;;  %588 = vst.msk [vmem:[#allocation2 + $0x159] sm:$0xff] %vm440_vm0, %v4311_v36 }
  0x45   : > { %v4634_v27 = vpack.i.bf16 %v5860_v26, %v5858_v25  ;;  %v824_v28 = vld [vmem:[#allocation2 + $0x79] sm:$0xff]  ;;  %v825_v29 = vld [vmem:[#allocation2 + $0x81] sm:$0xff]  ;;  %v699_v37 = vld [vmem:[#allocation2 + $0x90] sm:$0xff]  ;;  %2536 = vst.msk [vmem:[#allocation5] sm:$0xff] %vm2472_vm12, %v5512_v0 }
  0x46   : > { %4535 = vrot.lane.b32.xlu1 %v4534_v51, %s7259_s20  ;;  %v4644_v30 = vpack.i.bf16 %v825_v29, %v824_v28  ;;  %v856_v31 = vld [vmem:[#allocation2 + $0x7a] sm:$0xff]  ;;  %v857_v32 = vld [vmem:[#allocation2 + $0x82] sm:$0xff]  ;;  %v763_v48 = vld [vmem:[#allocation2 + $0x92] sm:$0xff]  ;;  %2539 = vst.msk [vmem:[#allocation5 + $0x10] sm:$0xff] %vm2472_vm12, %v5512_v0 }
  0x47   : > { %4530 = vrot.lane.b32.xlu0 %v4509_v44, %s7259_s20  ;;  %s7292_s20 = smov 9   ;;  %v4659_v34 = vpack.i.bf16 %v857_v32, %v856_v31  ;;  %v700_v38 = vld [vmem:[#allocation2 + $0x98] sm:$0xff]  ;;  %v796_v53 = vld [vmem:[#allocation2 + $0xa8] sm:$0xff]  ;;  %v703_v4 = vld [vmem:[#allocation2 + $0xc0] sm:$0xff]  ;;  %2541 = vst.msk [vmem:[#allocation5 + $0x20] sm:$0xff] %vm2472_vm12, %v5512_v0 }
  0x48   : > { %v4684_v39 = vpack.i.bf16 %v700_v38, %v699_v37  ;;  %v732_v41 = vld [vmem:[#allocation2 + $0x99] sm:$0xff]  ;;  %v828_v58 = vld [vmem:[#allocation2 + $0xa9] sm:$0xff]  ;;  %v829_v59 = vld [vmem:[#allocation2 + $0xb1] sm:$0xff]  ;;  %2543 = vst.msk [vmem:[#allocation5 + $0x30] sm:$0xff] %vm2472_vm12, %v5512_v0 }
  0x49   : > { %v764_v49 = vld [vmem:[#allocation2 + $0x9a] sm:$0xff]  ;;  %v4724_v60 = vpack.i.bf16 %v829_v59, %v828_v58  ;;  %v860_v61 = vld [vmem:[#allocation2 + $0xaa] sm:$0xff]  ;;  %v861_v62 = vld [vmem:[#allocation2 + $0xb2] sm:$0xff]  ;;  %2545 = vst.msk [vmem:[#allocation5 + $0x40] sm:$0xff] %vm2472_vm12, %v5512_v0 }
  0x4a   : > { %4545 = vrot.lane.b32.xlu1 %v4544_v54, %s7265_s21  ;;  %v4704_v52 = vpack.i.bf16 %v764_v49, %v763_v48  ;;  %v4739_v1 = vpack.i.bf16 %v861_v62, %v860_v61  ;;  %v704_v5 = vld [vmem:[#allocation2 + $0xc8] sm:$0xff]  ;;  %v801_v16 = vld [vmem:[#allocation2 + $0xe0] sm:$0xff]  ;;  %v708_v35 = vld [vmem:[#allocation2 + $0xf8] sm:$0xff]  ;;  %2547 = vst.msk [vmem:[#allocation5 + $0x50] sm:$0xff] %vm2472_vm12, %v5512_v0 }
  0x4b   : > { %4540 = vrot.lane.b32.xlu0 %v4514_v40, %s7265_s21  ;;  %s5520_s21 = smov 21   ;;  %v731_v40 = vld [vmem:[#allocation2 + $0x91] sm:$0xff]  ;;  %v4764_v6 = vpack.i.bf16 %v704_v5, %v703_v4  ;;  %v735_v7 = vld [vmem:[#allocation2 + $0xc1] sm:$0xff]  ;;  %v736_v8 = vld [vmem:[#allocation2 + $0xc9] sm:$0xff]  ;;  %2549 = vst.msk [vmem:[#allocation5 + $0x60] sm:$0xff] %vm2472_vm12, %v5512_v0 }
  0x4c   : > { %v4694_v44 = vpack.i.bf16 %v732_v41, %v731_v40  ;;  %v4774_v9 = vpack.i.bf16 %v736_v8, %v735_v7  ;;  %v768_v11 = vld [vmem:[#allocation2 + $0xca] sm:$0xff]  ;;  %v832_v20 = vld [vmem:[#allocation2 + $0xd9] sm:$0xff]  ;;  %v833_v21 = vld [vmem:[#allocation2 + $0xe1] sm:$0xff]  ;;  %2551 = vst.msk [vmem:[#allocation5 + $0x70] sm:$0xff] %vm2472_vm12, %v5512_v0 }
  0x4d   : > { %v5913_v22 = vpack.i.bf16 %v833_v21, %v832_v20  ;;  %v864_v28 = vld [vmem:[#allocation2 + $0xda] sm:$0xff]  ;;  %v865_v29 = vld [vmem:[#allocation2 + $0xe2] sm:$0xff]  ;;  %2553 = vst.msk [vmem:[#allocation5 + $0x80] sm:$0xff] %vm2472_vm12, %v5512_v0  ;;  %2555 = vst.msk [vmem:[#allocation5 + $0x90] sm:$0xff] %vm2472_vm12, %v5512_v0 }
  0x4e   : > { %4555 = vrot.lane.b32.xlu1 %v4554_v57, %s5519_s22  ;;  %v5927_v31 = vpack.i.bf16 %v865_v29, %v864_v28  ;;  %v593_v40 = vld [vmem:[#allocation2] sm:$0xff]  ;;  %v804_v62 = vld [vmem:[#allocation2 + $0x108] sm:$0xff]  ;;  %2544 = vst.msk [vmem:[#allocation5 + $0x38] sm:$0x3] %vm2537_vm13, %v5512_v0  ;;  %2538 = vst.msk [vmem:[#allocation5 + $0x8] sm:$0x3] %vm2537_vm13, %v5512_v0 }
  0x4f   : > { %4550 = vrot.lane.b32.xlu0 %v4524_v47, %s5519_s22  ;;  %v4333_v47 = vld [vmem:[%s5763_s24 + $0x70] sm:$0xff]   ;;  %v772_v61 = vld [vmem:[#allocation2 + $0xfa] sm:$0xff]  ;;  %2540 = vst.msk [vmem:[#allocation5 + $0x18] sm:$0x3] %vm2537_vm13, %v5512_v0  ;;  %2542 = vst.msk [vmem:[#allocation5 + $0x28] sm:$0x3] %vm2537_vm13, %v5512_v0 }
  0x50   : > { %v4314_v50 = vunpack.c.l.bf16 %v4333_v47  ;;  %2546 = vst.msk [vmem:[#allocation5 + $0x48] sm:$0x3] %vm2537_vm13, %v5512_v0  ;;  %2548 = vst.msk [vmem:[#allocation5 + $0x58] sm:$0x3] %vm2537_vm13, %v5512_v0 }
  0x51   : > { %2550 = vst.msk [vmem:[#allocation5 + $0x68] sm:$0x3] %vm2537_vm13, %v5512_v0  ;;  %2552 = vst.msk [vmem:[#allocation5 + $0x78] sm:$0x3] %vm2537_vm13, %v5512_v0 }
  0x52   : > { %4565 = vrot.lane.b32.xlu1 %v4564_v63, %s5520_s21  ;;  %589 = vst.msk [vmem:[#allocation2 + $0x169] sm:$0xff] %vm440_vm0, %v4314_v50 }
  0x53   : > { %4560 = vrot.lane.b32.xlu0 %v4534_v51, %s5520_s21  ;;  %2554 = vst.msk [vmem:[#allocation5 + $0x88] sm:$0x3] %vm2537_vm13, %v5512_v0  ;;  %2556 = vst.msk [vmem:[#allocation5 + $0x98] sm:$0x3] %vm2537_vm13, %v5512_v0 }
  0x56   : > { %4575 = vrot.lane.b32.xlu1 %v4534_v51, %s5514_s15  ;;  %v4315_v51 = vunpack.c.h.bf16 %v4333_v47 }
  0x57   : > { %4570 = vrot.lane.b32.xlu0 %v4544_v54, %s7267_s30 }
  0x58   : > { %590 = vst.msk [vmem:[#allocation2 + $0x171] sm:$0xff] %vm440_vm0, %v4315_v51  ;;  %v739_v51 = vld [vmem:[#allocation2 + $0xf1] sm:$0xff] }
  0x5a   : > { %4585 = vrot.lane.b32.xlu1 %v4564_v63, %s5514_s15 }
  0x5b   : > { %4580 = vrot.lane.b32.xlu0 %v4579_v10, %s7267_s30  ;;  %s7294_s30 = smov 15  }
  0x5e   : > { %4595 = vrot.lane.b32.xlu1 %v4579_v10, %s7291_s16 }
  0x5f   : > { %4590 = vrot.lane.b32.xlu0 %v4544_v54, %s7291_s16  ;;  %v797_v54 = vld [vmem:[#allocation2 + $0xb0] sm:$0xff] }
  0x62   : > { %4605 = vrot.lane.b32.xlu1 %v4604_v15, %s7292_s20 }
  0x63   : > { %4600 = vrot.lane.b32.xlu0 %v4554_v57, %s7292_s20  ;;  %v4714_v57 = vpack.i.bf16 %v797_v54, %v796_v53  ;;  %v771_v53 = vld [vmem:[#allocation2 + $0xf2] sm:$0xff] }
  0x66   : > { %4615 = vrot.lane.b32.xlu1 %v4614_v18, %s7293_s23 }
  0x67   : > { %4610 = vrot.lane.b32.xlu0 %v4564_v63, %s7293_s23  ;;  %v4334_v63 = vld [vmem:[%s5763_s24 + $0x78] sm:$0xff]   ;;  %s7277_s24 = smov 48  }
  0x68   : > { %v4318_v2 = vunpack.c.l.bf16 %v4334_v63  ;;  %v4319_v3 = vunpack.c.h.bf16 %v4334_v63  ;;  %v805_v63 = vld [vmem:[#allocation2 + $0x110] sm:$0xff] }
  0x6a   : > { %4625 = vrot.lane.b32.xlu1 %v4624_v24, %s7294_s30  ;;  %591 = vst.msk [vmem:[#allocation2 + $0x181] sm:$0xff] %vm440_vm0, %v4318_v2  ;;  %592 = vst.msk [vmem:[#allocation2 + $0x189] sm:$0xff] %vm440_vm0, %v4319_v3 }
  0x6b   : > { %4620 = vrot.lane.b32.xlu0 %v4579_v10, %s7294_s30  ;;  %v767_v10 = vld [vmem:[#allocation2 + $0xc2] sm:$0xff] }
  0x6c   : > { %v4784_v12 = vpack.i.bf16 %v768_v11, %v767_v10  ;;  %v5972_v10 = vpack.i.bf16 %v805_v63, %v804_v62 }
  0x6e   : > { %4635 = vrot.lane.b32.xlu1 %v4634_v27, %s5519_s22 }
  0x6f   : > { %4630 = vrot.lane.b32.xlu0 %v4604_v15, %s5519_s22  ;;  %v800_v15 = vld [vmem:[#allocation2 + $0xd8] sm:$0xff] }
  0x72   : > { %4645 = vrot.lane.b32.xlu1 %v4644_v30, %s5520_s21 }
  0x73   : > { %4640 = vrot.lane.b32.xlu0 %v4614_v18, %s5520_s21 }
  0x76   : > { %4655 = vrot.lane.b32.xlu1 %v4614_v18, %s5514_s15  ;;  %v5908_v18 = vpack.i.bf16 %v801_v16, %v800_v15 }
  0x77   : > { %4650 = vrot.lane.b32.xlu0 %v4624_v24, %s7295_s0 }
  0x7a   : > { %4665 = vrot.lane.b32.xlu1 %v4644_v30, %s5514_s15 }
  0x7b   : > { %4660 = vrot.lane.b32.xlu0 %v4659_v34, %s7295_s0 }
  0x7e   : > { %4675 = vrot.lane.b32.xlu1 %v4659_v34, %s7291_s16 }
  0x7f   : > { %4670 = vrot.lane.b32.xlu0 %v4624_v24, %s7291_s16 }
  0x82   : > { %4685 = vrot.lane.b32.xlu1 %v4684_v39, %s7292_s20 }
  0x83   : > { %4680 = vrot.lane.b32.xlu0 %v4634_v27, %s7292_s20 }
  0x86   : > { %4695 = vrot.lane.b32.xlu1 %v4694_v44, %s7293_s23 }
  0x87   : > { %4690 = vrot.lane.b32.xlu0 %v4644_v30, %s7293_s23 }
  0x8a   : > { %4705 = vrot.lane.b32.xlu1 %v4704_v52, %s7294_s30 }
  0x8b   : > { %4700 = vrot.lane.b32.xlu0 %v4659_v34, %s7294_s30  ;;  %v707_v34 = vld [vmem:[#allocation2 + $0xf0] sm:$0xff] }
  0x8c   : > { %v5943_v48 = vpack.i.bf16 %v708_v35, %v707_v34 }
  0x8e   : > { %4715 = vrot.lane.b32.xlu1 %v4714_v57, %s5519_s22 }
  0x8f   : > { %4710 = vrot.lane.b32.xlu0 %v4684_v39, %s5519_s22  ;;  %v594_v39 = vld [vmem:[#allocation2 + $0x8] sm:$0xff] }
  0x92   : > { %4725 = vrot.lane.b32.xlu1 %v4724_v60, %s5520_s21 }
  0x93   : > { %4720 = vrot.lane.b32.xlu0 %v4694_v44, %s5520_s21 }
  0x96   : > { %4735 = vrot.lane.b32.xlu1 %v4694_v44, %s5514_s15  ;;  %v5906_v17 = vpop.permute.xlu1 %4505 }
  0x97   : > { %4730 = vrot.lane.b32.xlu0 %v4704_v52, %s7295_s0  ;;  %v4501_v19 = vpop.permute.xlu0 %4500  ;;  %v4508_v49 = vunpack.i.h.bf16 %v5906_v17  ;;  %v4507_v50 = vunpack.i.l.bf16 %v5906_v17 }
  0x98   : > { %v4503_v36 = vunpack.i.h.bf16 %v4501_v19  ;;  %v4502_v37 = vunpack.i.l.bf16 %v4501_v19 }
  0x9a   : > { %4745 = vrot.lane.b32.xlu1 %v4724_v60, %s5514_s15  ;;  %v1907_v54 = vsel %vm440_vm0, %v594_v39, %v4503_v36 }
  0x9b   : > { %4740 = vrot.lane.b32.xlu0 %v4739_v1, %s7295_s0 }
  0x9e   : > { %4755 = vrot.lane.b32.xlu1 %v4739_v1, %s7291_s16 }
  0x9f   : > { %4750 = vrot.lane.b32.xlu0 %v4704_v52, %s7291_s16  ;;  %v740_v52 = vld [vmem:[#allocation2 + $0xf9] sm:$0xff] }
  0xa0   : > { %v5964_v8 = vpack.i.bf16 %v740_v52, %v739_v51 }
  0xa2   : > { %4765 = vrot.lane.b32.xlu1 %v4764_v6, %s7292_s20 }
  0xa3   : > { %4760 = vrot.lane.b32.xlu0 %v4714_v57, %s7292_s20  ;;  %v1906_v57 = vsel %vm440_vm0, %v593_v40, %v4502_v37 }
  0xa6   : > { %4775 = vrot.lane.b32.xlu1 %v4774_v9, %s7293_s23 }
  0xa7   : > { %4770 = vrot.lane.b32.xlu0 %v4724_v60, %s7293_s23 }
  0xaa   : > { %4785 = vrot.lane.b32.xlu1 %v4784_v12, %s7294_s30 }
  0xab   : > { %4780 = vrot.lane.b32.xlu0 %v4739_v1, %s7294_s30 }
  0xae   : > { %4795 = vrot.lane.b32.xlu1 %v5908_v18, %s5519_s22 }
  0xaf   : > { %4790 = vrot.lane.b32.xlu0 %v4764_v6, %s5519_s22 }
  0xb0   : > { %v5916_v23 = vpop.permute.xlu1 %4515 }
  0xb1   : > { %v4511_v24 = vpop.permute.xlu0 %4510  ;;  %v4518_v58 = vunpack.i.h.bf16 %v5916_v23  ;;  %v4517_v59 = vunpack.i.l.bf16 %v5916_v23 }
  0xb2   : > { %4805 = vrot.lane.b32.xlu1 %v5913_v22, %s5520_s21  ;;  %v4513_v41 = vunpack.i.h.bf16 %v4511_v24  ;;  %v4512_v44 = vunpack.i.l.bf16 %v4511_v24 }
  0xb3   : > { %4800 = vrot.lane.b32.xlu0 %v4774_v9, %s5520_s21 }
  0xb4   : > { %v5921_v27 = vpop.permute.xlu1 %4525  ;;  %v1908_v1 = vsel %vm440_vm0, %v5801_v45, %v4512_v44  ;;  %v1909_v2 = vsel %vm440_vm0, %v5803_v46, %v4513_v41  ;;  %v1939_v45 = vsel %vm1938_vm4, %v1906_v57, %v4507_v50  ;;  %v5970_v46 = vpack.i.bf16 %v772_v61, %v771_v53  ;;  %v836_v53 = vld [vmem:[#allocation2 + $0x109] sm:$0xff] }
  0xb5   : > { %v5923_v30 = vpop.permute.xlu0 %4520  ;;  %v4528_v3 = vunpack.i.h.bf16 %v5921_v27  ;;  %v4527_v4 = vunpack.i.l.bf16 %v5921_v27  ;;  %v1941_v11 = vsel %vm1938_vm4, %v1908_v1, %v4517_v59 }
  0xb6   : > { %4815 = vrot.lane.b32.xlu1 %v4774_v9, %s5514_s15  ;;  %v4523_v6 = vunpack.i.h.bf16 %v5923_v30  ;;  %v4522_v7 = vunpack.i.l.bf16 %v5923_v30  ;;  %v1940_v9 = vsel %vm1938_vm4, %v1907_v54, %v4508_v49  ;;  %v837_v54 = vld [vmem:[#allocation2 + $0x111] sm:$0xff] }
  0xb7   : > { %4810 = vrot.lane.b32.xlu0 %v4784_v12, %s7295_s0  ;;  %v1974_v19 = vsel %vm1971_vm5, %v1941_v11, %v4527_v4 }
  0xb8   : > { %v5929_v32 = vpop.permute.xlu1 %4535  ;;  %v1973_v24 = vsel %vm1971_vm5, %v1940_v9, %v4523_v6  ;;  %v1972_v27 = vsel %vm1971_vm5, %v1939_v45, %v4522_v7  ;;  %v6016_v6 = vpack.i.bf16 %v837_v54, %v836_v53 }
  0xb9   : > { %v5931_v33 = vpop.permute.xlu0 %4530  ;;  %v4538_v30 = vunpack.i.h.bf16 %v5929_v32 }
  0xba   : > { %4825 = vrot.lane.b32.xlu1 %v5913_v22, %s5514_s15  ;;  %v4533_v15 = vunpack.i.h.bf16 %v5931_v33  ;;  %v4532_v16 = vunpack.i.l.bf16 %v5931_v33  ;;  %v4537_v33 = vunpack.i.l.bf16 %v5929_v32 }
  0xbb   : > { %4820 = vrot.lane.b32.xlu0 %v5927_v31, %s7295_s0 }
  0xbc   : > { %v5937_v38 = vpop.permute.xlu1 %4545  ;;  %v2005_v36 = vsel %vm2004_vm6, %v1972_v27, %v4532_v16  ;;  %v2006_v37 = vsel %vm2004_vm6, %v1973_v24, %v4533_v15  ;;  %v2007_v61 = vsel %vm2004_vm6, %v1974_v19, %v4537_v33  ;;  %v712_v33 = vld [vmem:[#allocation2 + $0x128] sm:$0xff] }
  0xbd   : > { %v5939_v47 = vpop.permute.xlu0 %4540  ;;  %v4548_v39 = vunpack.i.h.bf16 %v5937_v38  ;;  %v4547_v40 = vunpack.i.l.bf16 %v5937_v38 }
  0xbe   : > { %4835 = vrot.lane.b32.xlu1 %v5927_v31, %s7291_s16  ;;  %v4542_v21 = vunpack.i.l.bf16 %v5939_v47 }
  0xbf   : > { %4830 = vrot.lane.b32.xlu0 %v4784_v12, %s7291_s16  ;;  %v1942_v12 = vsel %vm1938_vm4, %v1909_v2, %v4518_v58 }
  0xc0   : > { %v5952_v60 = vpop.permute.xlu1 %4555  ;;  %v1975_v20 = vsel %vm1971_vm5, %v1942_v12, %v4528_v3  ;;  %v2038_v44 = vsel %vm2037_vm7, %v2005_v36, %v4542_v21  ;;  %v2040_v3 = vsel %vm2037_vm7, %v2007_v61, %v4547_v40  ;;  %v744_v36 = vld [vmem:[#allocation2 + $0x129] sm:$0xff] }
  0xc1   : > { %v4551_v5 = vpop.permute.xlu0 %4550  ;;  %v4558_v32 = vunpack.i.h.bf16 %v5952_v60  ;;  %v4557_v49 = vunpack.i.l.bf16 %v5952_v60  ;;  %v2008_v62 = vsel %vm2004_vm6, %v1975_v20, %v4538_v30  ;;  %v711_v30 = vld [vmem:[#allocation2 + $0x120] sm:$0xff] }
  0xc2   : > { %4845 = vrot.lane.b32.xlu1 %v5943_v48, %s7292_s20  ;;  %v4553_v28 = vunpack.i.h.bf16 %v4551_v5  ;;  %v4552_v29 = vunpack.i.l.bf16 %v4551_v5  ;;  %v2041_v4 = vsel %vm2037_vm7, %v2008_v62, %v4548_v39 }
  0xc3   : > { %4840 = vrot.lane.b32.xlu0 %v5908_v18, %s7292_s20  ;;  %v4543_v18 = vunpack.i.h.bf16 %v5939_v47  ;;  %v2073_v7 = vsel %vm2070_vm8, %v2040_v3, %v4557_v49  ;;  %v2074_v45 = vsel %vm2070_vm8, %v2041_v4, %v4558_v32  ;;  %v808_v32 = vld [vmem:[#allocation2 + $0x138] sm:$0xff]  ;;  %v809_v49 = vld [vmem:[#allocation2 + $0x140] sm:$0xff] }
  0xc4   : > { %v4566_v17 = vpop.permute.xlu1 %4565  ;;  %v2071_v52 = vsel %vm2070_vm8, %v2038_v44, %v4552_v29  ;;  %v6056_v44 = vpack.i.bf16 %v712_v33, %v711_v30  ;;  %v6068_v62 = vpack.i.bf16 %v809_v49, %v808_v32 }
  0xc5   : > { %v4561_v23 = vpop.permute.xlu0 %4560  ;;  %v2039_v47 = vsel %vm2037_vm7, %v2006_v37, %v4543_v18  ;;  %v4568_v57 = vunpack.i.h.bf16 %v4566_v17  ;;  %v4567_v58 = vunpack.i.l.bf16 %v4566_v17  ;;  %v775_v37 = vld [vmem:[#allocation2 + $0x122] sm:$0xff] }
  0xc6   : > { %4855 = vrot.lane.b32.xlu1 %v5964_v8, %s7293_s23  ;;  %v4563_v34 = vunpack.i.h.bf16 %v4561_v23  ;;  %v4562_v35 = vunpack.i.l.bf16 %v4561_v23  ;;  %v2072_v38 = vsel %vm2070_vm8, %v2039_v47, %v4553_v28  ;;  %v868_v23 = vld [vmem:[#allocation2 + $0x10a] sm:$0xff] }
  0xc7   : > { %4850 = vrot.lane.b32.xlu0 %v5913_v22, %s7293_s23  ;;  %v2106_v12 = vsel %vm2103_vm9, %v2073_v7, %v4567_v58  ;;  %v2107_v15 = vsel %vm2103_vm9, %v2074_v45, %v4568_v57  ;;  %v776_v47 = vld [vmem:[#allocation2 + $0x12a] sm:$0xff] }
  0xc8   : > { %v5994_v41 = vpop.permute.xlu1 %4575  ;;  %v2104_v59 = vsel %vm2103_vm9, %v2071_v52, %v4562_v35  ;;  %v2105_v60 = vsel %vm2103_vm9, %v2072_v38, %v4563_v34  ;;  %v743_v35 = vld [vmem:[#allocation2 + $0x121] sm:$0xff]  ;;  %v6066_v61 = vpack.i.bf16 %v776_v47, %v775_v37 }
  0xc9   : > { %v4571_v50 = vpop.permute.xlu0 %4570  ;;  %v6064_v57 = vpack.i.bf16 %v744_v36, %v743_v35  ;;  %v841_v47 = vld [vmem:[#allocation2 + $0x141] sm:$0xff] }
  0xca   : > { %v4573_v22 = vunpack.i.h.bf16 %v4571_v50  ;;  %v4572_v51 = vunpack.i.l.bf16 %v4571_v50  ;;  %4865 = vrot.lane.b32.xlu1 %v5970_v46, %s7294_s30  ;;  %v4578_v50 = vunpack.i.h.bf16 %v5994_v41 }
  0xcb   : > { %4860 = vrot.lane.b32.xlu0 %v5927_v31, %s7294_s30 }
  0xcc   : > { %v6010_v63 = vpop.permute.xlu1 %4585  ;;  %v2137_v1 = vsel %vm2136_vm10, %v2104_v59, %v4572_v51  ;;  %v2138_v2 = vsel %vm2136_vm10, %v2105_v60, %v4573_v22  ;;  %v4577_v22 = vunpack.i.l.bf16 %v5994_v41 }
  0xcd   : > { %v4581_v5 = vpop.permute.xlu0 %4580  ;;  %v2169_v31 = vpack.c.bf16 %v2138_v2, %v2137_v1  ;;  %v4588_v39 = vunpack.i.h.bf16 %v6010_v63  ;;  %v4587_v40 = vunpack.i.l.bf16 %v6010_v63  ;;  %v1911_v2 = vsel %vm440_vm0, %v5799_v43, %v4578_v50 }
  0xce   : > { %v4583_v9 = vunpack.i.h.bf16 %v4581_v5  ;;  %v4582_v11 = vunpack.i.l.bf16 %v4581_v5  ;;  %4875 = vrot.lane.b32.xlu1 %v5972_v10, %s5519_s22  ;;  %v1910_v3 = vsel %vm440_vm0, %v5797_v42, %v4577_v22 }
  0xcf   : > { %4870 = vrot.lane.b32.xlu0 %v5943_v48, %s5519_s22  ;;  %4374 = vmatprep.mubr.msk.bf16.mxu0 %vm2207_vm11, %v2169_v31  ;;  %v869_v48 = vld [vmem:[#allocation2 + $0x112] sm:$0xff]  ;;  %v1913_v41 = vsel %vm440_vm0, %v5817_v56, %v4588_v39  ;;  %v1912_v63 = vsel %vm440_vm0, %v5815_v55, %v4587_v40 }
  0xd0   : > { %v2139_v16 = vsel %vm2136_vm10, %v2106_v12, %v4582_v11  ;;  %v2140_v17 = vsel %vm2136_vm10, %v2107_v15, %v4583_v9  ;;  %v4596_v19 = vpop.permute.xlu1 %4595  ;;  %v6038_v27 = vpack.i.bf16 %v869_v48, %v868_v23 }
  0xd1   : > { %v4591_v20 = vpop.permute.xlu0 %4590  ;;  %v2170_v18 = vpack.c.bf16 %v2140_v17, %v2139_v16  ;;  %v4598_v51 = vunpack.i.h.bf16 %v4596_v19  ;;  %v4597_v52 = vunpack.i.l.bf16 %v4596_v19 }
  0xd2   : > { %4885 = vrot.lane.b32.xlu1 %v6016_v6, %s5520_s21  ;;  %v4593_v38 = vunpack.i.h.bf16 %v4591_v20  ;;  %v4592_v53 = vunpack.i.l.bf16 %v4591_v20 }
  0xd3   : > { %4880 = vrot.lane.b32.xlu0 %v5964_v8, %s5520_s21  ;;  %4375 = vmatmul.mubr.msk.bf16.vlgmr.msra.gmra.mxu0 %vm2207_vm11, %v2170_v18  ;;  %v1945_v4 = vsel %vm1938_vm4, %v1912_v63, %v4597_v52  ;;  %v1946_v5 = vsel %vm1938_vm4, %v1913_v41, %v4598_v51 }
  0xd4   : > { %v4606_v21 = vpop.permute.xlu1 %4605  ;;  %v1944_v55 = vsel %vm1938_vm4, %v1911_v2, %v4593_v38  ;;  %v1943_v56 = vsel %vm1938_vm4, %v1910_v3, %v4592_v53 }
  0xd5   : > { %v4601_v24 = vpop.permute.xlu0 %4600  ;;  %v4608_v58 = vunpack.i.h.bf16 %v4606_v21  ;;  %v4607_v59 = vunpack.i.l.bf16 %v4606_v21 }
  0xd6   : > { %4895 = vrot.lane.b32.xlu1 %v5964_v8, %s5514_s15  ;;  %v4602_v1 = vunpack.i.l.bf16 %v4601_v24 }
  0xd7   : > { %4890 = vrot.lane.b32.xlu0 %v5970_v46, %s7295_s0  ;;  %v1978_v43 = vsel %vm1971_vm5, %v1945_v4, %v4607_v59  ;;  %v1979_v42 = vsel %vm1971_vm5, %v1946_v5, %v4608_v58 }
  0xd8   : > { %v6040_v28 = vpop.permute.xlu1 %4615 }
  0xd9   : > { %v6042_v29 = vpop.permute.xlu0 %4610  ;;  %v4618_v19 = vunpack.i.h.bf16 %v6040_v28  ;;  %v4617_v20 = vunpack.i.l.bf16 %v6040_v28 }
  0xda   : > { %4905 = vrot.lane.b32.xlu1 %v6016_v6, %s5514_s15  ;;  %v4613_v31 = vunpack.i.h.bf16 %v6042_v29  ;;  %v4612_v7 = vunpack.i.l.bf16 %v6042_v29 }
  0xdb   : > { %4900 = vrot.lane.b32.xlu0 %v6038_v27, %s7295_s0  ;;  %v2011_v51 = vsel %vm2004_vm6, %v1978_v43, %v4617_v20  ;;  %v2012_v52 = vsel %vm2004_vm6, %v1979_v42, %v4618_v19  ;;  %v872_v43 = vld [vmem:[#allocation2 + $0x13a] sm:$0xff]  ;;  %v779_v20 = vld [vmem:[#allocation2 + $0x152] sm:$0xff] }
  0xdc   : > { %v6048_v34 = vpop.permute.xlu1 %4625  ;;  %v748_v19 = vld [vmem:[#allocation2 + $0x159] sm:$0xff] }
  0xdd   : > { %v6050_v8 = vpop.permute.xlu0 %4620  ;;  %v4627_v29 = vunpack.i.l.bf16 %v6048_v34 }
  0xde   : > { %4915 = vrot.lane.b32.xlu1 %v6038_v27, %s7291_s16  ;;  %v4623_v9 = vunpack.i.h.bf16 %v6050_v8  ;;  %v4622_v11 = vunpack.i.l.bf16 %v6050_v8 }
  0xdf   : > { %4910 = vrot.lane.b32.xlu0 %v5970_v46, %s7291_s16  ;;  %v4603_v46 = vunpack.i.h.bf16 %v4601_v24  ;;  %v4628_v24 = vunpack.i.h.bf16 %v6048_v34  ;;  %v840_v34 = vld [vmem:[#allocation2 + $0x139] sm:$0xff]  ;;  %v2044_v58 = vsel %vm2037_vm7, %v2011_v51, %v4627_v29  ;;  %v813_v29 = vld [vmem:[#allocation2 + $0x170] sm:$0xff] }
  0xe0   : > { %v6062_v54 = vpop.permute.xlu1 %4635  ;;  %v6126_v63 = vpack.i.bf16 %v841_v47, %v840_v34 }
  0xe1   : > { %v4631_v60 = vpop.permute.xlu0 %4630  ;;  %v1977_v15 = vsel %vm1971_vm5, %v1944_v55, %v4603_v46  ;;  %v4638_v28 = vunpack.i.h.bf16 %v6062_v54  ;;  %v4637_v35 = vunpack.i.l.bf16 %v6062_v54  ;;  %v2045_v59 = vsel %vm2037_vm7, %v2012_v52, %v4628_v24  ;;  %v812_v24 = vld [vmem:[#allocation2 + $0x168] sm:$0xff] }
  0xe2   : > { %4925 = vrot.lane.b32.xlu1 %v6056_v44, %s7292_s20  ;;  %v4633_v16 = vunpack.i.h.bf16 %v4631_v60  ;;  %v4632_v17 = vunpack.i.l.bf16 %v4631_v60  ;;  %v2010_v48 = vsel %vm2004_vm6, %v1977_v15, %v4613_v31  ;;  %v716_v15 = vld [vmem:[#allocation2 + $0x158] sm:$0xff] }
  0xe3   : > { %4920 = vrot.lane.b32.xlu0 %v5972_v10, %s7292_s20  ;;  %v1976_v10 = vsel %vm1971_vm5, %v1943_v56, %v4602_v1  ;;  %v2043_v8 = vsel %vm2037_vm7, %v2010_v48, %v4623_v9  ;;  %v2078_v46 = vsel %vm2070_vm8, %v2045_v59, %v4638_v28  ;;  %v780_v48 = vld [vmem:[#allocation2 + $0x15a] sm:$0xff] }
  0xe4   : > { %v4646_v45 = vpop.permute.xlu1 %4645  ;;  %v2009_v23 = vsel %vm2004_vm6, %v1976_v10, %v4612_v7  ;;  %v2076_v37 = vsel %vm2070_vm8, %v2043_v8, %v4633_v16  ;;  %v715_v10 = vld [vmem:[#allocation2 + $0x150] sm:$0xff] }
  0xe5   : > { %v4641_v12 = vpop.permute.xlu0 %4640  ;;  %v2042_v33 = vsel %vm2037_vm7, %v2009_v23, %v4622_v11  ;;  %v4648_v32 = vunpack.i.h.bf16 %v4646_v45  ;;  %v4647_v49 = vunpack.i.l.bf16 %v4646_v45  ;;  %v6166_v23 = vpack.i.bf16 %v716_v15, %v715_v10 }
  0xe6   : > { %4935 = vrot.lane.b32.xlu1 %v6064_v57, %s7293_s23  ;;  %v4643_v18 = vunpack.i.h.bf16 %v4641_v12  ;;  %v4642_v21 = vunpack.i.l.bf16 %v4641_v12 }
  0xe7   : > { %4930 = vrot.lane.b32.xlu0 %v6016_v6, %s7293_s23  ;;  %v2075_v6 = vsel %vm2070_vm8, %v2042_v33, %v4632_v17  ;;  %v2111_v4 = vsel %vm2103_vm9, %v2078_v46, %v4648_v32  ;;  %v747_v17 = vld [vmem:[#allocation2 + $0x151] sm:$0xff]  ;;  %v6176_v32 = vpack.i.bf16 %v780_v48, %v779_v20 }
  0xe8   : > { %v6104_v30 = vpop.permute.xlu1 %4655  ;;  %v2108_v50 = vsel %vm2103_vm9, %v2075_v6, %v4642_v21  ;;  %v2109_v22 = vsel %vm2103_vm9, %v2076_v37, %v4643_v18 }
  0xe9   : > { %v4651_v36 = vpop.permute.xlu0 %4650  ;;  %v4658_v33 = vunpack.i.h.bf16 %v6104_v30  ;;  %v4657_v8 = vunpack.i.l.bf16 %v6104_v30 }
  0xea   : > { %v4653_v39 = vunpack.i.h.bf16 %v4651_v36  ;;  %v4652_v40 = vunpack.i.l.bf16 %v4651_v36  ;;  %4945 = vrot.lane.b32.xlu1 %v6066_v61, %s7294_s30 }
  0xeb   : > { %4940 = vrot.lane.b32.xlu0 %v6038_v27, %s7294_s30  ;;  %v2077_v27 = vsel %vm2070_vm8, %v2044_v58, %v4637_v35  ;;  %v1915_v51 = vsel %vm440_vm0, %v5845_v14, %v4658_v33  ;;  %v1914_v52 = vsel %vm440_vm0, %v5843_v13, %v4657_v8 }
  0xec   : > { %v2141_v38 = vsel %vm2136_vm10, %v2108_v50, %v4652_v40  ;;  %v2142_v53 = vsel %vm2136_vm10, %v2109_v22, %v4653_v39  ;;  %v6122_v54 = vpop.permute.xlu1 %4665  ;;  %v2110_v3 = vsel %vm2103_vm9, %v2077_v27, %v4647_v49  ;;  %v6174_v39 = vpack.i.bf16 %v748_v19, %v747_v17  ;;  %v845_v19 = vld [vmem:[#allocation2 + $0x171] sm:$0xff] }
  0xed   : > { %v4661_v60 = vpop.permute.xlu0 %4660  ;;  %v2171_v41 = vpack.c.bf16 %v2142_v53, %v2141_v38  ;;  %v4668_v18 = vunpack.i.h.bf16 %v6122_v54  ;;  %v4667_v21 = vunpack.i.l.bf16 %v6122_v54  ;;  %v6178_v49 = vpack.i.bf16 %v813_v29, %v812_v24 }
  0xee   : > { %v4663_v1 = vunpack.i.h.bf16 %v4661_v60  ;;  %v4662_v2 = vunpack.i.l.bf16 %v4661_v60  ;;  %4955 = vrot.lane.b32.xlu1 %v6068_v62, %s5519_s22 }
  0xef   : > { %4950 = vrot.lane.b32.xlu0 %v6056_v44, %s5519_s22  ;;  %4378 = vmatprep.mubr.msk.bf16.mxu0 %vm2207_vm11, %v2171_v41  ;;  %v873_v44 = vld [vmem:[#allocation2 + $0x142] sm:$0xff]  ;;  %v1917_v30 = vsel %vm440_vm0, %v5860_v26, %v4668_v18  ;;  %v1916_v50 = vsel %vm440_vm0, %v5858_v25, %v4667_v21 }
  0xf0   : > { %v2144_v5 = vsel %vm2136_vm10, %v2111_v4, %v4663_v1  ;;  %v2143_v55 = vsel %vm2136_vm10, %v2110_v3, %v4662_v2  ;;  %v4676_v56 = vpop.permute.xlu1 %4675  ;;  %v6148_v9 = vpack.i.bf16 %v873_v44, %v872_v43 }
  0xf1   : > { %v4671_v31 = vpop.permute.xlu0 %4670  ;;  %v2172_v7 = vpack.c.bf16 %v2144_v5, %v2143_v55  ;;  %v4678_v28 = vunpack.i.h.bf16 %v4676_v56  ;;  %v4677_v35 = vunpack.i.l.bf16 %v4676_v56 }
  0xf2   : > { %4965 = vrot.lane.b32.xlu1 %v6126_v63, %s5520_s21  ;;  %v4673_v36 = vunpack.i.h.bf16 %v4671_v31  ;;  %v4672_v6 = vunpack.i.l.bf16 %v4671_v31 }
  0xf3   : > { %4960 = vrot.lane.b32.xlu0 %v6064_v57, %s5520_s21  ;;  %4379 = vmatmul.mubr.msk.bf16.gmra.mxu0 %vm2207_vm11, %v2172_v7  ;;  %v1949_v38 = vsel %vm1938_vm4, %v1916_v50, %v4677_v35  ;;  %v1950_v53 = vsel %vm1938_vm4, %v1917_v30, %v4678_v28 }
  0xf4   : > { %v4686_v45 = vpop.permute.xlu1 %4685  ;;  %v1948_v25 = vsel %vm1938_vm4, %v1915_v51, %v4673_v36  ;;  %v1947_v26 = vsel %vm1938_vm4, %v1914_v52, %v4672_v6 }
  0xf5   : > { %v4681_v42 = vpop.permute.xlu0 %4680  ;;  %v4688_v40 = vunpack.i.h.bf16 %v4686_v45  ;;  %v4687_v34 = vunpack.i.l.bf16 %v4686_v45 }
  0xf6   : > { %4975 = vrot.lane.b32.xlu1 %v6064_v57, %s5514_s15  ;;  %v4682_v22 = vunpack.i.l.bf16 %v4681_v42 }
  0xf7   : > { %4970 = vrot.lane.b32.xlu0 %v6066_v61, %s7295_s0  ;;  %v1982_v14 = vsel %vm1971_vm5, %v1949_v38, %v4687_v34  ;;  %v1983_v13 = vsel %vm1971_vm5, %v1950_v53, %v4688_v40 }
  0xf8   : > { %v6150_v11 = vpop.permute.xlu1 %4695 }
  0xf9   : > { %v6152_v12 = vpop.permute.xlu0 %4690  ;;  %v4698_v3 = vunpack.i.h.bf16 %v6150_v11  ;;  %v4697_v4 = vunpack.i.l.bf16 %v6150_v11 }
  0xfa   : > { %4985 = vrot.lane.b32.xlu1 %v6126_v63, %s5514_s15  ;;  %v4693_v54 = vunpack.i.h.bf16 %v6152_v12  ;;  %v4692_v58 = vunpack.i.l.bf16 %v6152_v12 }
  0xfb   : > { %4980 = vrot.lane.b32.xlu0 %v6148_v9, %s7295_s0  ;;  %v2015_v24 = vsel %vm2004_vm6, %v1982_v14, %v4697_v4  ;;  %v2016_v29 = vsel %vm2004_vm6, %v1983_v13, %v4698_v3  ;;  %v719_v13 = vld [vmem:[#allocation2 + $0x180] sm:$0xff]  ;;  %v784_v4 = vld [vmem:[#allocation2 + $0x18a] sm:$0xff] }
  0xfc   : > { %v6158_v16 = vpop.permute.xlu1 %4705 }
  0xfd   : > { %v6160_v57 = vpop.permute.xlu0 %4700  ;;  %v4708_v7 = vunpack.i.h.bf16 %v6158_v16  ;;  %v4707_v45 = vunpack.i.l.bf16 %v6158_v16  ;;  %v844_v16 = vld [vmem:[#allocation2 + $0x169] sm:$0xff] }
  0xfe   : > { %4995 = vrot.lane.b32.xlu1 %v6148_v9, %s7291_s16  ;;  %v4703_v60 = vunpack.i.h.bf16 %v6160_v57  ;;  %v4702_v41 = vunpack.i.l.bf16 %v6160_v57  ;;  %v6236_v40 = vpack.i.bf16 %v845_v19, %v844_v16 }
  0xff   : > { %4990 = vrot.lane.b32.xlu0 %v6066_v61, %s7291_s16  ;;  %v4683_v61 = vunpack.i.h.bf16 %v4681_v42  ;;  %v2048_v35 = vsel %vm2037_vm7, %v2015_v24, %v4707_v45  ;;  %v2049_v36 = vsel %vm2037_vm7, %v2016_v29, %v4708_v7  ;;  %v607_v7 = vld [vmem:[#allocation2 + $0xa8] sm:$0xff]  ;;  %v608_v45 = vld [vmem:[#allocation2 + $0xb0] sm:$0xff] }
 0x100   : > { %v6172_v37 = vpop.permute.xlu1 %4715 }
 0x101   : > { %v4711_v47 = vpop.permute.xlu0 %4710  ;;  %v1981_v46 = vsel %vm1971_vm5, %v1948_v25, %v4683_v61  ;;  %v4718_v11 = vunpack.i.h.bf16 %v6172_v37  ;;  %v4717_v12 = vunpack.i.l.bf16 %v6172_v37  ;;  %v876_v25 = vld [vmem:[#allocation2 + $0x16a] sm:$0xff] }
 0x102   : > { %5005 = vrot.lane.b32.xlu1 %v6166_v23, %s7292_s20  ;;  %v4713_v1 = vunpack.i.h.bf16 %v4711_v47  ;;  %v4712_v2 = vunpack.i.l.bf16 %v4711_v47  ;;  %v2014_v31 = vsel %vm2004_vm6, %v1981_v46, %v4693_v54  ;;  %v783_v46 = vld [vmem:[#allocation2 + $0x182] sm:$0xff] }
 0x103   : > { %5000 = vrot.lane.b32.xlu0 %v6068_v62, %s7292_s20  ;;  %v1980_v62 = vsel %vm1971_vm5, %v1947_v26, %v4682_v22  ;;  %v2047_v42 = vsel %vm2037_vm7, %v2014_v31, %v4703_v60  ;;  %v2082_v34 = vsel %vm2070_vm8, %v2049_v36, %v4718_v11  ;;  %v877_v26 = vld [vmem:[#allocation2 + $0x172] sm:$0xff]  ;;  %v720_v60 = vld [vmem:[#allocation2 + $0x188] sm:$0xff]  ;;  %v6324_v19 = vpack.i.bf16 %v784_v4, %v783_v46 }
 0x104   : > { %v4726_v59 = vpop.permute.xlu1 %4725  ;;  %v2013_v56 = vsel %vm2004_vm6, %v1980_v62, %v4692_v58  ;;  %v2080_v15 = vsel %vm2070_vm8, %v2047_v42, %v4713_v1  ;;  %v6266_v58 = vpack.i.bf16 %v877_v26, %v876_v25  ;;  %v752_v62 = vld [vmem:[#allocation2 + $0x189] sm:$0xff]  ;;  %v6304_v3 = vpack.i.bf16 %v720_v60, %v719_v13  ;;  %v849_v4 = vld [vmem:[#allocation2 + $0x1a1] sm:$0xff] }
 0x105   : > { %v4721_v27 = vpop.permute.xlu0 %4720  ;;  %v2046_v44 = vsel %vm2037_vm7, %v2013_v56, %v4702_v41  ;;  %v4728_v20 = vunpack.i.h.bf16 %v4726_v59  ;;  %v4727_v18 = vunpack.i.l.bf16 %v4726_v59  ;;  %v605_v11 = vld [vmem:[#allocation2 + $0x90] sm:$0xff] }
 0x106   : > { %5015 = vrot.lane.b32.xlu1 %v6174_v39, %s7293_s23  ;;  %v4723_v5 = vunpack.i.h.bf16 %v4721_v27  ;;  %v4722_v55 = vunpack.i.l.bf16 %v4721_v27  ;;  %v751_v27 = vld [vmem:[#allocation2 + $0x181] sm:$0xff] }
 0x107   : > { %5010 = vrot.lane.b32.xlu0 %v6126_v63, %s7293_s23  ;;  %v2079_v63 = vsel %vm2070_vm8, %v2046_v44, %v4712_v2  ;;  %v2115_v61 = vsel %vm2103_vm9, %v2082_v34, %v4728_v20 }
 0x108   : > { %v6214_v43 = vpop.permute.xlu1 %4735  ;;  %v2112_v21 = vsel %vm2103_vm9, %v2079_v63, %v4722_v55  ;;  %v2113_v48 = vsel %vm2103_vm9, %v2080_v15, %v4723_v5  ;;  %v6306_v5 = vld [vmem:[#allocation2 + $0x198] sm:$0xff]  ;;  %v6308_v55 = vld [vmem:[#allocation2 + $0x1a0] sm:$0xff] }
 0x109   : > { %v4731_v10 = vpop.permute.xlu0 %4730  ;;  %v4738_v56 = vunpack.i.h.bf16 %v6214_v43  ;;  %v4737_v31 = vunpack.i.l.bf16 %v6214_v43 }
 0x10a   : > { %v4733_v57 = vunpack.i.h.bf16 %v4731_v10  ;;  %v4732_v17 = vunpack.i.l.bf16 %v4731_v10  ;;  %5025 = vrot.lane.b32.xlu1 %v6176_v32, %s7294_s30 }
 0x10b   : > { %5020 = vrot.lane.b32.xlu0 %v6148_v9, %s7294_s30  ;;  %v2081_v9 = vsel %vm2070_vm8, %v2048_v35, %v4717_v12  ;;  %v606_v12 = vld [vmem:[#allocation2 + $0x98] sm:$0xff]  ;;  %v1918_v29 = vsel %vm440_vm0, %v605_v11, %v4737_v31 }
 0x10c   : > { %v2145_v33 = vsel %vm2136_vm10, %v2112_v21, %v4732_v17  ;;  %v2146_v8 = vsel %vm2136_vm10, %v2113_v48, %v4733_v57  ;;  %v6232_v28 = vpop.permute.xlu1 %4745  ;;  %v2114_v50 = vsel %vm2103_vm9, %v2081_v9, %v4727_v18  ;;  %v6320_v57 = vpack.i.bf16 %v752_v62, %v751_v27 }
 0x10d   : > { %v4741_v6 = vpop.permute.xlu0 %4740  ;;  %v2173_v37 = vpack.c.bf16 %v2146_v8, %v2145_v33  ;;  %v4748_v1 = vunpack.i.h.bf16 %v6232_v28  ;;  %v4747_v2 = vunpack.i.l.bf16 %v6232_v28  ;;  %v1919_v24 = vsel %vm440_vm0, %v606_v12, %v4738_v56 }
 0x10e   : > { %v4743_v47 = vunpack.i.h.bf16 %v4741_v6  ;;  %v4742_v30 = vunpack.i.l.bf16 %v4741_v6  ;;  %5035 = vrot.lane.b32.xlu1 %v6178_v49, %s5519_s22 }
 0x10f   : > { %5030 = vrot.lane.b32.xlu0 %v6166_v23, %s5519_s22  ;;  %4382 = vmatprep.mubr.msk.bf16.mxu0 %vm2207_vm11, %v2173_v37  ;;  %v1921_v20 = vsel %vm440_vm0, %v608_v45, %v4748_v1  ;;  %v1920_v18 = vsel %vm440_vm0, %v607_v7, %v4747_v2 }
 0x110   : > { %v2148_v22 = vsel %vm2136_vm10, %v2115_v61, %v4743_v47  ;;  %v2147_v51 = vsel %vm2136_vm10, %v2114_v50, %v4742_v30  ;;  %v6249_v52 = vpop.permute.xlu1 %4755 }
 0x111   : > { %v6251_v38 = vpop.permute.xlu0 %4750  ;;  %v2174_v53 = vpack.c.bf16 %v2148_v22, %v2147_v51  ;;  %v4758_v44 = vunpack.i.h.bf16 %v6249_v52  ;;  %v4757_v42 = vunpack.i.l.bf16 %v6249_v52 }
 0x112   : > { %5045 = vrot.lane.b32.xlu1 %v6236_v40, %s5520_s21  ;;  %v4753_v10 = vunpack.i.h.bf16 %v6251_v38  ;;  %v4752_v63 = vunpack.i.l.bf16 %v6251_v38 }
 0x113   : > { %5040 = vrot.lane.b32.xlu0 %v6174_v39, %s5520_s21  ;;  %4383 = vmatmul.mubr.msk.bf16.gmra.mxu0 %vm2207_vm11, %v2174_v53  ;;  %v1953_v33 = vsel %vm1938_vm4, %v1920_v18, %v4757_v42  ;;  %v1954_v8 = vsel %vm1938_vm4, %v1921_v20, %v4758_v44 }
 0x114   : > { %v6258_v23 = vpop.permute.xlu1 %4765  ;;  %v1952_v28 = vsel %vm1938_vm4, %v1919_v24, %v4753_v10  ;;  %v1951_v35 = vsel %vm1938_vm4, %v1918_v29, %v4752_v63  ;;  %v880_v29 = vld [vmem:[#allocation2 + $0x19a] sm:$0xff] }
 0x115   : > { %v6260_v54 = vpop.permute.xlu0 %4760  ;;  %v4768_v43 = vunpack.i.h.bf16 %v6258_v23  ;;  %v4767_v17 = vunpack.i.l.bf16 %v6258_v23 }
 0x116   : > { %5055 = vrot.lane.b32.xlu1 %v6174_v39, %s5514_s15  ;;  %v4763_v21 = vunpack.i.h.bf16 %v6260_v54  ;;  %v4762_v48 = vunpack.i.l.bf16 %v6260_v54 }
 0x117   : > { %5050 = vrot.lane.b32.xlu0 %v6176_v32, %s7295_s0  ;;  %v1986_v9 = vsel %vm1971_vm5, %v1953_v33, %v4767_v17  ;;  %v1987_v34 = vsel %vm1971_vm5, %v1954_v8, %v4768_v43  ;;  %v881_v33 = vld [vmem:[#allocation2 + $0x1a2] sm:$0xff] }
 0x118   : > { %v6268_v59 = vpop.permute.xlu1 %4775  ;;  %v1985_v61 = vsel %vm1971_vm5, %v1952_v28, %v4763_v21 }
 0x119   : > { %v6270_v14 = vpop.permute.xlu0 %4770  ;;  %v4778_v52 = vunpack.i.h.bf16 %v6268_v59  ;;  %v4777_v38 = vunpack.i.l.bf16 %v6268_v59 }
 0x11a   : > { %5065 = vrot.lane.b32.xlu1 %v6236_v40, %s5514_s15  ;;  %v4773_v36 = vunpack.i.h.bf16 %v6270_v14  ;;  %v4772_v6 = vunpack.i.l.bf16 %v6270_v14  ;;  %s7275_s15 = smov 64  }
 0x11b   : > { %5060 = vrot.lane.b32.xlu0 %v6266_v58, %s7295_s0  ;;  %v2019_v44 = vsel %vm2004_vm6, %v1986_v9, %v4777_v38  ;;  %v2020_v42 = vsel %vm2004_vm6, %v1987_v34, %v4778_v52  ;;  %v609_v52 = vld [vmem:[#allocation2 + $0xc0] sm:$0xff]  ;;  %v610_v38 = vld [vmem:[#allocation2 + $0xc8] sm:$0xff] }
 0x11c   : > { %v6296_v39 = vpop.permute.xlu1 %4785  ;;  %v2018_v26 = vsel %vm2004_vm6, %v1985_v61, %v4773_v36  ;;  %v612_v61 = vld [vmem:[#allocation2 + $0xe0] sm:$0xff] }
 0x11d   : > { %v6298_v41 = vpop.permute.xlu0 %4780  ;;  %v4788_v54 = vunpack.i.h.bf16 %v6296_v39  ;;  %v4787_v14 = vunpack.i.l.bf16 %v6296_v39  ;;  %v848_v39 = vld [vmem:[#allocation2 + $0x199] sm:$0xff] }
 0x11e   : > { %5075 = vrot.lane.b32.xlu1 %v6266_v58, %s7291_s16  ;;  %v4783_v47 = vunpack.i.h.bf16 %v6298_v41  ;;  %v4782_v30 = vunpack.i.l.bf16 %v6298_v41 }
 0x11f   : > { %5070 = vrot.lane.b32.xlu0 %v6176_v32, %s7291_s16  ;;  %v5114_v32 = vpack.i.bf16 %v6308_v55, %v6306_v5  ;;  %v2052_v63 = vsel %vm2037_vm7, %v2019_v44, %v4787_v14  ;;  %v5134_v5 = vpack.i.bf16 %v881_v33, %v880_v29  ;;  %s7279_s16 = smov 16  }
 0x120   : > { %v6318_v15 = vpop.permute.xlu1 %4795  ;;  %v2051_v41 = vsel %vm2037_vm7, %v2018_v26, %v4783_v47 }
 0x121   : > { %v4791_v16 = vpop.permute.xlu0 %4790  ;;  %v4798_v59 = vunpack.i.h.bf16 %v6318_v15  ;;  %v4797_v27 = vunpack.i.l.bf16 %v6318_v15  ;;  %v2053_v15 = vsel %vm2037_vm7, %v2020_v42, %v4788_v54 }
 0x122   : > { %5085 = vrot.lane.b32.xlu1 %v6304_v3, %s7292_s20  ;;  %v4793_v22 = vunpack.i.h.bf16 %v4791_v16  ;;  %v4792_v51 = vunpack.i.l.bf16 %v4791_v16  ;;  %v5124_v16 = vpack.i.bf16 %v849_v4, %v848_v39 }
 0x123   : > { %5080 = vrot.lane.b32.xlu0 %v6178_v49, %s7292_s20  ;;  %v1984_v49 = vsel %vm1971_vm5, %v1951_v35, %v4762_v48  ;;  %v2085_v20 = vsel %vm2070_vm8, %v2052_v63, %v4797_v27  ;;  %s7273_s20 = smov 80  }
 0x124   : > { %v4806_v37 = vpop.permute.xlu1 %4805  ;;  %v2017_v25 = vsel %vm2004_vm6, %v1984_v49, %v4772_v6  ;;  %v2084_v46 = vsel %vm2070_vm8, %v2051_v41, %v4793_v22  ;;  %v611_v49 = vld [vmem:[#allocation2 + $0xd8] sm:$0xff] }
 0x125   : > { %v4801_v50 = vpop.permute.xlu0 %4800  ;;  %v2050_v60 = vsel %vm2037_vm7, %v2017_v25, %v4782_v30  ;;  %v4808_v56 = vunpack.i.h.bf16 %v4806_v37  ;;  %v4807_v31 = vunpack.i.l.bf16 %v4806_v37 }
 0x126   : > { %5095 = vrot.lane.b32.xlu1 %v6320_v57, %s7293_s23  ;;  %v4803_v53 = vunpack.i.h.bf16 %v4801_v50  ;;  %v4802_v23 = vunpack.i.l.bf16 %v4801_v50 }
 0x127   : > { %5090 = vrot.lane.b32.xlu0 %v6236_v40, %s7293_s23  ;;  %v2083_v40 = vsel %vm2070_vm8, %v2050_v60, %v4792_v51  ;;  %v2118_v48 = vsel %vm2103_vm9, %v2085_v20, %v4807_v31  ;;  %s7271_s23 = smov 96  }
 0x128   : > { %v6360_v13 = vpop.permute.xlu1 %4815  ;;  %v2116_v7 = vsel %vm2103_vm9, %v2083_v40, %v4802_v23  ;;  %v2117_v45 = vsel %vm2103_vm9, %v2084_v46, %v4803_v53 }
 0x129   : > { %v4811_v62 = vpop.permute.xlu0 %4810  ;;  %v4818_v50 = vunpack.i.h.bf16 %v6360_v13 }
 0x12a   : > { %v4813_v1 = vunpack.i.h.bf16 %v4811_v62  ;;  %v4812_v2 = vunpack.i.l.bf16 %v4811_v62  ;;  %5105 = vrot.lane.b32.xlu1 %v6324_v19, %s7294_s30 }
 0x12b   : > { %5100 = vrot.lane.b32.xlu0 %v6266_v58, %s7294_s30  ;;  %v2086_v58 = vsel %vm2070_vm8, %v2053_v15, %v4798_v59  ;;  %s7281_s30 = smov 32  }
 0x12c   : > { %v2149_v11 = vsel %vm2136_vm10, %v2116_v7, %v4812_v2  ;;  %v2150_v12 = vsel %vm2136_vm10, %v2117_v45, %v4813_v1  ;;  %v4826_v10 = vpop.permute.xlu1 %4825  ;;  %v2119_v24 = vsel %vm2103_vm9, %v2086_v58, %v4808_v56 }
 0x12d   : > { %v4821_v43 = vpop.permute.xlu0 %4820  ;;  %v2175_v17 = vpack.c.bf16 %v2150_v12, %v2149_v11  ;;  %v4828_v47 = vunpack.i.h.bf16 %v4826_v10  ;;  %v4827_v30 = vunpack.i.l.bf16 %v4826_v10 }
 0x12e   : > { %v4823_v18 = vunpack.i.h.bf16 %v4821_v43  ;;  %v4822_v21 = vunpack.i.l.bf16 %v4821_v43  ;;  %5115 = vrot.lane.b32.xlu1 %v5114_v32, %s5519_s22 }
 0x12f   : > { %5110 = vrot.lane.b32.xlu0 %v6304_v3, %s5519_s22  ;;  %4386 = vmatprep.mubr.msk.bf16.mxu0 %vm2207_vm11, %v2175_v17  ;;  %v1925_v14 = vsel %vm440_vm0, %v612_v61, %v4828_v47  ;;  %v1924_v60 = vsel %vm440_vm0, %v611_v49, %v4827_v30  ;;  %s7304_s22 = smov 112  }
 0x130   : > { %v2152_v8 = vsel %vm2136_vm10, %v2119_v24, %v4823_v18  ;;  %v2151_v28 = vsel %vm2136_vm10, %v2118_v48, %v4822_v21  ;;  %v4836_v35 = vpop.permute.xlu1 %4835 }
 0x131   : > { %v4831_v36 = vpop.permute.xlu0 %4830  ;;  %v2176_v6 = vpack.c.bf16 %v2152_v8, %v2151_v28  ;;  %v4838_v22 = vunpack.i.h.bf16 %v4836_v35  ;;  %v4837_v51 = vunpack.i.l.bf16 %v4836_v35 }
 0x132   : > { %5125 = vrot.lane.b32.xlu1 %v5124_v16, %s5520_s21  ;;  %v4833_v53 = vunpack.i.h.bf16 %v4831_v36 }
 0x133   : > { %5120 = vrot.lane.b32.xlu0 %v6320_v57, %s5520_s21  ;;  %4387 = vmatmul.mubr.msk.bf16.gmra.mxu0 %vm2207_vm11, %v2176_v6  ;;  %v4817_v57 = vunpack.i.l.bf16 %v6360_v13  ;;  %v1923_v13 = vsel %vm440_vm0, %v610_v38, %v4818_v50  ;;  %v1957_v62 = vsel %vm1938_vm4, %v1924_v60, %v4837_v51  ;;  %v1958_v40 = vsel %vm1938_vm4, %v1925_v14, %v4838_v22  ;;  %s7269_s21 = smov 112  }
 0x134   : > { %v4846_v3 = vpop.permute.xlu1 %4845  ;;  %v1956_v46 = vsel %vm1938_vm4, %v1923_v13, %v4833_v53 }
 0x135   : > { %v4841_v55 = vpop.permute.xlu0 %4840  ;;  %v4848_v25 = vunpack.i.h.bf16 %v4846_v3  ;;  %v4847_v26 = vunpack.i.l.bf16 %v4846_v3  ;;  %v1922_v27 = vsel %vm440_vm0, %v609_v52, %v4817_v57 }
 0x136   : > { %5135 = vrot.lane.b32.xlu1 %v5134_v5, %s7295_s0  ;;  %v4843_v41 = vunpack.i.h.bf16 %v4841_v55  ;;  %v4842_v59 = vunpack.i.l.bf16 %v4841_v55 }
 0x137   : > { %5130 = vrot.lane.b32.xlu0 %v6324_v19, %s7295_s0  ;;  %v4832_v19 = vunpack.i.l.bf16 %v4831_v36  ;;  %v1990_v56 = vsel %vm1971_vm5, %v1957_v62, %v4847_v26  ;;  %v1991_v31 = vsel %vm1971_vm5, %v1958_v40, %v4848_v25 }
 0x138   : > { %v6400_v32 = vpop.permute.xlu1 %4855  ;;  %v1989_v11 = vsel %vm1971_vm5, %v1956_v46, %v4843_v41 }
 0x139   : > { %v4851_v37 = vpop.permute.xlu0 %4850  ;;  %v1955_v1 = vsel %vm1938_vm4, %v1922_v27, %v4832_v19  ;;  %v4858_v63 = vunpack.i.h.bf16 %v6400_v32  ;;  %v4857_v15 = vunpack.i.l.bf16 %v6400_v32 }
 0x13a   : > { %v4853_v2 = vunpack.i.h.bf16 %v4851_v37  ;;  %v4852_v39 = vunpack.i.l.bf16 %v4851_v37  ;;  %v1988_v42 = vsel %vm1971_vm5, %v1955_v1, %v4842_v59 }
 0x13b   : > { %v2023_v37 = vsel %vm2004_vm6, %v1990_v56, %v4857_v15 }
 0x13c   : > { %v6402_v9 = vpop.permute.xlu1 %4865  ;;  %v2021_v16 = vsel %vm2004_vm6, %v1988_v42, %v4852_v39  ;;  %v2022_v20 = vsel %vm2004_vm6, %v1989_v11, %v4853_v2  ;;  %v615_v39 = vld [vmem:[#allocation2 + $0x108] sm:$0xff] }
 0x13d   : > { %v4861_v34 = vpop.permute.xlu0 %4860  ;;  %v4868_v58 = vunpack.i.h.bf16 %v6402_v9  ;;  %v4867_v18 = vunpack.i.l.bf16 %v6402_v9  ;;  %v2024_v9 = vsel %vm2004_vm6, %v1991_v31, %v4858_v63 }
 0x13e   : > { %v4863_v7 = vunpack.i.h.bf16 %v4861_v34  ;;  %v4862_v45 = vunpack.i.l.bf16 %v4861_v34 }
 0x13f   : > { %v2056_v50 = vsel %vm2037_vm7, %v2023_v37, %v4867_v18  ;;  %v2057_v57 = vsel %vm2037_vm7, %v2024_v9, %v4868_v58 }
 0x140   : > { %v4876_v23 = vpop.permute.xlu1 %4875  ;;  %v2054_v48 = vsel %vm2037_vm7, %v2021_v16, %v4862_v45  ;;  %v2055_v24 = vsel %vm2037_vm7, %v2022_v20, %v4863_v7  ;;  %v613_v7 = vld [vmem:[#allocation2 + $0xf0] sm:$0xff]  ;;  %v614_v45 = vld [vmem:[#allocation2 + $0xf8] sm:$0xff] }
 0x141   : > { %v4871_v54 = vpop.permute.xlu0 %4870  ;;  %v4878_v29 = vunpack.i.h.bf16 %v4876_v23  ;;  %v4877_v33 = vunpack.i.l.bf16 %v4876_v23 }
 0x142   : > { %v4873_v12 = vunpack.i.h.bf16 %v4871_v54  ;;  %v4872_v10 = vunpack.i.l.bf16 %v4871_v54 }
 0x143   : > { %v2089_v22 = vsel %vm2070_vm8, %v2056_v50, %v4877_v33  ;;  %v2090_v51 = vsel %vm2070_vm8, %v2057_v57, %v4878_v29 }
 0x144   : > { %v4886_v4 = vpop.permute.xlu1 %4885  ;;  %v2087_v28 = vsel %vm2070_vm8, %v2054_v48, %v4872_v10  ;;  %v2088_v35 = vsel %vm2070_vm8, %v2055_v24, %v4873_v12 }
 0x145   : > { %v4881_v44 = vpop.permute.xlu0 %4880  ;;  %v4888_v5 = vunpack.i.h.bf16 %v4886_v4  ;;  %v4887_v3 = vunpack.i.l.bf16 %v4886_v4  ;;  %v616_v4 = vld [vmem:[#allocation2 + $0x110] sm:$0xff] }
 0x146   : > { %v4883_v43 = vunpack.i.h.bf16 %v4881_v44  ;;  %v4882_v17 = vunpack.i.l.bf16 %v4881_v44 }
 0x147   : > { %v2122_v53 = vsel %vm2103_vm9, %v2089_v22, %v4887_v3  ;;  %v2123_v19 = vsel %vm2103_vm9, %v2090_v51, %v4888_v5 }
 0x148   : > { %v6424_v21 = vpop.permute.xlu1 %4895  ;;  %v2120_v55 = vsel %vm2103_vm9, %v2087_v28, %v4882_v17  ;;  %v2121_v32 = vsel %vm2103_vm9, %v2088_v35, %v4883_v43 }
 0x149   : > { %v4891_v8 = vpop.permute.xlu0 %4890  ;;  %v4898_v1 = vunpack.i.h.bf16 %v6424_v21  ;;  %v4897_v2 = vunpack.i.l.bf16 %v6424_v21 }
 0x14a   : > { %v4893_v36 = vunpack.i.h.bf16 %v4891_v8  ;;  %v4892_v6 = vunpack.i.l.bf16 %v4891_v8 }
 0x14b   : > { %v1927_v20 = vsel %vm440_vm0, %v614_v45, %v4898_v1  ;;  %v1926_v58 = vsel %vm440_vm0, %v613_v7, %v4897_v2 }
 0x14c   : > { %v2153_v34 = vsel %vm2136_vm10, %v2120_v55, %v4892_v6  ;;  %v2154_v47 = vsel %vm2136_vm10, %v2121_v32, %v4893_v36  ;;  %v4906_v30 = vpop.permute.xlu1 %4905 }
 0x14d   : > { %v4901_v49 = vpop.permute.xlu0 %4900  ;;  %v2177_v61 = vpack.c.bf16 %v2154_v47, %v2153_v34  ;;  %v4908_v40 = vunpack.i.h.bf16 %v4906_v30  ;;  %v4907_v46 = vunpack.i.l.bf16 %v4906_v30 }
 0x14e   : > { %v4903_v52 = vunpack.i.h.bf16 %v4901_v49  ;;  %v4902_v38 = vunpack.i.l.bf16 %v4901_v49 }
 0x14f   : > { %4390 = vmatprep.mubr.msk.bf16.mxu0 %vm2207_vm11, %v2177_v61  ;;  %v1929_v15 = vsel %vm440_vm0, %v616_v4, %v4908_v40  ;;  %v1928_v43 = vsel %vm440_vm0, %v615_v39, %v4907_v46 }
 0x150   : > { %v2156_v23 = vsel %vm2136_vm10, %v2123_v19, %v4903_v52  ;;  %v2155_v25 = vsel %vm2136_vm10, %v2122_v53, %v4902_v38  ;;  %v4916_v26 = vpop.permute.xlu1 %4915 }
 0x151   : > { %v4911_v54 = vpop.permute.xlu0 %4910  ;;  %v2178_v14 = vpack.c.bf16 %v2156_v23, %v2155_v25  ;;  %v4918_v56 = vunpack.i.h.bf16 %v4916_v26  ;;  %v4917_v31 = vunpack.i.l.bf16 %v4916_v26 }
 0x152   : > { %v4913_v44 = vunpack.i.h.bf16 %v4911_v54  ;;  %v4912_v42 = vunpack.i.l.bf16 %v4911_v54 }
 0x153   : > { %4391 = vmatmul.mubr.msk.bf16.gmra.mxu0 %vm2207_vm11, %v2178_v14  ;;  %v1961_v18 = vsel %vm1938_vm4, %v1928_v43, %v4917_v31  ;;  %v1962_v21 = vsel %vm1938_vm4, %v1929_v15, %v4918_v56 }
 0x154   : > { %v4926_v60 = vpop.permute.xlu1 %4925  ;;  %v1960_v48 = vsel %vm1938_vm4, %v1927_v20, %v4913_v44  ;;  %v1959_v24 = vsel %vm1938_vm4, %v1926_v58, %v4912_v42 }
 0x155   : > { %v4921_v41 = vpop.permute.xlu0 %4920  ;;  %v4928_v12 = vunpack.i.h.bf16 %v4926_v60  ;;  %v4927_v10 = vunpack.i.l.bf16 %v4926_v60 }
 0x156   : > { %v4923_v17 = vunpack.i.h.bf16 %v4921_v41  ;;  %v4922_v16 = vunpack.i.l.bf16 %v4921_v41 }
 0x157   : > { %v1994_v28 = vsel %vm1971_vm5, %v1961_v18, %v4927_v10  ;;  %v1995_v35 = vsel %vm1971_vm5, %v1962_v21, %v4928_v12 }
 0x158   : > { %v6446_v59 = vpop.permute.xlu1 %4935  ;;  %v1992_v3 = vsel %vm1971_vm5, %v1959_v24, %v4922_v16  ;;  %v1993_v55 = vsel %vm1971_vm5, %v1960_v48, %v4923_v17 }
 0x159   : > { %v4931_v13 = vpop.permute.xlu0 %4930  ;;  %v4938_v9 = vunpack.i.h.bf16 %v6446_v59  ;;  %v4937_v34 = vunpack.i.l.bf16 %v6446_v59 }
 0x15a   : > { %v4933_v29 = vunpack.i.h.bf16 %v4931_v13  ;;  %v4932_v33 = vunpack.i.l.bf16 %v4931_v13 }
 0x15b   : > { %v2027_v13 = vsel %vm2004_vm6, %v1994_v28, %v4937_v34  ;;  %v617_v28 = vld [vmem:[#allocation2 + $0x120] sm:$0xff]  ;;  %v5445_v34 = vld [vmem:[#allocation2 + $0x138] sm:$0xff] }
 0x15c   : > { %v6448_v27 = vpop.permute.xlu1 %4945  ;;  %v2025_v50 = vsel %vm2004_vm6, %v1992_v3, %v4932_v33  ;;  %v2026_v57 = vsel %vm2004_vm6, %v1993_v55, %v4933_v29 }
 0x15d   : > { %v4941_v62 = vpop.permute.xlu0 %4940  ;;  %v4948_v49 = vunpack.i.h.bf16 %v6448_v27  ;;  %v4947_v61 = vunpack.i.l.bf16 %v6448_v27  ;;  %v2028_v27 = vsel %vm2004_vm6, %v1995_v35, %v4938_v9  ;;  %v618_v35 = vld [vmem:[#allocation2 + $0x128] sm:$0xff] }
 0x15e   : > { %v4943_v36 = vunpack.i.h.bf16 %v4941_v62  ;;  %v4942_v6 = vunpack.i.l.bf16 %v4941_v62 }
 0x15f   : > { %v2060_v1 = vsel %vm2037_vm7, %v2027_v13, %v4947_v61  ;;  %v2061_v2 = vsel %vm2037_vm7, %v2028_v27, %v4948_v49 }
 0x160   : > { %v4956_v11 = vpop.permute.xlu1 %4955  ;;  %v2058_v51 = vsel %vm2037_vm7, %v2025_v50, %v4942_v6  ;;  %v2059_v52 = vsel %vm2037_vm7, %v2026_v57, %v4943_v36 }
 0x161   : > { %v4951_v63 = vpop.permute.xlu0 %4950  ;;  %v4958_v38 = vunpack.i.h.bf16 %v4956_v11  ;;  %v4957_v53 = vunpack.i.l.bf16 %v4956_v11 }
 0x162   : > { %v4953_v32 = vunpack.i.h.bf16 %v4951_v63  ;;  %v4952_v37 = vunpack.i.l.bf16 %v4951_v63 }
 0x163   : > { %v2093_v56 = vsel %vm2070_vm8, %v2060_v1, %v4957_v53  ;;  %v2094_v31 = vsel %vm2070_vm8, %v2061_v2, %v4958_v38 }
 0x164   : > { %v4966_v8 = vpop.permute.xlu1 %4965  ;;  %v2091_v23 = vsel %vm2070_vm8, %v2058_v51, %v4952_v37  ;;  %v2092_v25 = vsel %vm2070_vm8, %v2059_v52, %v4953_v32  ;;  %v5444_v37 = vld [vmem:[#allocation2 + $0x140] sm:$0xff] }
 0x165   : > { %v4961_v5 = vpop.permute.xlu0 %4960  ;;  %v4968_v14 = vunpack.i.h.bf16 %v4966_v8  ;;  %v4967_v60 = vunpack.i.l.bf16 %v4966_v8 }
 0x166   : > { %v4963_v47 = vunpack.i.h.bf16 %v4961_v5  ;;  %v4962_v30 = vunpack.i.l.bf16 %v4961_v5 }
 0x167   : > { %v2126_v44 = vsel %vm2103_vm9, %v2093_v56, %v4967_v60  ;;  %v2127_v42 = vsel %vm2103_vm9, %v2094_v31, %v4968_v14 }
 0x168   : > { %v6470_v22 = vpop.permute.xlu1 %4975  ;;  %v2124_v41 = vsel %vm2103_vm9, %v2091_v23, %v4962_v30  ;;  %v2125_v59 = vsel %vm2103_vm9, %v2092_v25, %v4963_v47 }
 0x169   : > { %v4971_v19 = vpop.permute.xlu0 %4970  ;;  %v4978_v24 = vunpack.i.h.bf16 %v6470_v22  ;;  %v4977_v29 = vunpack.i.l.bf16 %v6470_v22 }
 0x16a   : > { %v4973_v26 = vunpack.i.h.bf16 %v4971_v19  ;;  %v4972_v54 = vunpack.i.l.bf16 %v4971_v19 }
 0x16b   : > { %v1931_v57 = vsel %vm440_vm0, %v618_v35, %v4978_v24  ;;  %v1930_v49 = vsel %vm440_vm0, %v617_v28, %v4977_v29 }
 0x16c   : > { %v2157_v62 = vsel %vm2136_vm10, %v2124_v41, %v4972_v54  ;;  %v2158_v40 = vsel %vm2136_vm10, %v2125_v59, %v4973_v26  ;;  %v4986_v46 = vpop.permute.xlu1 %4985 }
 0x16d   : > { %v4981_v39 = vpop.permute.xlu0 %4980  ;;  %v2179_v4 = vpack.c.bf16 %v2158_v40, %v2157_v62  ;;  %v4988_v21 = vunpack.i.h.bf16 %v4986_v46  ;;  %v4987_v48 = vunpack.i.l.bf16 %v4986_v46 }
 0x16e   : > { %v4983_v7 = vunpack.i.h.bf16 %v4981_v39  ;;  %v4982_v45 = vunpack.i.l.bf16 %v4981_v39 }
 0x16f   : > { %4394 = vmatprep.mubr.msk.bf16.mxu0 %vm2207_vm11, %v2179_v4  ;;  %v1933_v9 = vsel %vm440_vm0, %v5444_v37, %v4988_v21  ;;  %v1932_v47 = vsel %vm440_vm0, %v5445_v34, %v4987_v48 }
 0x170   : > { %v2160_v11 = vsel %vm2136_vm10, %v2127_v42, %v4983_v7  ;;  %v2159_v12 = vsel %vm2136_vm10, %v2126_v44, %v4982_v45  ;;  %v4996_v10 = vpop.permute.xlu1 %4995 }
 0x171   : > { %v4991_v63 = vpop.permute.xlu0 %4990  ;;  %v2180_v15 = vpack.c.bf16 %v2160_v11, %v2159_v12  ;;  %v4998_v33 = vunpack.i.h.bf16 %v4996_v10  ;;  %v4997_v8 = vunpack.i.l.bf16 %v4996_v10 }
 0x172   : > { %v4993_v36 = vunpack.i.h.bf16 %v4991_v63  ;;  %v4992_v6 = vunpack.i.l.bf16 %v4991_v63 }
 0x173   : > { %4395 = vmatmul.mubr.msk.bf16.gmra.mxu0 %vm2207_vm11, %v2180_v15  ;;  %v1965_v61 = vsel %vm1938_vm4, %v1932_v47, %v4997_v8  ;;  %v1966_v22 = vsel %vm1938_vm4, %v1933_v9, %v4998_v33  ;;  %v5421_v15 = vld [vmem:[%s7296_s3] sm:$0xff]  }
 0x174   : > { %v5006_v43 = vpop.permute.xlu1 %5005  ;;  %v1964_v51 = vsel %vm1938_vm4, %v1931_v57, %v4993_v36  ;;  %v1963_v52 = vsel %vm1938_vm4, %v1930_v49, %v4992_v6  ;;  %4406 = vmatprep.subr.bf16.mxu1 %v5421_v15 }
 0x175   : > { %v5001_v17 = vpop.permute.xlu0 %5000  ;;  %v5008_v3 = vunpack.i.h.bf16 %v5006_v43  ;;  %v5007_v55 = vunpack.i.l.bf16 %v5006_v43  ;;  %4407 = vmatpush3.bf16.msra.mxu1 %v5421_v15 }
 0x176   : > { %v5003_v30 = vunpack.i.h.bf16 %v5001_v17  ;;  %v5002_v50 = vunpack.i.l.bf16 %v5001_v17 }
 0x177   : > { %v1998_v23 = vsel %vm1971_vm5, %v1965_v61, %v5007_v55  ;;  %v1999_v25 = vsel %vm1971_vm5, %v1966_v22, %v5008_v3 }
 0x178   : > { %v6492_v16 = vpop.permute.xlu1 %5015  ;;  %v1996_v60 = vsel %vm1971_vm5, %v1963_v52, %v5002_v50  ;;  %v1997_v41 = vsel %vm1971_vm5, %v1964_v51, %v5003_v30  ;;  %v6547_v30 = vld [vmem:[%s7297_s2] ss:$0 sm:$0xff] }
 0x179   : > { %v5011_v20 = vpop.permute.xlu0 %5010  ;;  %v5018_v27 = vunpack.i.h.bf16 %v6492_v16  ;;  %v5017_v62 = vunpack.i.l.bf16 %v6492_v16 }
 0x17a   : > { %v5013_v38 = vunpack.i.h.bf16 %v5011_v20  ;;  %v5012_v53 = vunpack.i.l.bf16 %v5011_v20 }
 0x17c   : > { %v6494_v58 = vpop.permute.xlu1 %5025  ;;  %v2029_v1 = vsel %vm2004_vm6, %v1996_v60, %v5012_v53  ;;  %v2030_v2 = vsel %vm2004_vm6, %v1997_v41, %v5013_v38 }
 0x17d   : > { %v5021_v18 = vpop.permute.xlu0 %5020  ;;  %v5028_v39 = vunpack.i.h.bf16 %v6494_v58  ;;  %v5027_v4 = vunpack.i.l.bf16 %v6494_v58  ;;  %v2031_v58 = vsel %vm2004_vm6, %v1998_v23, %v5017_v62 }
 0x17e   : > { %v5023_v26 = vunpack.i.h.bf16 %v5021_v18  ;;  %v5022_v54 = vunpack.i.l.bf16 %v5021_v18  ;;  %v2032_v18 = vsel %vm2004_vm6, %v1999_v25, %v5018_v27 }
 0x17f   : > { %v2064_v29 = vsel %vm2037_vm7, %v2031_v58, %v5027_v4  ;;  %v2065_v33 = vsel %vm2037_vm7, %v2032_v18, %v5028_v39 }
 0x180   : > { %v6498_v5 = vpop.permute.xlu1 %5035  ;;  %v2062_v31 = vsel %vm2037_vm7, %v2029_v1, %v5022_v54  ;;  %v2063_v7 = vsel %vm2037_vm7, %v2030_v2, %v5023_v26 }
 0x181   : > { %v5031_v32 = vpop.permute.xlu0 %5030  ;;  %v5038_v45 = vunpack.i.h.bf16 %v6498_v5  ;;  %v5037_v44 = vunpack.i.l.bf16 %v6498_v5 }
 0x182   : > { %v5033_v59 = vunpack.i.h.bf16 %v5031_v32  ;;  %v5032_v13 = vunpack.i.l.bf16 %v5031_v32 }
 0x183   : > { %v2097_v35 = vsel %vm2070_vm8, %v2064_v29, %v5037_v44  ;;  %v2098_v36 = vsel %vm2070_vm8, %v2065_v33, %v5038_v45  ;;  %v5447_v45 = vld [vmem:[#allocation2 + $0x170] sm:$0xff] }
 0x184   : > { %v5046_v19 = vpop.permute.xlu1 %5045  ;;  %v2095_v11 = vsel %vm2070_vm8, %v2062_v31, %v5032_v13  ;;  %v2096_v12 = vsel %vm2070_vm8, %v2063_v7, %v5033_v59  ;;  %v5446_v31 = vld [vmem:[#allocation2 + $0x158] sm:$0xff] }
 0x185   : > { %v5041_v14 = vpop.permute.xlu0 %5040  ;;  %v5048_v43 = vunpack.i.h.bf16 %v5046_v19  ;;  %v5047_v17 = vunpack.i.l.bf16 %v5046_v19 }
 0x186   : > { %v5043_v40 = vunpack.i.h.bf16 %v5041_v14  ;;  %v5042_v46 = vunpack.i.l.bf16 %v5041_v14 }
 0x187   : > { %v2130_v3 = vsel %vm2103_vm9, %v2097_v35, %v5047_v17  ;;  %v2131_v55 = vsel %vm2103_vm9, %v2098_v36, %v5048_v43  ;;  %v5449_v43 = vld [vmem:[#allocation2 + $0x150] sm:$0xff] }
 0x188   : > { %v6518_v56 = vpop.permute.xlu1 %5055  ;;  %v2128_v16 = vsel %vm2103_vm9, %v2095_v11, %v5042_v46  ;;  %v2129_v20 = vsel %vm2103_vm9, %v2096_v12, %v5043_v40  ;;  %v5448_v12 = vld [vmem:[#allocation2 + $0x168] sm:$0xff] }
 0x189   : > { %v5051_v42 = vpop.permute.xlu0 %5050  ;;  %v5058_v54 = vunpack.i.h.bf16 %v6518_v56  ;;  %v5057_v13 = vunpack.i.l.bf16 %v6518_v56 }
 0x18a   : > { %v5053_v10 = vunpack.i.h.bf16 %v5051_v42  ;;  %v5052_v63 = vunpack.i.l.bf16 %v5051_v42 }
 0x18b   : > { %v1935_v7 = vsel %vm440_vm0, %v5446_v31, %v5058_v54  ;;  %v1934_v17 = vsel %vm440_vm0, %v5449_v43, %v5057_v13 }
 0x18c   : > { %v2161_v21 = vsel %vm2136_vm10, %v2128_v16, %v5052_v63  ;;  %v2162_v48 = vsel %vm2136_vm10, %v2129_v20, %v5053_v10  ;;  %v5066_v24 = vpop.permute.xlu1 %5065 }
 0x18d   : > { %v2181_v8 = vpack.c.bf16 %v2162_v48, %v2161_v21  ;;  %v5061_v28 = vpop.permute.xlu0 %5060  ;;  %v5068_v14 = vunpack.i.h.bf16 %v5066_v24  ;;  %v5067_v41 = vunpack.i.l.bf16 %v5066_v24 }
 0x18e   : > { %v5063_v6 = vunpack.i.h.bf16 %v5061_v28  ;;  %v5062_v5 = vunpack.i.l.bf16 %v5061_v28 }
 0x18f   : > { %4398 = vmatprep.mubr.msk.bf16.mxu0 %vm2207_vm11, %v2181_v8  ;;  %v1937_v44 = vsel %vm440_vm0, %v5447_v45, %v5068_v14  ;;  %v1936_v56 = vsel %vm440_vm0, %v5448_v12, %v5067_v41  ;;  %vm3001_vm0 = vcmask 523264  }
 0x190   : > { %v2164_v32 = vsel %vm2136_vm10, %v2131_v55, %v5063_v6  ;;  %v2163_v37 = vsel %vm2136_vm10, %v2130_v3, %v5062_v5  ;;  %v5076_v9 = vpop.permute.xlu1 %5075 }
 0x191   : > { %v2182_v34 = vpack.c.bf16 %v2164_v32, %v2163_v37  ;;  %v5071_v47 = vpop.permute.xlu0 %5070  ;;  %v5078_v27 = vunpack.i.h.bf16 %v5076_v9  ;;  %v5077_v62 = vunpack.i.l.bf16 %v5076_v9 }
 0x192   : > { %v5073_v40 = vunpack.i.h.bf16 %v5071_v47  ;;  %v5072_v1 = vunpack.i.l.bf16 %v5071_v47 }
 0x193   : > { %v4376_v50 = vpop.f32.mrf.mxu0  ;;  %4399 = vmatmul.mubr.msk.bf16.gmra.mxu0 %vm2207_vm11, %v2182_v34  ;;  %v1969_v16 = vsel %vm1938_vm4, %v1936_v56, %v5077_v62  ;;  %v1970_v20 = vsel %vm1938_vm4, %v1937_v44, %v5078_v27 }
 0x194   : > { %v2306_v57 = vadd.f32 %v4376_v50, %v6547_v30  ;;  %v5086_v49 = vpop.permute.xlu1 %5085  ;;  %v1968_v58 = vsel %vm1938_vm4, %v1935_v7, %v5073_v40  ;;  %v1967_v21 = vsel %vm1938_vm4, %v1934_v17, %v5072_v1  ;;  %vm3293_vm4 = vcmask 1043456  }
 0x195   : > { %v5081_v61 = vpop.permute.xlu0 %5080  ;;  %v2297_v22 = vpop.f32.mrf.mxu0  ;;  %v5088_v42 = vunpack.i.h.bf16 %v5086_v49  ;;  %v5087_v11 = vunpack.i.l.bf16 %v5086_v49 }
 0x196   : > { %v2298_v51 = vadd.f32 %v6547_v30, %v2297_v22  ;;  %v2426_v38 = vmax.f32 %v2306_v57, 0.0  ;;  %v5083_v10 = vunpack.i.h.bf16 %v5081_v61  ;;  %v5082_v63 = vunpack.i.l.bf16 %v5081_v61 }
 0x197   : > { %v4377_v52 = vpop.f32.mrf.mxu0  ;;  %v2002_v8 = vsel %vm1971_vm5, %v1969_v16, %v5087_v11  ;;  %v2003_v28 = vsel %vm1971_vm5, %v1970_v20, %v5088_v42 }
 0x198   : > { %v2424_v53 = vmax.f32 %v2298_v51, 0.0  ;;  %v5096_v19 = vpop.permute.xlu1 %5095  ;;  %v2309_v23 = vadd.f32 %v4377_v52, %v6547_v30  ;;  %v2000_v6 = vsel %vm1971_vm5, %v1967_v21, %v5082_v63  ;;  %v2001_v5 = vsel %vm1971_vm5, %v1968_v58, %v5083_v10 }
 0x199   : > { %v5091_v25 = vpop.permute.xlu0 %5090  ;;  %v2300_v26 = vpop.f32.mrf.mxu0  ;;  %v5098_v48 = vunpack.i.h.bf16 %v5096_v19  ;;  %v5097_v24 = vunpack.i.l.bf16 %v5096_v19  ;;  %vm3241_vm5 = vcmask 195712  }
 0x19a   : > { %v2456_v60 = vmax.f32 %v2424_v53, %v2426_v38  ;;  %v2301_v59 = vadd.f32 %v6547_v30, %v2300_v26  ;;  %v2427_v2 = vmax.f32 %v2309_v23, 0.0  ;;  %v5092_v29 = vunpack.i.l.bf16 %v5091_v25 }
 0x19b   : > { %v5093_v35 = vunpack.i.h.bf16 %v5091_v25  ;;  %v2035_v50 = vsel %vm2004_vm6, %v2002_v8, %v5097_v24  ;;  %v2036_v57 = vsel %vm2004_vm6, %v2003_v28, %v5098_v48 }
 0x19c   : > { %2473 = vst.msk [vmem:[#allocation3] sm:$0xff] %vm2472_vm12, %v2456_v60  ;;  %v5106_v46 = vpop.permute.xlu1 %5105  ;;  %v2425_v39 = vmax.f32 %v2301_v59, 0.0  ;;  %v2033_v49 = vsel %vm2004_vm6, %v2000_v6, %v5092_v29 }
 0x19d   : > { %v5101_v4 = vpop.permute.xlu0 %5100  ;;  %v5107_v36 = vunpack.i.l.bf16 %v5106_v46  ;;  %v5108_v3 = vunpack.i.h.bf16 %v5106_v46  ;;  %v2034_v51 = vsel %vm2004_vm6, %v2001_v5, %v5093_v35  ;;  %vm3934_vm6 = vcmask 261312  }
 0x19e   : > { %v2457_v15 = vmax.f32 %v2425_v39, %v2427_v2  ;;  %v5102_v55 = vunpack.i.l.bf16 %v5101_v4  ;;  %v5103_v32 = vunpack.i.h.bf16 %v5101_v4 }
 0x19f   : > { %v2068_v52 = vsel %vm2037_vm7, %v2035_v50, %v5107_v36  ;;  %v2069_v19 = vsel %vm2037_vm7, %v2036_v57, %v5108_v3 }
 0x1a0   : > { %v5116_v18 = vpop.permute.xlu1 %5115  ;;  %2474 = vst.msk [vmem:[#allocation3 + $0x8] sm:$0xff] %vm2472_vm12, %v2457_v15  ;;  %v2066_v23 = vsel %vm2037_vm7, %v2033_v49, %v5102_v55  ;;  %v2067_v60 = vsel %vm2037_vm7, %v2034_v51, %v5103_v32  ;;  %vm4094_vm7 = vcmask 125952  }
 0x1a1   : > { %v5111_v33 = vpop.permute.xlu0 %5110  ;;  %v5118_v37 = vunpack.i.h.bf16 %v5116_v18  ;;  %v5117_v9 = vunpack.i.l.bf16 %v5116_v18 }
 0x1a2   : > { %v5112_v34 = vunpack.i.l.bf16 %v5111_v33  ;;  %v5113_v61 = vunpack.i.h.bf16 %v5111_v33 }
 0x1a3   : > { %v2101_v41 = vsel %vm2070_vm8, %v2068_v52, %v5117_v9  ;;  %v2102_v59 = vsel %vm2070_vm8, %v2069_v19, %v5118_v37 }
 0x1a4   : > { %v5126_v47 = vpop.permute.xlu1 %5125  ;;  %v2099_v13 = vsel %vm2070_vm8, %v2066_v23, %v5112_v34  ;;  %v2100_v62 = vsel %vm2070_vm8, %v2067_v60, %v5113_v61 }
 0x1a5   : > { %v5121_v22 = vpop.permute.xlu0 %5120  ;;  %v5128_v38 = vunpack.i.h.bf16 %v5126_v47  ;;  %v5127_v53 = vunpack.i.l.bf16 %v5126_v47 }
 0x1a6   : > { %v5123_v25 = vunpack.i.h.bf16 %v5121_v22  ;;  %v5122_v26 = vunpack.i.l.bf16 %v5121_v22 }
 0x1a7   : > { %v2489_v54 = vld [vmem:[#allocation3] ss:$2 sm:$0xff]  ;;  %v2505_v14 = vld [vmem:[#allocation3 + $0x1] ss:$2 sm:$0xff]  ;;  %v2134_v39 = vsel %vm2103_vm9, %v2101_v41, %v5127_v53  ;;  %v2135_v4 = vsel %vm2103_vm9, %v2102_v59, %v5128_v38 }
 0x1a8   : > { %v5136_v27 = vpop.permute.xlu1 %5135  ;;  %v2520_v2 = vmax.f32 %v2489_v54, %v2505_v14  ;;  %v2132_v45 = vsel %vm2103_vm9, %v2099_v13, %v5122_v26  ;;  %v2133_v44 = vsel %vm2103_vm9, %v2100_v62, %v5123_v25 }
 0x1a9   : > { %v5138_v40 = vunpack.i.h.bf16 %v5136_v27  ;;  %v5137_v46 = vunpack.i.l.bf16 %v5136_v27  ;;  %v5131_v1 = vpop.permute.xlu0 %5130 }
 0x1aa   : > { %v5133_v31 = vunpack.i.h.bf16 %v5131_v1  ;;  %v5132_v7 = vunpack.i.l.bf16 %v5131_v1  ;;  %2528 = vst.msk [vmem:[#allocation4] sm:$0xff] %vm2472_vm12, %v2520_v2 }
 0x1ab   : > { %v2167_v42 = vsel %vm2136_vm10, %v2134_v39, %v5137_v46  ;;  %v2168_v11 = vsel %vm2136_vm10, %v2135_v4, %v5138_v40 }
 0x1ac   : > { %v2184_v12 = vpack.c.bf16 %v2168_v11, %v2167_v42  ;;  %v2165_v56 = vsel %vm2136_vm10, %v2132_v45, %v5132_v7  ;;  %v2166_v10 = vsel %vm2136_vm10, %v2133_v44, %v5133_v31 }
 0x1ad   : > { %v2183_v63 = vpack.c.bf16 %v2166_v10, %v2165_v56 }
 0x1af   : > { %4402 = vmatprep.mubr.msk.bf16.mxu0 %vm2207_vm11, %v2183_v63 }
 0x1b0   : > { %4403 = vmatmul.mubr.msk.bf16.gmra.mxu0 %vm2207_vm11, %v2184_v12 }
 0x1b1   : > { %v2557_v5 = vld [vmem:[#allocation4] sm:$0xff] }
 0x1b3   : > { %v4380_v15 = vpop.f32.mrf.mxu0 }
 0x1b4   : > { %v2322_v43 = vadd.f32 %v4380_v15, %v6547_v30 }
 0x1b5   : > { %v2313_v17 = vpop.f32.mrf.mxu0 }
 0x1b6   : > { %v2314_v16 = vadd.f32 %v6547_v30, %v2313_v17  ;;  %v2430_v58 = vmax.f32 %v2322_v43, 0.0 }
 0x1b7   : > { %v4381_v20 = vpop.f32.mrf.mxu0 }
 0x1b8   : > { %v2428_v18 = vmax.f32 %v2314_v16, 0.0  ;;  %v2325_v21 = vadd.f32 %v4381_v20, %v6547_v30 }
 0x1b9   : > { %v2316_v48 = vpop.f32.mrf.mxu0 }
 0x1ba   : > { %v2458_v24 = vmax.f32 %v2428_v18, %v2430_v58  ;;  %v2317_v29 = vadd.f32 %v6547_v30, %v2316_v48  ;;  %v2431_v33 = vmax.f32 %v2325_v21, 0.0 }
 0x1bc   : > { %2475 = vst.msk [vmem:[#allocation3 + $0x10] sm:$0xff] %vm2472_vm12, %v2458_v24  ;;  %v2429_v8 = vmax.f32 %v2317_v29, 0.0 }
 0x1be   : > { %v2459_v28 = vmax.f32 %v2429_v8, %v2431_v33 }
 0x1c0   : > { %2476 = vst.msk [vmem:[#allocation3 + $0x18] sm:$0xff] %vm2472_vm12, %v2459_v28 }
 0x1c7   : > { %v2491_v35 = vld [vmem:[#allocation3 + $0x10] ss:$2 sm:$0xff]  ;;  %v2507_v36 = vld [vmem:[#allocation3 + $0x11] ss:$2 sm:$0xff] }
 0x1c8   : > { %v2521_v6 = vmax.f32 %v2491_v35, %v2507_v36 }
 0x1ca   : > { %2529 = vst.msk [vmem:[#allocation4 + $0x8] sm:$0xff] %vm2472_vm12, %v2521_v6 }
 0x1d1   : > { %v2558_v3 = vld [vmem:[#allocation4 + $0x8] sm:$0xff] }
 0x1d2   : > { %v2565_v55 = vpack.c.bf16 %v2558_v3, %v2557_v5 }
 0x1d3   : > { %v4384_v32 = vpop.f32.mrf.mxu0 }
 0x1d4   : > { %v2338_v37 = vadd.f32 %v4384_v32, %v6547_v30  ;;  %4408 = vmatprep.mubr.msk.bf16.mxu1 %vm2472_vm12, %v2565_v55 }
 0x1d5   : > { %v2329_v9 = vpop.f32.mrf.mxu0 }
 0x1d6   : > { %v2330_v34 = vadd.f32 %v6547_v30, %v2329_v9  ;;  %v2434_v50 = vmax.f32 %v2338_v37, 0.0 }
 0x1d7   : > { %v4385_v47 = vpop.f32.mrf.mxu0 }
 0x1d8   : > { %v2432_v57 = vmax.f32 %v2330_v34, 0.0  ;;  %v2341_v49 = vadd.f32 %v4385_v47, %v6547_v30 }
 0x1d9   : > { %v2332_v61 = vpop.f32.mrf.mxu0 }
 0x1da   : > { %v2460_v22 = vmax.f32 %v2432_v57, %v2434_v50  ;;  %v2333_v51 = vadd.f32 %v6547_v30, %v2332_v61  ;;  %v2435_v52 = vmax.f32 %v2341_v49, 0.0 }
 0x1dc   : > { %2477 = vst.msk [vmem:[#allocation3 + $0x20] sm:$0xff] %vm2472_vm12, %v2460_v22  ;;  %v2433_v38 = vmax.f32 %v2333_v51, 0.0 }
 0x1de   : > { %v2461_v53 = vmax.f32 %v2433_v38, %v2435_v52 }
 0x1e0   : > { %2478 = vst.msk [vmem:[#allocation3 + $0x28] sm:$0xff] %vm2472_vm12, %v2461_v53 }
 0x1e7   : > { %v2493_v19 = vld [vmem:[#allocation3 + $0x20] ss:$2 sm:$0xff]  ;;  %v2509_v23 = vld [vmem:[#allocation3 + $0x21] ss:$2 sm:$0xff] }
 0x1e8   : > { %v2522_v25 = vmax.f32 %v2493_v19, %v2509_v23 }
 0x1ea   : > { %2530 = vst.msk [vmem:[#allocation4 + $0x10] sm:$0xff] %vm2472_vm12, %v2522_v25 }
 0x1f1   : > { %v2559_v45 = vld [vmem:[#allocation4 + $0x10] sm:$0xff] }
 0x1f3   : > { %v4388_v26 = vpop.f32.mrf.mxu0 }
 0x1f4   : > { %v2354_v54 = vadd.f32 %v4388_v26, %v6547_v30 }
 0x1f5   : > { %v2345_v14 = vpop.f32.mrf.mxu0 }
 0x1f6   : > { %v2346_v60 = vadd.f32 %v6547_v30, %v2345_v14  ;;  %v2438_v59 = vmax.f32 %v2354_v54, 0.0 }
 0x1f7   : > { %v4389_v41 = vpop.f32.mrf.mxu0 }
 0x1f8   : > { %v2436_v13 = vmax.f32 %v2346_v60, 0.0  ;;  %v2357_v27 = vadd.f32 %v4389_v41, %v6547_v30 }
 0x1f9   : > { %v2348_v62 = vpop.f32.mrf.mxu0 }
 0x1fa   : > { %v2462_v40 = vmax.f32 %v2436_v13, %v2438_v59  ;;  %v2349_v46 = vadd.f32 %v6547_v30, %v2348_v62  ;;  %v2439_v1 = vmax.f32 %v2357_v27, 0.0 }
 0x1fc   : > { %2479 = vst.msk [vmem:[#allocation3 + $0x30] sm:$0xff] %vm2472_vm12, %v2462_v40  ;;  %v2437_v2 = vmax.f32 %v2349_v46, 0.0 }
 0x1fe   : > { %v2463_v39 = vmax.f32 %v2437_v2, %v2439_v1 }
 0x200   : > { %2480 = vst.msk [vmem:[#allocation3 + $0x38] sm:$0xff] %vm2472_vm12, %v2463_v39 }
 0x207   : > { %v2495_v4 = vld [vmem:[#allocation3 + $0x30] ss:$2 sm:$0xff]  ;;  %v2511_v31 = vld [vmem:[#allocation3 + $0x31] ss:$2 sm:$0xff] }
 0x208   : > { %v2523_v7 = vmax.f32 %v2495_v4, %v2511_v31 }
 0x20a   : > { %2531 = vst.msk [vmem:[#allocation4 + $0x18] sm:$0xff] %vm2472_vm12, %v2523_v7 }
 0x211   : > { %v2560_v44 = vld [vmem:[#allocation4 + $0x18] sm:$0xff] }
 0x212   : > { %v2566_v42 = vpack.c.bf16 %v2560_v44, %v2559_v45 }
 0x213   : > { %v4392_v11 = vpop.f32.mrf.mxu0 }
 0x214   : > { %v2370_v12 = vadd.f32 %v4392_v11, %v6547_v30  ;;  %4409 = vmatmul.mubr.msk.bf16.vlgmr.msra.gmra.mxu1 %vm2472_vm12, %v2566_v42 }
 0x215   : > { %v2361_v56 = vpop.f32.mrf.mxu0 }
 0x216   : > { %v2362_v10 = vadd.f32 %v6547_v30, %v2361_v56  ;;  %v2442_v15 = vmax.f32 %v2370_v12, 0.0 }
 0x217   : > { %v4393_v63 = vpop.f32.mrf.mxu0 }
 0x218   : > { %v2440_v43 = vmax.f32 %v2362_v10, 0.0  ;;  %v2373_v17 = vadd.f32 %v4393_v63, %v6547_v30  ;;  %v5422_v63 = vld [vmem:[%s7250_s5 + $0x38] sm:$0xff]  }
 0x219   : > { %v2364_v16 = vpop.f32.mrf.mxu0 }
 0x21a   : > { %v2464_v20 = vmax.f32 %v2440_v43, %v2442_v15  ;;  %v2365_v58 = vadd.f32 %v6547_v30, %v2364_v16  ;;  %v2443_v0 = vmax.f32 %v2373_v17, 0.0  ;;  %v5522_v43 = vmov 0   ;;  %v5423_v17 = vld [vmem:[%s7250_s5 + $0x30] sm:$0xff]  }
 0x21b   : > { %3136 = vmatprep.subr.bf16.mxu1 %v5522_v43 }
 0x21c   : > { %2481 = vst.msk [vmem:[#allocation3 + $0x40] sm:$0xff] %vm2472_vm12, %v2464_v20  ;;  %v2441_v18 = vmax.f32 %v2365_v58, 0.0  ;;  %3137 = vmatpush1.bf16.msra.mxu1 %v5422_v63 }
 0x21d   : > { %3138 = vmatprep.subr.bf16.mxu1 %v5522_v43 }
 0x21e   : > { %v2465_v21 = vmax.f32 %v2441_v18, %v2443_v0 }
 0x220   : > { %2482 = vst.msk [vmem:[#allocation3 + $0x48] sm:$0xff] %vm2472_vm12, %v2465_v21  ;;  %3139 = vmatpush1.bf16.msra.mxu1 %v5423_v17  ;;  %v6668_v21 = vld [vmem:[%s7249_s4] ss:$0 sm:$0xff] }
 0x221   : > { %3140 = vmatprep.subr.bf16.mxu1 %v5522_v43 }
 0x227   : > { %v2497_v48 = vld [vmem:[#allocation3 + $0x40] ss:$2 sm:$0xff]  ;;  %v2513_v24 = vld [vmem:[#allocation3 + $0x41] ss:$2 sm:$0xff] }
 0x228   : > { %v2524_v29 = vmax.f32 %v2497_v48, %v2513_v24  ;;  %v5424_v48 = vld [vmem:[%s7250_s5 + $0x28] sm:$0xff]  }
 0x229   : > { %3141 = vmatpush1.bf16.msra.mxu1 %v5424_v48  ;;  %v2678_v48 = vld [vmem:[#allocation5] sm:$0xff] }
 0x22a   : > { %2532 = vst.msk [vmem:[#allocation4 + $0x20] sm:$0xff] %vm2472_vm12, %v2524_v29  ;;  %3142 = vmatprep.subr.bf16.mxu1 %v5522_v43 }
 0x231   : > { %v2561_v61 = vld [vmem:[#allocation4 + $0x20] sm:$0xff] }
 0x233   : > { %v4396_v33 = vpop.f32.mrf.mxu0 }
 0x234   : > { %v2386_v8 = vadd.f32 %v4396_v33, %v6547_v30 }
 0x235   : > { %v2377_v28 = vpop.f32.mrf.mxu0 }
 0x236   : > { %v2378_v35 = vadd.f32 %v6547_v30, %v2377_v28  ;;  %v2446_v6 = vmax.f32 %v2386_v8, 0.0  ;;  %v5425_v8 = vld [vmem:[%s7250_s5 + $0x20] sm:$0xff]  }
 0x237   : > { %v4397_v36 = vpop.f32.mrf.mxu0  ;;  %3143 = vmatpush1.bf16.msra.mxu1 %v5425_v8 }
 0x238   : > { %v2444_v5 = vmax.f32 %v2378_v35, 0.0  ;;  %v2389_v3 = vadd.f32 %v4397_v36, %v6547_v30  ;;  %3144 = vmatprep.subr.bf16.mxu1 %v5522_v43 }
 0x239   : > { %v2380_v55 = vpop.f32.mrf.mxu0 }
 0x23a   : > { %v2466_v32 = vmax.f32 %v2444_v5, %v2446_v6  ;;  %v2381_v37 = vadd.f32 %v6547_v30, %v2380_v55  ;;  %v2447_v9 = vmax.f32 %v2389_v3, 0.0  ;;  %v5426_v55 = vld [vmem:[%s7250_s5 + $0x18] sm:$0xff]  }
 0x23b   : > { %3145 = vmatpush1.bf16.msra.mxu1 %v5426_v55 }
 0x23c   : > { %2483 = vst.msk [vmem:[#allocation3 + $0x50] sm:$0xff] %vm2472_vm12, %v2466_v32  ;;  %v2445_v34 = vmax.f32 %v2381_v37, 0.0  ;;  %3146 = vmatprep.subr.bf16.mxu1 %v5522_v43 }
 0x23e   : > { %v2467_v47 = vmax.f32 %v2445_v34, %v2447_v9  ;;  %v5427_v34 = vld [vmem:[%s7250_s5 + $0x10] sm:$0xff]  }
 0x23f   : > { %3147 = vmatpush1.bf16.msra.mxu1 %v5427_v34 }
 0x240   : > { %2484 = vst.msk [vmem:[#allocation3 + $0x58] sm:$0xff] %vm2472_vm12, %v2467_v47  ;;  %v6693_v47 = vld [vmem:[#allocation5 + $0x2] sm:$0xff]  ;;  %3148 = vmatprep.subr.bf16.mxu1 %v5522_v43 }
 0x247   : > { %v2499_v50 = vld [vmem:[#allocation3 + $0x50] ss:$2 sm:$0xff]  ;;  %v2515_v57 = vld [vmem:[#allocation3 + $0x51] ss:$2 sm:$0xff] }
 0x248   : > { %v2525_v49 = vmax.f32 %v2499_v50, %v2515_v57  ;;  %v6695_v50 = vld [vmem:[#allocation5 + $0x1] sm:$0xff] }
 0x24a   : > { %2533 = vst.msk [vmem:[#allocation4 + $0x28] sm:$0xff] %vm2472_vm12, %v2525_v49 }
 0x251   : > { %v2562_v22 = vld [vmem:[#allocation4 + $0x28] sm:$0xff] }
 0x252   : > { %v2567_v51 = vpack.c.bf16 %v2562_v22, %v2561_v61 }
 0x253   : > { %v4400_v52 = vpop.f32.mrf.mxu0 }
 0x254   : > { %v2402_v38 = vadd.f32 %v4400_v52, %v6547_v30  ;;  %4412 = vmatprep.mubr.msk.bf16.mxu1 %vm2472_vm12, %v2567_v51  ;;  %v5428_v51 = vld [vmem:[%s7250_s5 + $0x8] sm:$0xff]  }
 0x255   : > { %v2393_v53 = vpop.f32.mrf.mxu0  ;;  %3149 = vmatpush1.bf16.msra.mxu1 %v5428_v51 }
 0x256   : > { %v2394_v19 = vadd.f32 %v6547_v30, %v2393_v53  ;;  %v2450_v25 = vmax.f32 %v2402_v38, 0.0  ;;  %3150 = vmatprep.subr.bf16.mxu1 %v5522_v43 }
 0x257   : > { %v4401_v23 = vpop.f32.mrf.mxu0 }
 0x258   : > { %v2448_v26 = vmax.f32 %v2394_v19, 0.0  ;;  %v2405_v54 = vadd.f32 %v4401_v23, %v6547_v30 }
 0x259   : > { %v2396_v14 = vpop.f32.mrf.mxu0 }
 0x25a   : > { %v2468_v60 = vmax.f32 %v2448_v26, %v2450_v25  ;;  %v2397_v41 = vadd.f32 %v6547_v30, %v2396_v14  ;;  %v2451_v59 = vmax.f32 %v2405_v54, 0.0  ;;  %v5429_v14 = vld [vmem:[%s7250_s5] sm:$0xff]  }
 0x25b   : > { %3151 = vmatpush1.bf16.msra.mxu1 %v5429_v14 }
 0x25c   : > { %2485 = vst.msk [vmem:[#allocation3 + $0x60] sm:$0xff] %vm2472_vm12, %v2468_v60  ;;  %v2449_v13 = vmax.f32 %v2397_v41, 0.0  ;;  %3166 = vmatprep.subr.bf16.mxu1 %v5522_v43 }
 0x25e   : > { %v2469_v27 = vmax.f32 %v2449_v13, %v2451_v59  ;;  %v5430_v13 = vld [vmem:[%s7250_s5 + $0x40] sm:$0xff]  }
 0x25f   : > { %3167 = vmatpush2.bf16.msra.mxu1 %v5430_v13 }
 0x260   : > { %2486 = vst.msk [vmem:[#allocation3 + $0x68] sm:$0xff] %vm2472_vm12, %v2469_v27  ;;  %3829 = vmatprep.subr.bf16.mxu1 %v5522_v43 }
 0x267   : > { %v2501_v62 = vld [vmem:[#allocation3 + $0x60] ss:$2 sm:$0xff]  ;;  %v2517_v40 = vld [vmem:[#allocation3 + $0x61] ss:$2 sm:$0xff] }
 0x268   : > { %v2526_v46 = vmax.f32 %v2501_v62, %v2517_v40 }
 0x26a   : > { %2534 = vst.msk [vmem:[#allocation4 + $0x30] sm:$0xff] %vm2472_vm12, %v2526_v46 }
 0x270   : > { %v4404_v1 = vpop.f32.mrf.mxu0 }
 0x271   : > { %v2418_v2 = vadd.f32 %v4404_v1, %v6547_v30  ;;  %v2563_v58 = vld [vmem:[#allocation4 + $0x30] sm:$0xff] }
 0x272   : > { %v2409_v39 = vpop.f32.mrf.mxu0 }
 0x273   : > { %v2410_v4 = vadd.f32 %v6547_v30, %v2409_v39  ;;  %v2454_v7 = vmax.f32 %v2418_v2, 0.0 }
 0x274   : > { %v4405_v31 = vpop.f32.mrf.mxu0 }
 0x275   : > { %v2452_v45 = vmax.f32 %v2410_v4, 0.0  ;;  %v2421_v44 = vadd.f32 %v4405_v31, %v6547_v30 }
 0x276   : > { %v2412_v42 = vpop.f32.mrf.mxu0 }
 0x277   : > { %v2470_v11 = vmax.f32 %v2452_v45, %v2454_v7  ;;  %v2413_v12 = vadd.f32 %v6547_v30, %v2412_v42  ;;  %v2455_v56 = vmax.f32 %v2421_v44, 0.0 }
 0x279   : > { %2487 = vst.msk [vmem:[#allocation3 + $0x70] sm:$0xff] %vm2472_vm12, %v2470_v11  ;;  %v2453_v10 = vmax.f32 %v2413_v12, 0.0 }
 0x27b   : > { %v2471_v15 = vmax.f32 %v2453_v10, %v2455_v56 }
 0x27d   : > { %2488 = vst.msk [vmem:[#allocation3 + $0x78] sm:$0xff] %vm2472_vm12, %v2471_v15 }
 0x284   : > { %v2503_v30 = vld [vmem:[#allocation3 + $0x70] ss:$2 sm:$0xff]  ;;  %v2519_v16 = vld [vmem:[#allocation3 + $0x71] ss:$2 sm:$0xff] }
 0x285   : > { %v2527_v20 = vmax.f32 %v2503_v30, %v2519_v16 }
 0x287   : > { %2535 = vst.msk [vmem:[#allocation4 + $0x38] sm:$0xff] %vm2472_vm12, %v2527_v20 }
 0x28e   : > { %v2564_v0 = vld [vmem:[#allocation4 + $0x38] sm:$0xff] }
 0x28f   : > { %v2568_v18 = vpack.c.bf16 %v2564_v0, %v2563_v58 }
 0x291   : > { %4413 = vmatmul.mubr.msk.bf16.gmra.mxu1 %vm2472_vm12, %v2568_v18 }
 0x2d4   : > { %v4410_v24 = vpop.f32.mrf.mxu1 }
 0x2d5   : > { %v2639_v29 = vadd.f32 %v4410_v24, %v6668_v21 }
 0x2d6   : > { %v2630_v33 = vpop.f32.mrf.mxu1 }
 0x2d7   : > { %v2663_v28 = vmax.f32 %v2639_v29, 0.0  ;;  %v2631_v35 = vadd.f32 %v6668_v21, %v2630_v33 }
 0x2d8   : > { %v4411_v36 = vpop.f32.mrf.mxu1 }
 0x2d9   : > { %2672 = vst.msk [vmem:[#allocation5 + $0x31] sm:$0xff] %vm2472_vm12, %v2663_v28  ;;  %v2661_v6 = vmax.f32 %v2631_v35, 0.0  ;;  %v2642_v5 = vadd.f32 %v4411_v36, %v6668_v21 }
 0x2da   : > { %v2633_v3 = vpop.f32.mrf.mxu1 }
 0x2db   : > { %2670 = vst.msk [vmem:[#allocation5 + $0x11] sm:$0xff] %vm2472_vm12, %v2661_v6  ;;  %v2664_v32 = vmax.f32 %v2642_v5, 0.0  ;;  %v2634_v37 = vadd.f32 %v6668_v21, %v2633_v3 }
 0x2dd   : > { %2673 = vst.msk [vmem:[#allocation5 + $0x41] sm:$0xff] %vm2472_vm12, %v2664_v32  ;;  %v2662_v9 = vmax.f32 %v2634_v37, 0.0 }
 0x2df   : > { %2671 = vst.msk [vmem:[#allocation5 + $0x21] sm:$0xff] %vm2472_vm12, %v2662_v9 }
 0x2e0   : > { %v2744_v19 = vld [vmem:[#allocation5 + $0x32] sm:$0xff] }
 0x2e1   : > { %v6709_v23 = vld [vmem:[#allocation5 + $0x30] sm:$0xff] }
 0x2e2   : > { %v2695_v57 = vld [vmem:[#allocation5 + $0x12] sm:$0xff] }
 0x2e3   : > { %v2687_v49 = vld [vmem:[#allocation5 + $0x11] sm:$0xff]  ;;  %v5144_v61 = vpack.i.bf16 %v2695_v57, %v6693_v47 }
 0x2e4   : > { %v5139_v22 = vpack.i.bf16 %v2687_v49, %v6695_v50  ;;  %v6703_v52 = vld [vmem:[#allocation5 + $0x40] sm:$0xff]  ;;  %v2712_v54 = vld [vmem:[#allocation5 + $0x31] sm:$0xff] }
 0x2e5   : > { %5145 = vrot.lane.b32.xlu1 %v5144_v61, %s7281_s30  ;;  %v6707_v38 = vld [vmem:[#allocation5 + $0x41] sm:$0xff]  ;;  %v5149_v26 = vpack.i.bf16 %v6703_v52, %v6709_v23  ;;  %v2702_v62 = vld [vmem:[#allocation5 + $0x10] sm:$0xff] }
 0x2e6   : > { %5140 = vrot.lane.b32.xlu0 %v5139_v22, %s7279_s16  ;;  %v2743_v53 = vld [vmem:[#allocation5 + $0x22] sm:$0xff]  ;;  %v5154_v60 = vpack.i.bf16 %v6707_v38, %v2712_v54 }
 0x2e7   : > { %v3038_v25 = vpack.c.bf16 %v2744_v19, %v2743_v53  ;;  %v6718_v41 = vld [vmem:[#allocation5 + $0x42] sm:$0xff]  ;;  %v5174_v2 = vpack.i.bf16 %v2743_v53, %v2695_v57  ;;  %v5194_v31 = vpack.i.bf16 %v2744_v19, %v2743_v53 }
 0x2e8   : > { %v6722_v59 = vld [vmem:[#allocation5 + $0x20] sm:$0xff]  ;;  %v5159_v27 = vpack.i.bf16 %v6718_v41, %v2744_v19 }
 0x2e9   : > { %4217 = vmatprep.mubr.msk.bf16.mxu1 %vm2472_vm12, %v3038_v25  ;;  %5150 = vrot.lane.b32.xlu1 %v5149_v26, %s7277_s24  ;;  %v5164_v40 = vpack.i.bf16 %v6722_v59, %v2702_v62  ;;  %v2711_v46 = vld [vmem:[#allocation5 + $0x21] sm:$0xff]  ;;  %v5179_v39 = vpack.i.bf16 %v6709_v23, %v6722_v59 }
 0x2ea   : > { %5155 = vrot.lane.b32.xlu0 %v5154_v60, %s7275_s15  ;;  %v5169_v1 = vpack.i.bf16 %v2711_v46, %v2687_v49  ;;  %v5184_v4 = vpack.i.bf16 %v2712_v54, %v2711_v46 }
 0x2ed   : > { %5160 = vrot.lane.b32.xlu1 %v5159_v27, %s7273_s20 }
 0x2ee   : > { %5165 = vrot.lane.b32.xlu0 %v5164_v40, %s7277_s24 }
 0x2f1   : > { %5170 = vrot.lane.b32.xlu1 %v5169_v1, %s7275_s15 }
 0x2f2   : > { %5175 = vrot.lane.b32.xlu0 %v5174_v2, %s7273_s20 }
 0x2f5   : > { %5180 = vrot.lane.b32.xlu1 %v5179_v39, %s7271_s23 }
 0x2f6   : > { %5185 = vrot.lane.b32.xlu0 %v5184_v4, %s7269_s21 }
 0x2f9   : > { %5190 = vrot.lane.b32.xlu1 %v5184_v4, %s7279_s16 }
 0x2fa   : > { %5195 = vrot.lane.b32.xlu0 %v5194_v31, %s7281_s30 }
 0x351   : > { %v4414_v7 = vpop.f32.mrf.mxu1 }
 0x352   : > { %v2655_v45 = vadd.f32 %v4414_v7, %v6668_v21 }
 0x353   : > { %v2646_v44 = vpop.f32.mrf.mxu1 }
 0x354   : > { %v2667_v42 = vmax.f32 %v2655_v45, 0.0  ;;  %v2647_v11 = vadd.f32 %v6668_v21, %v2646_v44 }
 0x355   : > { %v4415_v12 = vpop.f32.mrf.mxu1 }
 0x356   : > { %2676 = vst.msk [vmem:[#allocation5 + $0x71] sm:$0xff] %vm2472_vm12, %v2667_v42  ;;  %v2665_v56 = vmax.f32 %v2647_v11, 0.0  ;;  %v2658_v10 = vadd.f32 %v4415_v12, %v6668_v21 }
 0x357   : > { %v2649_v63 = vpop.f32.mrf.mxu1  ;;  %v5146_v15 = vpop.permute.xlu1 %5145 }
 0x358   : > { %2674 = vst.msk [vmem:[#allocation5 + $0x51] sm:$0xff] %vm2472_vm12, %v2665_v56  ;;  %v2668_v17 = vmax.f32 %v2658_v10, 0.0  ;;  %v2650_v30 = vadd.f32 %v6668_v21, %v2649_v63  ;;  %v5141_v16 = vpop.permute.xlu0 %5140  ;;  %v5147_v29 = vunpack.i.l.bf16 %v5146_v15  ;;  %v5148_v28 = vunpack.i.h.bf16 %v5146_v15 }
 0x359   : > { %v5142_v0 = vunpack.i.l.bf16 %v5141_v16  ;;  %v5143_v24 = vunpack.i.h.bf16 %v5141_v16 }
 0x35a   : > { %2677 = vst.msk [vmem:[#allocation5 + $0x81] sm:$0xff] %vm2472_vm12, %v2668_v17  ;;  %v2666_v20 = vmax.f32 %v2650_v30, 0.0 }
 0x35b   : > { %v6749_v58 = vpop.permute.xlu1 %5150  ;;  %v2975_v35 = vsel %vm2472_vm12, %v2678_v48, %v5142_v0  ;;  %v2976_v3 = vsel %vm2472_vm12, %v2702_v62, %v5143_v24 }
 0x35c   : > { %2675 = vst.msk [vmem:[#allocation5 + $0x61] sm:$0xff] %vm2472_vm12, %v2666_v20  ;;  %v6752_v18 = vpop.permute.xlu0 %5155  ;;  %v2984_v9 = vsel %vm2983_vm14, %v2975_v35, %v5147_v29  ;;  %v2985_v57 = vsel %vm2983_vm14, %v2976_v3, %v5148_v28  ;;  %v5153_v56 = vunpack.i.h.bf16 %v6749_v58  ;;  %v5152_v24 = vunpack.i.l.bf16 %v6749_v58 }
 0x35d   : > { %v6784_v27 = vld [vmem:[#allocation5 + $0x70] sm:$0xff]  ;;  %v5158_v29 = vunpack.i.h.bf16 %v6752_v18 }
 0x35e   : > { %v2716_v62 = vld [vmem:[#allocation5 + $0x71] sm:$0xff] }
 0x35f   : > { %v6754_v33 = vpop.permute.xlu1 %5160  ;;  %v6756_v8 = vld [vmem:[#allocation5 + $0x51] sm:$0xff] }
 0x360   : > { %v6758_v21 = vld [vmem:[#allocation5 + $0x50] sm:$0xff]  ;;  %v5166_v36 = vpop.permute.xlu0 %5165  ;;  %v5204_v6 = vpack.i.bf16 %v6756_v8, %v6707_v38  ;;  %v5163_v3 = vunpack.i.h.bf16 %v6754_v33 }
 0x361   : > { %v5199_v5 = vpack.i.bf16 %v6758_v21, %v6703_v52  ;;  %v5168_v55 = vunpack.i.h.bf16 %v5166_v36  ;;  %v5167_v32 = vunpack.i.l.bf16 %v5166_v36  ;;  %v6766_v37 = vld [vmem:[#allocation5 + $0x52] sm:$0xff]  ;;  %v6776_v26 = vld [vmem:[#allocation5 + $0x80] sm:$0xff] }
 0x362   : > { %5205 = vrot.lane.b32.xlu1 %v5204_v6, %s7269_s21  ;;  %v5214_v51 = vpack.i.bf16 %v6766_v37, %v6718_v41  ;;  %v6778_v54 = vld [vmem:[#allocation5 + $0x81] sm:$0xff]  ;;  %v5219_v2 = vpack.i.bf16 %v6776_v26, %v6784_v27  ;;  %v3040_v58 = vpack.c.bf16 %v6766_v37, %v6718_v41 }
 0x363   : > { %5200 = vrot.lane.b32.xlu0 %v5199_v5, %s7271_s23  ;;  %v5171_v34 = vpop.permute.xlu1 %5170  ;;  %v2993_v38 = vsel %vm2992_vm15, %v2984_v9, %v5167_v32  ;;  %v2994_v53 = vsel %vm2992_vm15, %v2985_v57, %v5168_v55  ;;  %v5224_v39 = vpack.i.bf16 %v6778_v54, %v2716_v62  ;;  %v2715_v4 = vld [vmem:[#allocation5 + $0x61] sm:$0xff]  ;;  %v5162_v55 = vunpack.i.l.bf16 %v6754_v33 }
 0x364   : > { %v5173_v49 = vunpack.i.h.bf16 %v5171_v34  ;;  %v5172_v61 = vunpack.i.l.bf16 %v5171_v34  ;;  %v5176_v22 = vpop.permute.xlu0 %5175  ;;  %v6791_v42 = vld [vmem:[#allocation5 + $0x60] sm:$0xff]  ;;  %v5234_v17 = vpack.i.bf16 %v2715_v4, %v6756_v8 }
 0x365   : > { %v5178_v19 = vunpack.i.h.bf16 %v5176_v22  ;;  %v5177_v25 = vunpack.i.l.bf16 %v5176_v22  ;;  %v5229_v48 = vpack.i.bf16 %v6791_v42, %v6758_v21  ;;  %v2723_v36 = vld [vmem:[#allocation5 + $0x62] sm:$0xff]  ;;  %v5244_v9 = vpack.i.bf16 %v6784_v27, %v6791_v42 }
 0x366   : > { %v3002_v14 = vsel %vm3001_vm0, %v2993_v38, %v5172_v61  ;;  %v3003_v60 = vsel %vm3001_vm0, %v2994_v53, %v5173_v49  ;;  %5215 = vrot.lane.b32.xlu1 %v5214_v51, %s7281_s30  ;;  %v5239_v41 = vpack.i.bf16 %v2723_v36, %v6766_v37  ;;  %v5254_v61 = vpack.i.bf16 %v2716_v62, %v2715_v4  ;;  %v6830_v22 = vld [vmem:[#allocation5 + $0x82] sm:$0xff]  ;;  %v2724_v37 = vld [vmem:[#allocation5 + $0x72] sm:$0xff] }
 0x367   : > { %5210 = vrot.lane.b32.xlu0 %v5204_v6, %s7279_s16  ;;  %v5181_v13 = vpop.permute.xlu1 %5180  ;;  %v3011_v31 = vsel %vm3010_vm1, %v3002_v14, %v5177_v25  ;;  %v3012_v7 = vsel %vm3010_vm1, %v3003_v60, %v5178_v19  ;;  %v5157_v6 = vunpack.i.l.bf16 %v6752_v18  ;;  %v5259_v51 = vpack.i.bf16 %v6830_v22, %v2724_v37  ;;  %v6835_v53 = vld [vmem:[#allocation5 + $0x91] sm:$0xff] }
 0x368   : > { %v5183_v40 = vunpack.i.h.bf16 %v5181_v13  ;;  %v5182_v46 = vunpack.i.l.bf16 %v5181_v13  ;;  %v5186_v1 = vpop.permute.xlu0 %5185  ;;  %v5264_v38 = vpack.i.bf16 %v2724_v37, %v2723_v36  ;;  %v6837_v19 = vld [vmem:[#allocation5 + $0x90] sm:$0xff]  ;;  %v5274_v25 = vpack.i.bf16 %v6835_v53, %v6778_v54 }
 0x369   : > { %v5188_v45 = vunpack.i.h.bf16 %v5186_v1  ;;  %v5187_v44 = vunpack.i.l.bf16 %v5186_v1  ;;  %v5269_v14 = vpack.i.bf16 %v6837_v19, %v6776_v26 }
 0x36a   : > { %v3020_v11 = vsel %vm3019_vm2, %v3011_v31, %v5182_v46  ;;  %v3021_v12 = vsel %vm3019_vm2, %v3012_v7, %v5183_v40  ;;  %5220 = vrot.lane.b32.xlu1 %v5219_v2, %s7277_s24 }
 0x36b   : > { %5225 = vrot.lane.b32.xlu0 %v5224_v39, %s7275_s15  ;;  %v3029_v10 = vsel %vm3028_vm3, %v3020_v11, %v5187_v44  ;;  %v3030_v63 = vsel %vm3028_vm3, %v3021_v12, %v5188_v45  ;;  %v5191_v15 = vpop.permute.xlu1 %5190  ;;  %v3042_v11 = vpack.c.bf16 %v2724_v37, %v2723_v36 }
 0x36c   : > { %v3037_v30 = vpack.c.bf16 %v3030_v63, %v3029_v10  ;;  %v5193_v16 = vunpack.i.h.bf16 %v5191_v15  ;;  %v5192_v20 = vunpack.i.l.bf16 %v5191_v15  ;;  %v5196_v0 = vpop.permute.xlu0 %5195 }
 0x36d   : > { %v5198_v28 = vunpack.i.h.bf16 %v5196_v0  ;;  %v5197_v35 = vunpack.i.l.bf16 %v5196_v0 }
 0x36e   : > { %v2978_v5 = vsel %vm2472_vm12, %v6709_v23, %v5193_v16  ;;  %v2977_v8 = vsel %vm2472_vm12, %v6722_v59, %v5192_v20  ;;  %5235 = vrot.lane.b32.xlu1 %v5234_v17, %s7275_s15  ;;  %3169 = vmatmul.mubr.bf16.vlgmr.msra.gmra.mxu1 %v3037_v30  ;;  %s7298_s15 = smov 32  }
 0x36f   : > { %5230 = vrot.lane.b32.xlu0 %v5229_v48, %s7277_s24  ;;  %v2987_v32 = vsel %vm2983_vm14, %v2978_v5, %v5198_v28  ;;  %v2986_v18 = vsel %vm2983_vm14, %v2977_v8, %v5197_v35  ;;  %4218 = vmatprep.mubr.msk.bf16.mxu1 %vm2472_vm12, %v3040_v58  ;;  %s7300_s24 = smov 48  }
 0x370   : > { %v2996_v23 = vsel %vm2992_vm15, %v2987_v32, %v5153_v56  ;;  %v2995_v59 = vsel %vm2992_vm15, %v2986_v18, %v5152_v24 }
 0x371   : > { %v3004_v34 = vsel %vm3001_vm0, %v2995_v59, %v5157_v6  ;;  %v3005_v33 = vsel %vm3001_vm0, %v2996_v23, %v5158_v29 }
 0x372   : > { %5245 = vrot.lane.b32.xlu1 %v5244_v9, %s7271_s23  ;;  %v3013_v57 = vsel %vm3010_vm1, %v3004_v34, %v5162_v55  ;;  %v3014_v49 = vsel %vm3010_vm1, %v3005_v33, %v5163_v3 }
 0x373   : > { %5240 = vrot.lane.b32.xlu0 %v5239_v41, %s7273_s20 }
 0x376   : > { %5255 = vrot.lane.b32.xlu1 %v5254_v61, %s7279_s16 }
 0x377   : > { %5250 = vrot.lane.b32.xlu0 %v5254_v61, %s7269_s21  ;;  %v6868_v61 = vld [vmem:[#allocation5 + $0x92] sm:$0xff] }
 0x37a   : > { %5260 = vrot.lane.b32.xlu1 %v5259_v51, %s7273_s20  ;;  %s7299_s20 = smov 16  }
 0x37b   : > { %5265 = vrot.lane.b32.xlu0 %v5264_v38, %s7281_s30  ;;  %s7302_s30 = smov 80  }
 0x37e   : > { %5275 = vrot.lane.b32.xlu1 %v5274_v25, %s7269_s21  ;;  %s4255_s21 = sshll.u32 %s5623_s29, 8 }
 0x37f   : > { %5270 = vrot.lane.b32.xlu0 %v5269_v14, %s7271_s23  ;;  %s7301_s23 = smov 64  }
 0x3d4   : > { %v5206_v60 = vpop.permute.xlu1 %5205 }
 0x3d5   : > { %v5201_v13 = vpop.permute.xlu0 %5200  ;;  %v5208_v62 = vunpack.i.h.bf16 %v5206_v60  ;;  %v5207_v40 = vunpack.i.l.bf16 %v5206_v60 }
 0x3d6   : > { %v5203_v46 = vunpack.i.h.bf16 %v5201_v13  ;;  %v5202_v1 = vunpack.i.l.bf16 %v5201_v13 }
 0x3d8   : > { %v3022_v2 = vsel %vm3019_vm2, %v3013_v57, %v5202_v1  ;;  %v3023_v39 = vsel %vm3019_vm2, %v3014_v49, %v5203_v46  ;;  %v5216_v4 = vpop.permute.xlu1 %5215 }
 0x3d9   : > { %v5211_v31 = vpop.permute.xlu0 %5210  ;;  %v3031_v54 = vsel %vm3028_vm3, %v3022_v2, %v5207_v40  ;;  %v3032_v26 = vsel %vm3028_vm3, %v3023_v39, %v5208_v62  ;;  %v5218_v10 = vunpack.i.h.bf16 %v5216_v4  ;;  %v5217_v63 = vunpack.i.l.bf16 %v5216_v4 }
 0x3da   : > { %v3039_v7 = vpack.c.bf16 %v3032_v26, %v3031_v54  ;;  %v5213_v45 = vunpack.i.h.bf16 %v5211_v31  ;;  %v5212_v44 = vunpack.i.l.bf16 %v5211_v31  ;;  %v3044_v62 = vpack.c.bf16 %v6868_v61, %v6830_v22 }
 0x3dc   : > { %3177 = vmatmul.mubr.bf16.gmra.mxu1 %v3039_v7  ;;  %v5221_v12 = vpop.permute.xlu1 %5220  ;;  %v2980_v15 = vsel %vm2472_vm12, %v6758_v21, %v5213_v45  ;;  %v2979_v17 = vsel %vm2472_vm12, %v6703_v52, %v5212_v44 }
 0x3dd   : > { %v6851_v56 = vpop.permute.xlu0 %5225  ;;  %4219 = vmatprep.mubr.msk.bf16.mxu1 %vm2472_vm12, %v3042_v11  ;;  %v2988_v29 = vsel %vm2983_vm14, %v2979_v17, %v5217_v63  ;;  %v2989_v28 = vsel %vm2983_vm14, %v2980_v15, %v5218_v10  ;;  %v5223_v40 = vunpack.i.h.bf16 %v5221_v12  ;;  %v5222_v46 = vunpack.i.l.bf16 %v5221_v12 }
 0x3de   : > { %v5228_v39 = vunpack.i.h.bf16 %v6851_v56  ;;  %v5227_v4 = vunpack.i.l.bf16 %v6851_v56 }
 0x3e0   : > { %v5236_v30 = vpop.permute.xlu1 %5235 }
 0x3e1   : > { %v5231_v16 = vpop.permute.xlu0 %5230  ;;  %v5238_v48 = vunpack.i.h.bf16 %v5236_v30  ;;  %v5237_v24 = vunpack.i.l.bf16 %v5236_v30 }
 0x3e2   : > { %v5233_v20 = vunpack.i.h.bf16 %v5231_v16  ;;  %v5232_v0 = vunpack.i.l.bf16 %v5231_v16 }
 0x3e4   : > { %v2997_v35 = vsel %vm2992_vm15, %v2988_v29, %v5232_v0  ;;  %v2998_v36 = vsel %vm2992_vm15, %v2989_v28, %v5233_v20  ;;  %v5246_v6 = vpop.permute.xlu1 %5245 }
 0x3e5   : > { %v5241_v5 = vpop.permute.xlu0 %5240  ;;  %v5248_v58 = vunpack.i.h.bf16 %v5246_v6  ;;  %v5247_v52 = vunpack.i.l.bf16 %v5246_v6  ;;  %v3006_v3 = vsel %vm3001_vm0, %v2997_v35, %v5237_v24  ;;  %v3007_v55 = vsel %vm3001_vm0, %v2998_v36, %v5238_v48  ;;  %v4207_v24 = vld [vmem:[%s7251_s6] ss:$0 sm:$0xff] }
 0x3e6   : > { %v5243_v21 = vunpack.i.h.bf16 %v5241_v5  ;;  %v5242_v8 = vunpack.i.l.bf16 %v5241_v5 }
 0x3e8   : > { %v3015_v32 = vsel %vm3010_vm1, %v3006_v3, %v5242_v8  ;;  %v3016_v18 = vsel %vm3010_vm1, %v3007_v55, %v5243_v21  ;;  %v5256_v23 = vpop.permute.xlu1 %5255 }
 0x3e9   : > { %v5251_v59 = vpop.permute.xlu0 %5250  ;;  %v5258_v34 = vunpack.i.h.bf16 %v5256_v23  ;;  %v5257_v33 = vunpack.i.l.bf16 %v5256_v23  ;;  %v3024_v57 = vsel %vm3019_vm2, %v3015_v32, %v5247_v52  ;;  %v3025_v49 = vsel %vm3019_vm2, %v3016_v18, %v5248_v58  ;;  %v5431_v58 = vld [vmem:[%s7252_s7 + $0x8] ss:$0 sps:$4 sm:$0xff]   ;;  %v5432_v52 = vld [vmem:[%s7252_s7] sm:$0xff]  }
 0x3ea   : > { %v5253_v9 = vunpack.i.h.bf16 %v5251_v59  ;;  %v5252_v41 = vunpack.i.l.bf16 %v5251_v59  ;;  %4440 = vmatprep.subr.msk.bf16.mxu0 %vm3293_vm4, %v5431_v58  ;;  %v3295_v3 = vsel %vm3293_vm4, %v5431_v58, 0 }
 0x3eb   : > { %v2982_v1 = vsel %vm2472_vm12, %v6784_v27, %v5258_v34  ;;  %v2981_v2 = vsel %vm2472_vm12, %v6791_v42, %v5257_v33  ;;  %4417 = vmatpush3.bf16.msra.mxu0 %v3295_v3 }
 0x3ec   : > { %v3033_v37 = vsel %vm3028_vm3, %v3024_v57, %v5252_v41  ;;  %v3034_v51 = vsel %vm3028_vm3, %v3025_v49, %v5253_v9  ;;  %v5261_v38 = vpop.permute.xlu1 %5260  ;;  %4418 = vmatprep.subr.bf16.mxu0 %v5432_v52 }
 0x3ed   : > { %v5266_v25 = vpop.permute.xlu0 %5265  ;;  %v3041_v14 = vpack.c.bf16 %v3034_v51, %v3033_v37  ;;  %v5263_v22 = vunpack.i.h.bf16 %v5261_v38  ;;  %v5262_v26 = vunpack.i.l.bf16 %v5261_v38 }
 0x3ee   : > { %v5268_v60 = vunpack.i.h.bf16 %v5266_v25  ;;  %v5267_v13 = vunpack.i.l.bf16 %v5266_v25 }
 0x3ef   : > { %3185 = vmatmul.mubr.bf16.gmra.mxu1 %v3041_v14  ;;  %4419 = vmatpush3.bf16.msra.mxu0 %v5432_v52 }
 0x3f0   : > { %v2991_v31 = vsel %vm2983_vm14, %v2982_v1, %v5268_v60  ;;  %v2990_v54 = vsel %vm2983_vm14, %v2981_v2, %v5267_v13  ;;  %4220 = vmatprep.mubr.msk.bf16.mxu1 %vm2472_vm12, %v3044_v62  ;;  %v5276_v45 = vpop.permute.xlu1 %5275 }
 0x3f1   : > { %v3000_v7 = vsel %vm2992_vm15, %v2991_v31, %v5223_v40  ;;  %v2999_v27 = vsel %vm2992_vm15, %v2990_v54, %v5222_v46  ;;  %v5271_v44 = vpop.permute.xlu0 %5270  ;;  %v5278_v42 = vunpack.i.h.bf16 %v5276_v45  ;;  %v5277_v11 = vunpack.i.l.bf16 %v5276_v45 }
 0x3f2   : > { %v5273_v12 = vunpack.i.h.bf16 %v5271_v44  ;;  %v5272_v10 = vunpack.i.l.bf16 %v5271_v44  ;;  %v3008_v56 = vsel %vm3001_vm0, %v2999_v27, %v5227_v4  ;;  %v3009_v63 = vsel %vm3001_vm0, %v3000_v7, %v5228_v39 }
 0x3f3   : > { %v3017_v15 = vsel %vm3010_vm1, %v3008_v56, %v5262_v26  ;;  %v3018_v17 = vsel %vm3010_vm1, %v3009_v63, %v5263_v22 }
 0x3f4   : > { %v3026_v30 = vsel %vm3019_vm2, %v3017_v15, %v5272_v10  ;;  %v3027_v16 = vsel %vm3019_vm2, %v3018_v17, %v5273_v12 }
 0x3f5   : > { %v3035_v20 = vsel %vm3028_vm3, %v3026_v30, %v5277_v11  ;;  %v3036_v0 = vsel %vm3028_vm3, %v3027_v16, %v5278_v42 }
 0x3f6   : > { %v3043_v48 = vpack.c.bf16 %v3036_v0, %v3035_v20  ;;  %v5433_v0 = vld [vmem:[%s7254_s9 + $0x38] sm:$0xff]  }
 0x3f7   : > { %3830 = vmatpush1.bf16.msra.mxu1 %v5433_v0 }
 0x3f8   : > { %3193 = vmatmul.mubr.bf16.gmra.mxu1 %v3043_v48  ;;  %v5434_v48 = vld [vmem:[%s7254_s9 + $0x30] sm:$0xff]   ;;  %3831 = vmatprep.subr.bf16.mxu1 %v5522_v43 }
 0x3fb   : > { %3832 = vmatpush1.bf16.msra.mxu1 %v5434_v48 }
 0x3fc   : > { %3833 = vmatprep.subr.bf16.mxu1 %v5522_v43 }
 0x42e   : > { %v3170_v29 = vpop.f32.mrf.mxu1 }
 0x42f   : > { %v3171_v28 = vadd.f32 %v4207_v24, %v3170_v29  ;;  %v5436_v29 = vld [vmem:[%s7254_s9 + $0x20] sm:$0xff]  }
 0x430   : > { %v3172_v35 = vpop.f32.mrf.mxu1 }
 0x431   : > { %v3201_v36 = vmax.f32 %v3171_v28, 0.0  ;;  %v6941_v28 = vld [vmem:[%s7253_s8] ss:$0 sm:$0xff] }
 0x432   : > { %v3173_v6 = vpop.f32.mrf.mxu1 }
 0x433   : > { %v3174_v5 = vadd.f32 %v4207_v24, %v3173_v6  ;;  %3217 = vrot.lane.b32.xlu0 %v3201_v36, %s7279_s16 }
 0x434   : > { %v3175_v21 = vpop.f32.mrf.mxu1 }
 0x435   : > { %v3202_v8 = vmax.f32 %v3174_v5, 0.0 }
 0x437   : > { %3219 = vrot.lane.b32.xlu1 %v3202_v8, %s7279_s16 }
 0x49c   : > { %v3178_v55 = vpop.f32.mrf.mxu1 }
 0x49d   : > { %v3179_v32 = vadd.f32 %v4207_v24, %v3178_v55  ;;  %v5437_v55 = vld [vmem:[%s7254_s9 + $0x18] sm:$0xff]  }
 0x49e   : > { %v3180_v18 = vpop.f32.mrf.mxu1 }
 0x49f   : > { %v3203_v23 = vmax.f32 %v3179_v32, 0.0 }
 0x4a0   : > { %v3181_v59 = vpop.f32.mrf.mxu1 }
 0x4a1   : > { %v3182_v9 = vadd.f32 %v4207_v24, %v3181_v59  ;;  %3221 = vrot.lane.b32.xlu0 %v3203_v23, %s7279_s16  ;;  %v5438_v59 = vld [vmem:[%s7254_s9 + $0x10] sm:$0xff]  }
 0x4a2   : > { %v3183_v41 = vpop.f32.mrf.mxu1 }
 0x4a3   : > { %v3204_v34 = vmax.f32 %v3182_v9, 0.0 }
 0x4a5   : > { %3223 = vrot.lane.b32.xlu1 %v3204_v34, %s7279_s16  ;;  %v3218_v33 = vpop.permute.xlu0 %3217 }
 0x4a6   : > { %3242 = vst.msk [vmem:[#allocation4] sm:$0xff] %vm3241_vm5, %v3218_v33 }
 0x4a9   : > { %v3220_v57 = vpop.permute.xlu1 %3219 }
 0x4aa   : > { %3243 = vst.msk [vmem:[#allocation4 + $0x8] sm:$0xff] %vm3241_vm5, %v3220_v57  ;;  %v5439_v57 = vld [vmem:[%s7254_s9 + $0x8] sm:$0xff]  }
 0x4ad   : > { %v3250_v14 = vld [vmem:[#allocation4] sm:$0xff] }
 0x4af   : > { %v3186_v49 = vpop.f32.mrf.mxu1 }
 0x4b0   : > { %v3187_v37 = vadd.f32 %v4207_v24, %v3186_v49 }
 0x4b1   : > { %v3188_v51 = vpop.f32.mrf.mxu1  ;;  %v3251_v60 = vld [vmem:[#allocation4 + $0x8] sm:$0xff] }
 0x4b2   : > { %v3205_v38 = vmax.f32 %v3187_v37, 0.0  ;;  %v3258_v62 = vpack.c.bf16 %v3251_v60, %v3250_v14  ;;  %v5440_v60 = vld [vmem:[%s7254_s9] sm:$0xff]  }
 0x4b3   : > { %v3189_v25 = vpop.f32.mrf.mxu1 }
 0x4b4   : > { %v3190_v13 = vadd.f32 %v4207_v24, %v3189_v25  ;;  %3225 = vrot.lane.b32.xlu0 %v3205_v38, %s7279_s16  ;;  %4420 = vmatprep.mubr.msk.bf16.mxu0 %vm2136_vm10, %v3258_v62 }
 0x4b5   : > { %v3191_v40 = vpop.f32.mrf.mxu1 }
 0x4b6   : > { %v3206_v46 = vmax.f32 %v3190_v13, 0.0 }
 0x4b8   : > { %3227 = vrot.lane.b32.xlu1 %v3206_v46, %s7279_s16  ;;  %v3194_v1 = vpop.f32.mrf.mxu1 }
 0x4b9   : > { %v3195_v2 = vadd.f32 %v4207_v24, %v3194_v1 }
 0x4ba   : > { %v3196_v39 = vpop.f32.mrf.mxu1 }
 0x4bb   : > { %v3207_v4 = vmax.f32 %v3195_v2, 0.0 }
 0x4bc   : > { %v3197_v31 = vpop.f32.mrf.mxu1 }
 0x4bd   : > { %v3198_v54 = vadd.f32 %v4207_v24, %v3197_v31  ;;  %3229 = vrot.lane.b32.xlu0 %v3207_v4, %s7279_s16  ;;  %v5435_v24 = vld [vmem:[%s7254_s9 + $0x28] sm:$0xff]   ;;  %v5441_v4 = vld [vmem:[%s7254_s9 + $0x40] sm:$0xff]  }
 0x4be   : > { %v3199_v22 = vpop.f32.mrf.mxu1  ;;  %3834 = vmatpush1.bf16.msra.mxu1 %v5435_v24 }
 0x4bf   : > { %v3208_v26 = vmax.f32 %v3198_v54, 0.0  ;;  %3835 = vmatprep.subr.bf16.mxu1 %v5522_v43 }
 0x4c1   : > { %3231 = vrot.lane.b32.xlu1 %v3208_v26, %s7279_s16  ;;  %s7303_s16 = smov 96  }
 0x4c2   : > { %3836 = vmatpush1.bf16.msra.mxu1 %v5436_v29 }
 0x4c3   : > { %3837 = vmatprep.subr.bf16.mxu1 %v5522_v43 }
 0x4c6   : > { %3838 = vmatpush1.bf16.msra.mxu1 %v5437_v55 }
 0x4c7   : > { %3839 = vmatprep.subr.bf16.mxu1 %v5522_v43 }
 0x4ca   : > { %3840 = vmatpush1.bf16.msra.mxu1 %v5438_v59 }
 0x4cb   : > { %3841 = vmatprep.subr.bf16.mxu1 %v5522_v43 }
 0x4ce   : > { %3842 = vmatpush1.bf16.msra.mxu1 %v5439_v57 }
 0x4cf   : > { %3843 = vmatprep.subr.bf16.mxu1 %v5522_v43 }
 0x4d2   : > { %3844 = vmatpush1.bf16.msra.mxu1 %v5440_v60 }
 0x4d3   : > { %3859 = vmatprep.subr.bf16.mxu1 %v5522_v43 }
 0x4d6   : > { %3860 = vmatpush2.bf16.msra.mxu1 %v5441_v4 }
 0x513   : > { %v3222_v7 = vpop.permute.xlu0 %3221 }
 0x514   : > { %3244 = vst.msk [vmem:[#allocation4 + $0x10] sm:$0xff] %vm3241_vm5, %v3222_v7 }
 0x517   : > { %v3224_v27 = vpop.permute.xlu1 %3223 }
 0x518   : > { %3245 = vst.msk [vmem:[#allocation4 + $0x18] sm:$0xff] %vm3241_vm5, %v3224_v27 }
 0x51b   : > { %v3252_v45 = vld [vmem:[#allocation4 + $0x10] sm:$0xff] }
 0x51f   : > { %v3253_v44 = vld [vmem:[#allocation4 + $0x18] sm:$0xff] }
 0x520   : > { %v3259_v42 = vpack.c.bf16 %v3253_v44, %v3252_v45 }
 0x522   : > { %4421 = vmatmul.mubr.msk.bf16.vlgmr.msra.gmra.mxu0 %vm2136_vm10, %v3259_v42 }
 0x526   : > { %v3226_v11 = vpop.permute.xlu0 %3225 }
 0x527   : > { %3246 = vst.msk [vmem:[#allocation4 + $0x20] sm:$0xff] %vm3241_vm5, %v3226_v11 }
 0x52a   : > { %v3228_v12 = vpop.permute.xlu1 %3227 }
 0x52b   : > { %3247 = vst.msk [vmem:[#allocation4 + $0x28] sm:$0xff] %vm3241_vm5, %v3228_v12 }
 0x52e   : > { %v3254_v56 = vld [vmem:[#allocation4 + $0x20] sm:$0xff] }
 0x52f   : > { %v3230_v10 = vpop.permute.xlu0 %3229 }
 0x530   : > { %3248 = vst.msk [vmem:[#allocation4 + $0x30] sm:$0xff] %vm3241_vm5, %v3230_v10 }
 0x532   : > { %v3255_v63 = vld [vmem:[#allocation4 + $0x28] sm:$0xff] }
 0x533   : > { %v3260_v15 = vpack.c.bf16 %v3255_v63, %v3254_v56  ;;  %v3232_v17 = vpop.permute.xlu1 %3231 }
 0x534   : > { %3249 = vst.msk [vmem:[#allocation4 + $0x38] sm:$0xff] %vm3241_vm5, %v3232_v17 }
 0x535   : > { %4424 = vmatprep.mubr.msk.bf16.mxu0 %vm2136_vm10, %v3260_v15 }
 0x537   : > { %v3256_v30 = vld [vmem:[#allocation4 + $0x30] sm:$0xff] }
 0x53b   : > { %v3257_v16 = vld [vmem:[#allocation4 + $0x38] sm:$0xff] }
 0x53c   : > { %v3261_v20 = vpack.c.bf16 %v3257_v16, %v3256_v30 }
 0x53e   : > { %4425 = vmatmul.mubr.msk.bf16.gmra.mxu0 %vm2136_vm10, %v3261_v20 }
 0x5e2   : > { %v4422_v35 = vpop.f32.mrf.mxu0 }
 0x5e3   : > { %v3340_v36 = vadd.f32 %v4422_v35, %v6941_v28 }
 0x5e4   : > { %v3331_v6 = vpop.f32.mrf.mxu0 }
 0x5e5   : > { %v3364_v5 = vmax.f32 %v3340_v36, 0.0  ;;  %v3332_v21 = vadd.f32 %v6941_v28, %v3331_v6 }
 0x5e6   : > { %v4423_v8 = vpop.f32.mrf.mxu0 }
 0x5e7   : > { %3372 = vst.msk [vmem:[#allocation5 + $0x31] sm:$0xff] %vm2472_vm12, %v3364_v5  ;;  %v3362_v58 = vmax.f32 %v3332_v21, 0.0  ;;  %v3343_v52 = vadd.f32 %v4423_v8, %v6941_v28 }
 0x5e8   : > { %v3334_v3 = vpop.f32.mrf.mxu0 }
 0x5e9   : > { %3370 = vst.msk [vmem:[#allocation5 + $0x11] sm:$0xff] %vm2472_vm12, %v3362_v58  ;;  %v3365_v32 = vmax.f32 %v3343_v52, 0.0  ;;  %v3335_v18 = vadd.f32 %v6941_v28, %v3334_v3 }
 0x5eb   : > { %3373 = vst.msk [vmem:[#allocation5 + $0x41] sm:$0xff] %vm2472_vm12, %v3365_v32  ;;  %v3363_v23 = vmax.f32 %v3335_v18, 0.0 }
 0x5ed   : > { %3371 = vst.msk [vmem:[#allocation5 + $0x21] sm:$0xff] %vm2472_vm12, %v3363_v23 }
 0x5ee   : > { %v3443_v38 = vld [vmem:[#allocation5 + $0x32] sm:$0xff] }
 0x5ef   : > { %v6968_v25 = vld [vmem:[#allocation5 + $0x30] sm:$0xff] }
 0x5f0   : > { %v3395_v9 = vld [vmem:[#allocation5 + $0x12] sm:$0xff] }
 0x5f1   : > { %v3387_v41 = vld [vmem:[#allocation5 + $0x11] sm:$0xff]  ;;  %v5284_v34 = vpack.i.bf16 %v3395_v9, %v6693_v47 }
 0x5f2   : > { %v5279_v33 = vpack.i.bf16 %v3387_v41, %v6695_v50  ;;  %v6964_v49 = vld [vmem:[#allocation5 + $0x40] sm:$0xff]  ;;  %v3412_v50 = vld [vmem:[#allocation5 + $0x31] sm:$0xff] }
 0x5f3   : > { %5285 = vrot.lane.b32.xlu1 %v5284_v34, %s7298_s15  ;;  %v3413_v37 = vld [vmem:[#allocation5 + $0x41] sm:$0xff]  ;;  %v5289_v47 = vpack.i.bf16 %v6964_v49, %v6968_v25  ;;  %v6984_v1 = vld [vmem:[#allocation5 + $0x10] sm:$0xff] }
 0x5f4   : > { %5280 = vrot.lane.b32.xlu0 %v5279_v33, %s7299_s20  ;;  %v3442_v51 = vld [vmem:[#allocation5 + $0x22] sm:$0xff]  ;;  %v5294_v13 = vpack.i.bf16 %v3413_v37, %v3412_v50 }
 0x5f5   : > { %v3731_v14 = vpack.c.bf16 %v3443_v38, %v3442_v51  ;;  %v6976_v62 = vld [vmem:[#allocation5 + $0x42] sm:$0xff]  ;;  %v5314_v22 = vpack.i.bf16 %v3442_v51, %v3395_v9  ;;  %v5334_v15 = vpack.i.bf16 %v3443_v38, %v3442_v51 }
 0x5f6   : > { %v6980_v40 = vld [vmem:[#allocation5 + $0x20] sm:$0xff]  ;;  %v5299_v46 = vpack.i.bf16 %v6976_v62, %v3443_v38 }
 0x5f7   : > { %4238 = vmatprep.mubr.msk.bf16.mxu1 %vm2472_vm12, %v3731_v14  ;;  %5290 = vrot.lane.b32.xlu1 %v5289_v47, %s7300_s24  ;;  %v5304_v2 = vpack.i.bf16 %v6980_v40, %v6984_v1  ;;  %v3411_v39 = vld [vmem:[#allocation5 + $0x21] sm:$0xff]  ;;  %v5319_v45 = vpack.i.bf16 %v6968_v25, %v6980_v40 }
 0x5f8   : > { %5295 = vrot.lane.b32.xlu0 %v5294_v13, %s7301_s23  ;;  %v5309_v31 = vpack.i.bf16 %v3411_v39, %v3387_v41  ;;  %v5324_v42 = vpack.i.bf16 %v3412_v50, %v3411_v39  ;;  %v3378_v13 = vld [vmem:[#allocation5] sm:$0xff] }
 0x5fb   : > { %5300 = vrot.lane.b32.xlu1 %v5299_v46, %s7302_s30 }
 0x5fc   : > { %5305 = vrot.lane.b32.xlu0 %v5304_v2, %s7300_s24 }
 0x5fe   : > { %v4426_v54 = vpop.f32.mrf.mxu0 }
 0x5ff   : > { %v3356_v26 = vadd.f32 %v4426_v54, %v6941_v28  ;;  %5310 = vrot.lane.b32.xlu1 %v5309_v31, %s7301_s23 }
 0x600   : > { %5315 = vrot.lane.b32.xlu0 %v5314_v22, %s7302_s30  ;;  %v3347_v43 = vpop.f32.mrf.mxu0 }
 0x601   : > { %v3368_v7 = vmax.f32 %v3356_v26, 0.0  ;;  %v3348_v27 = vadd.f32 %v6941_v28, %v3347_v43 }
 0x602   : > { %v4427_v44 = vpop.f32.mrf.mxu0 }
 0x603   : > { %3376 = vst.msk [vmem:[#allocation5 + $0x71] sm:$0xff] %vm2472_vm12, %v3368_v7  ;;  %v3366_v11 = vmax.f32 %v3348_v27, 0.0  ;;  %v3359_v12 = vadd.f32 %v4427_v44, %v6941_v28  ;;  %5320 = vrot.lane.b32.xlu1 %v5319_v45, %s7303_s16 }
 0x604   : > { %5325 = vrot.lane.b32.xlu0 %v5324_v42, %s7304_s22  ;;  %v3350_v10 = vpop.f32.mrf.mxu0 }
 0x605   : > { %3374 = vst.msk [vmem:[#allocation5 + $0x51] sm:$0xff] %vm2472_vm12, %v3366_v11  ;;  %v3369_v56 = vmax.f32 %v3359_v12, 0.0  ;;  %v3351_v63 = vadd.f32 %v6941_v28, %v3350_v10 }
 0x607   : > { %3377 = vst.msk [vmem:[#allocation5 + $0x81] sm:$0xff] %vm2472_vm12, %v3369_v56  ;;  %v3367_v17 = vmax.f32 %v3351_v63, 0.0  ;;  %5330 = vrot.lane.b32.xlu1 %v5324_v42, %s7299_s20 }
 0x608   : > { %5335 = vrot.lane.b32.xlu0 %v5334_v15, %s7298_s15 }
 0x609   : > { %3375 = vst.msk [vmem:[#allocation5 + $0x61] sm:$0xff] %vm2472_vm12, %v3367_v17 }
 0x60a   : > { %v7024_v35 = vld [vmem:[#allocation5 + $0x72] sm:$0xff] }
 0x60b   : > { %v7030_v21 = vld [vmem:[#allocation5 + $0x70] sm:$0xff] }
 0x60c   : > { %v3437_v30 = vld [vmem:[#allocation5 + $0x51] sm:$0xff] }
 0x60d   : > { %v7010_v16 = vld [vmem:[#allocation5 + $0x50] sm:$0xff]  ;;  %v5344_v0 = vpack.i.bf16 %v3437_v30, %v3413_v37 }
 0x60e   : > { %v7012_v20 = vld [vmem:[#allocation5 + $0x52] sm:$0xff]  ;;  %v5339_v48 = vpack.i.bf16 %v7010_v16, %v6964_v49  ;;  %v3409_v36 = vld [vmem:[#allocation5 + $0x80] sm:$0xff] }
 0x60f   : > { %v3733_v24 = vpack.c.bf16 %v7012_v20, %v6976_v62  ;;  %5345 = vrot.lane.b32.xlu1 %v5344_v0, %s7304_s22  ;;  %v5354_v28 = vpack.i.bf16 %v7012_v20, %v6976_v62  ;;  %v3417_v6 = vld [vmem:[#allocation5 + $0x81] sm:$0xff]  ;;  %v3416_v8 = vld [vmem:[#allocation5 + $0x71] sm:$0xff]  ;;  %v5359_v58 = vpack.i.bf16 %v3409_v36, %v7030_v21  ;;  %v5409_v37 = vpack.i.bf16 %v6837_v19, %v3409_v36 }
 0x610   : > { %5340 = vrot.lane.b32.xlu0 %v5339_v48, %s7303_s16  ;;  %v7020_v29 = vld [vmem:[#allocation5 + $0x62] sm:$0xff]  ;;  %v5364_v52 = vpack.i.bf16 %v3417_v6, %v3416_v8  ;;  %v5414_v57 = vpack.i.bf16 %v6835_v53, %v3417_v6 }
 0x611   : > { %v3735_v5 = vpack.c.bf16 %v7024_v35, %v7020_v29  ;;  %v3415_v3 = vld [vmem:[#allocation5 + $0x61] sm:$0xff]  ;;  %v5379_v59 = vpack.i.bf16 %v7020_v29, %v7012_v20  ;;  %v5404_v33 = vpack.i.bf16 %v7024_v35, %v7020_v29 }
 0x612   : > { %v7033_v55 = vld [vmem:[#allocation5 + $0x60] sm:$0xff]  ;;  %v5374_v32 = vpack.i.bf16 %v3415_v3, %v3437_v30  ;;  %v5394_v9 = vpack.i.bf16 %v3416_v8, %v3415_v3 }
 0x613   : > { %5355 = vrot.lane.b32.xlu1 %v5354_v28, %s7298_s15  ;;  %v5369_v18 = vpack.i.bf16 %v7033_v55, %v7010_v16  ;;  %v5384_v23 = vpack.i.bf16 %v7030_v21, %v7033_v55  ;;  %v7047_v41 = vld [vmem:[#allocation5 + $0x82] sm:$0xff] }
 0x614   : > { %5350 = vrot.lane.b32.xlu0 %v5344_v0, %s7299_s20  ;;  %v5399_v34 = vpack.i.bf16 %v7047_v41, %v7024_v35 }
 0x617   : > { %5360 = vrot.lane.b32.xlu1 %v5359_v58, %s7300_s24 }
 0x618   : > { %5365 = vrot.lane.b32.xlu0 %v5364_v52, %s7301_s23 }
 0x61b   : > { %5375 = vrot.lane.b32.xlu1 %v5374_v32, %s7301_s23 }
 0x61c   : > { %5370 = vrot.lane.b32.xlu0 %v5369_v18, %s7300_s24 }
 0x61f   : > { %5385 = vrot.lane.b32.xlu1 %v5384_v23, %s7303_s16 }
 0x620   : > { %5380 = vrot.lane.b32.xlu0 %v5379_v59, %s7302_s30 }
 0x623   : > { %5395 = vrot.lane.b32.xlu1 %v5394_v9, %s7299_s20 }
 0x624   : > { %5390 = vrot.lane.b32.xlu0 %v5394_v9, %s7304_s22 }
 0x627   : > { %5400 = vrot.lane.b32.xlu1 %v5399_v34, %s7302_s30 }
 0x628   : > { %5405 = vrot.lane.b32.xlu0 %v5404_v33, %s7298_s15  ;;  %s431_s15 = sand.u32 1, %s5502_s26  }
 0x629   : > { %s4179_s20 = sshll.u32 %s431_s15, 4  ;;  %s7203_s29 = scalar_lea.sflag [#allocation8], %s431_s15 }
 0x62a   : > { %s7180_s24 = scalar_lea.vmem [#allocation7], %s4179_s20 }
 0x62b   : > { %5415 = vrot.lane.b32.xlu1 %v5414_v57, %s7304_s22  ;;  %s4113_s30 = sshll.u32 %s7180_s24, 4  ;;  %s7193_s22 = scalar_lea.hbm %s7258_s13, %s4255_s21  ;;  %s7197_s30 = int_to_ptr.vmem [resolvable:$true] %s4113_s30 }
 0x62c   : > { %5410 = vrot.lane.b32.xlu0 %v5409_v37, %s7303_s16  ;;  %s5450_s20 = scalar_lea.vmem %s7197_s30, 256  ;;  %s5530_s21 = smov [#allocation7]  }
 0x62d   : > { %p5451_p11 = scmp.ne.s32.totalorder %s7197_s30, %s5450_s20  ;;  %s5454_s16 = sshll.u32 %s5530_s21, 4  ;;  %s5455_s16 = int_to_ptr.vmem [resolvable:$false] %s5454_s16 }
 0x62e   : > { %p5457_p0 = scmp.lt.s32.totalorder %s7197_s30, %s5455_s16 }
 0x62f   : > { %p5452_p12 = pnand %p5451_p11, %p5640_p5 }
 0x631   : > { %p5453_p13 = pneg %p5452_p12 }
 0x665   : > { %v5286_v51 = vpop.permute.xlu1 %5285 }
 0x666   : > { %v5281_v38 = vpop.permute.xlu0 %5280  ;;  %v5288_v2 = vunpack.i.h.bf16 %v5286_v51  ;;  %v5287_v39 = vunpack.i.l.bf16 %v5286_v51 }
 0x667   : > { %v5283_v50 = vunpack.i.h.bf16 %v5281_v38  ;;  %v5282_v60 = vunpack.i.l.bf16 %v5281_v38 }
 0x669   : > { %v5291_v14 = vpop.permute.xlu1 %5290  ;;  %v3675_v53 = vsel %vm2472_vm12, %v6984_v1, %v5283_v50  ;;  %v3674_v19 = vsel %vm2472_vm12, %v3378_v13, %v5282_v60 }
 0x66a   : > { %v5296_v47 = vpop.permute.xlu0 %5295  ;;  %v3682_v26 = vsel %vm2983_vm14, %v3674_v19, %v5287_v39  ;;  %v3683_v43 = vsel %vm2983_vm14, %v3675_v53, %v5288_v2  ;;  %v5293_v34 = vunpack.i.h.bf16 %v5291_v14  ;;  %v5292_v33 = vunpack.i.l.bf16 %v5291_v14 }
 0x66b   : > { %v5298_v50 = vunpack.i.h.bf16 %v5296_v47  ;;  %v5297_v60 = vunpack.i.l.bf16 %v5296_v47 }
 0x66d   : > { %v7061_v46 = vpop.permute.xlu1 %5300 }
 0x66e   : > { %v5306_v4 = vpop.permute.xlu0 %5305  ;;  %v5303_v2 = vunpack.i.h.bf16 %v7061_v46  ;;  %v5302_v39 = vunpack.i.l.bf16 %v7061_v46 }
 0x66f   : > { %v5308_v31 = vunpack.i.h.bf16 %v5306_v4  ;;  %v5307_v54 = vunpack.i.l.bf16 %v5306_v4 }
 0x671   : > { %v5311_v22 = vpop.permute.xlu1 %5310  ;;  %v3690_v44 = vsel %vm2992_vm15, %v3682_v26, %v5307_v54  ;;  %v3691_v42 = vsel %vm2992_vm15, %v3683_v43, %v5308_v31 }
 0x672   : > { %v5313_v7 = vunpack.i.h.bf16 %v5311_v22  ;;  %v5312_v27 = vunpack.i.l.bf16 %v5311_v22  ;;  %v5316_v45 = vpop.permute.xlu0 %5315 }
 0x673   : > { %v5318_v11 = vunpack.i.h.bf16 %v5316_v45  ;;  %v5317_v12 = vunpack.i.l.bf16 %v5316_v45 }
 0x674   : > { %v3698_v1 = vsel %vm3001_vm0, %v3690_v44, %v5312_v27  ;;  %v3699_v10 = vsel %vm3001_vm0, %v3691_v42, %v5313_v7 }
 0x675   : > { %v5321_v56 = vpop.permute.xlu1 %5320  ;;  %v3706_v30 = vsel %vm3010_vm1, %v3698_v1, %v5317_v12  ;;  %v3707_v0 = vsel %vm3010_vm1, %v3699_v10, %v5318_v11 }
 0x676   : > { %v5323_v63 = vunpack.i.h.bf16 %v5321_v56  ;;  %v5322_v15 = vunpack.i.l.bf16 %v5321_v56  ;;  %v5326_v17 = vpop.permute.xlu0 %5325 }
 0x677   : > { %v5328_v48 = vunpack.i.h.bf16 %v5326_v17  ;;  %v5327_v28 = vunpack.i.l.bf16 %v5326_v17 }
 0x678   : > { %v3714_v36 = vsel %vm3019_vm2, %v3706_v30, %v5322_v15  ;;  %v3715_v6 = vsel %vm3019_vm2, %v3707_v0, %v5323_v63 }
 0x679   : > { %v3722_v8 = vsel %vm3028_vm3, %v3714_v36, %v5327_v28  ;;  %v3723_v58 = vsel %vm3028_vm3, %v3715_v6, %v5328_v48  ;;  %v5331_v52 = vpop.permute.xlu1 %5330 }
 0x67a   : > { %v3730_v3 = vpack.c.bf16 %v3723_v58, %v3722_v8  ;;  %v5333_v32 = vunpack.i.h.bf16 %v5331_v52  ;;  %v5332_v18 = vunpack.i.l.bf16 %v5331_v52  ;;  %v5336_v23 = vpop.permute.xlu0 %5335 }
 0x67b   : > { %v5338_v59 = vunpack.i.h.bf16 %v5336_v23  ;;  %v5337_v9 = vunpack.i.l.bf16 %v5336_v23 }
 0x67c   : > { %v3677_v57 = vsel %vm2472_vm12, %v6968_v25, %v5333_v32  ;;  %v3676_v37 = vsel %vm2472_vm12, %v6980_v40, %v5332_v18  ;;  %3862 = vmatmul.mubr.bf16.vlgmr.msra.gmra.mxu1 %v3730_v3 }
 0x67d   : > { %v3685_v51 = vsel %vm2983_vm14, %v3677_v57, %v5338_v59  ;;  %v3684_v38 = vsel %vm2983_vm14, %v3676_v37, %v5337_v9  ;;  %4239 = vmatprep.mubr.msk.bf16.mxu1 %vm2472_vm12, %v3733_v24 }
 0x67e   : > { %v3693_v14 = vsel %vm2992_vm15, %v3685_v51, %v5293_v34  ;;  %v3692_v13 = vsel %vm2992_vm15, %v3684_v38, %v5292_v33 }
 0x67f   : > { %v3700_v25 = vsel %vm3001_vm0, %v3692_v13, %v5297_v60  ;;  %v3701_v40 = vsel %vm3001_vm0, %v3693_v14, %v5298_v50 }
 0x680   : > { %v3708_v47 = vsel %vm3010_vm1, %v3700_v25, %v5302_v39  ;;  %v3709_v31 = vsel %vm3010_vm1, %v3701_v40, %v5303_v2  ;;  %v3737_v2 = vpack.c.bf16 %v6868_v61, %v7047_v41 }
 0x681   : > { %v5346_v4 = vpop.permute.xlu1 %5345 }
 0x682   : > { %v5341_v53 = vpop.permute.xlu0 %5340  ;;  %v5348_v19 = vunpack.i.h.bf16 %v5346_v4  ;;  %v5347_v62 = vunpack.i.l.bf16 %v5346_v4 }
 0x683   : > { %v5343_v20 = vunpack.i.h.bf16 %v5341_v53  ;;  %v5342_v24 = vunpack.i.l.bf16 %v5341_v53 }
 0x685   : > { %v3716_v54 = vsel %vm3019_vm2, %v3708_v47, %v5342_v24  ;;  %v3717_v22 = vsel %vm3019_vm2, %v3709_v31, %v5343_v20  ;;  %v5356_v26 = vpop.permute.xlu1 %5355 }
 0x686   : > { %v5351_v43 = vpop.permute.xlu0 %5350  ;;  %v3724_v7 = vsel %vm3028_vm3, %v3716_v54, %v5347_v62  ;;  %v3725_v46 = vsel %vm3028_vm3, %v3717_v22, %v5348_v19  ;;  %v5358_v12 = vunpack.i.h.bf16 %v5356_v26  ;;  %v5357_v1 = vunpack.i.l.bf16 %v5356_v26 }
 0x687   : > { %v3732_v27 = vpack.c.bf16 %v3725_v46, %v3724_v7  ;;  %v5353_v45 = vunpack.i.h.bf16 %v5351_v43  ;;  %v5352_v44 = vunpack.i.l.bf16 %v5351_v43 }
 0x689   : > { %3870 = vmatmul.mubr.bf16.gmra.mxu1 %v3732_v27  ;;  %v5361_v42 = vpop.permute.xlu1 %5360  ;;  %v3679_v10 = vsel %vm2472_vm12, %v7010_v16, %v5353_v45  ;;  %v3678_v56 = vsel %vm2472_vm12, %v6964_v49, %v5352_v44 }
 0x68a   : > { %v7100_v11 = vpop.permute.xlu0 %5365  ;;  %4240 = vmatprep.mubr.msk.bf16.mxu1 %vm2472_vm12, %v3735_v5  ;;  %v3686_v28 = vsel %vm2983_vm14, %v3678_v56, %v5357_v1  ;;  %v3687_v29 = vsel %vm2983_vm14, %v3679_v10, %v5358_v12  ;;  %v5363_v39 = vunpack.i.h.bf16 %v5361_v42  ;;  %v5362_v4 = vunpack.i.l.bf16 %v5361_v42  ;;  %v4228_v56 = vld [vmem:[%s7255_s10] ss:$0 sm:$0xff] }
 0x68b   : > { %v5368_v62 = vunpack.i.h.bf16 %v7100_v11  ;;  %v5367_v20 = vunpack.i.l.bf16 %v7100_v11 }
 0x68d   : > { %v5376_v63 = vpop.permute.xlu1 %5375 }
 0x68e   : > { %v5371_v15 = vpop.permute.xlu0 %5370  ;;  %v5378_v0 = vunpack.i.h.bf16 %v5376_v63  ;;  %v5377_v48 = vunpack.i.l.bf16 %v5376_v63 }
 0x68f   : > { %v5373_v17 = vunpack.i.h.bf16 %v5371_v15  ;;  %v5372_v30 = vunpack.i.l.bf16 %v5371_v15 }
 0x691   : > { %v3694_v35 = vsel %vm2992_vm15, %v3686_v28, %v5372_v30  ;;  %v3695_v5 = vsel %vm2992_vm15, %v3687_v29, %v5373_v17  ;;  %v5386_v36 = vpop.permute.xlu1 %5385 }
 0x692   : > { %v5381_v6 = vpop.permute.xlu0 %5380  ;;  %v5388_v58 = vunpack.i.h.bf16 %v5386_v36  ;;  %v5387_v49 = vunpack.i.l.bf16 %v5386_v36  ;;  %v3702_v52 = vsel %vm3001_vm0, %v3694_v35, %v5377_v48  ;;  %v3703_v3 = vsel %vm3001_vm0, %v3695_v5, %v5378_v0  ;;  %v5442_v35 = vld [vmem:[%s7256_s11 + $0x8] sm:$0xff]   ;;  %v5443_v5 = vld [vmem:[%s7256_s11] sm:$0xff]  }
 0x693   : > { %v5383_v16 = vunpack.i.h.bf16 %v5381_v6  ;;  %v5382_v8 = vunpack.i.l.bf16 %v5381_v6  ;;  %4428 = vmatprep.subr.bf16.mxu0 %v5442_v35 }
 0x694   : > { %4429 = vmatpush3.bf16.msra.mxu0 %v5442_v35 }
 0x695   : > { %v3710_v32 = vsel %vm3010_vm1, %v3702_v52, %v5382_v8  ;;  %v3711_v18 = vsel %vm3010_vm1, %v3703_v3, %v5383_v16  ;;  %v5396_v23 = vpop.permute.xlu1 %5395  ;;  %4430 = vmatprep.subr.bf16.mxu0 %v5443_v5 }
 0x696   : > { %v5391_v59 = vpop.permute.xlu0 %5390  ;;  %v5398_v33 = vunpack.i.h.bf16 %v5396_v23  ;;  %v5397_v57 = vunpack.i.l.bf16 %v5396_v23  ;;  %v3718_v37 = vsel %vm3019_vm2, %v3710_v32, %v5387_v49  ;;  %v3719_v51 = vsel %vm3019_vm2, %v3711_v18, %v5388_v58 }
 0x697   : > { %v5393_v9 = vunpack.i.h.bf16 %v5391_v59  ;;  %v5392_v34 = vunpack.i.l.bf16 %v5391_v59 }
 0x698   : > { %v3681_v53 = vsel %vm2472_vm12, %v7030_v21, %v5398_v33  ;;  %v3680_v19 = vsel %vm2472_vm12, %v7033_v55, %v5397_v57  ;;  %4431 = vmatpush3.bf16.msra.mxu0 %v5443_v5 }
 0x699   : > { %v3726_v38 = vsel %vm3028_vm3, %v3718_v37, %v5392_v34  ;;  %v3727_v50 = vsel %vm3028_vm3, %v3719_v51, %v5393_v9  ;;  %v5401_v60 = vpop.permute.xlu1 %5400 }
 0x69a   : > { %v5406_v14 = vpop.permute.xlu0 %5405  ;;  %v3734_v13 = vpack.c.bf16 %v3727_v50, %v3726_v38  ;;  %v5403_v61 = vunpack.i.h.bf16 %v5401_v60  ;;  %v5402_v41 = vunpack.i.l.bf16 %v5401_v60 }
 0x69b   : > { %v5408_v25 = vunpack.i.h.bf16 %v5406_v14  ;;  %v5407_v40 = vunpack.i.l.bf16 %v5406_v14 }
 0x69c   : > { %3878 = vmatmul.mubr.bf16.gmra.mxu1 %v3734_v13 }
 0x69d   : > { %v3689_v24 = vsel %vm2983_vm14, %v3681_v53, %v5408_v25  ;;  %v3688_v47 = vsel %vm2983_vm14, %v3680_v19, %v5407_v40  ;;  %4241 = vmatprep.mubr.msk.bf16.mxu1 %vm2472_vm12, %v3737_v2  ;;  %v5416_v54 = vpop.permute.xlu1 %5415 }
 0x69e   : > { %v3697_v31 = vsel %vm2992_vm15, %v3689_v24, %v5363_v39  ;;  %v3696_v21 = vsel %vm2992_vm15, %v3688_v47, %v5362_v4  ;;  %v5411_v22 = vpop.permute.xlu0 %5410  ;;  %v5418_v55 = vunpack.i.h.bf16 %v5416_v54  ;;  %v5417_v26 = vunpack.i.l.bf16 %v5416_v54 }
 0x69f   : > { %v5413_v43 = vunpack.i.h.bf16 %v5411_v22  ;;  %v5412_v7 = vunpack.i.l.bf16 %v5411_v22  ;;  %v3704_v46 = vsel %vm3001_vm0, %v3696_v21, %v5367_v20  ;;  %v3705_v27 = vsel %vm3001_vm0, %v3697_v31, %v5368_v62 }
 0x6a0   : > { %v3712_v45 = vsel %vm3010_vm1, %v3704_v46, %v5402_v41  ;;  %v3713_v44 = vsel %vm3010_vm1, %v3705_v27, %v5403_v61  ;;  %v4242_v27 = vld [vmem:[%s7257_s12] ss:$0 sm:$0xff] }
 0x6a1   : > { %v3720_v42 = vsel %vm3019_vm2, %v3712_v45, %v5412_v7  ;;  %v3721_v11 = vsel %vm3019_vm2, %v3713_v44, %v5413_v43 }
 0x6a2   : > { %v3728_v12 = vsel %vm3028_vm3, %v3720_v42, %v5417_v26  ;;  %v3729_v1 = vsel %vm3028_vm3, %v3721_v11, %v5418_v55 }
 0x6a3   : > { %v3736_v10 = vpack.c.bf16 %v3729_v1, %v3728_v12 }
 0x6a5   : > { %3886 = vmatmul.mubr.bf16.gmra.mxu1 %v3736_v10 }
 0x73c   : > { %v3863_v63 = vpop.f32.mrf.mxu1 }
 0x73d   : > { %v3864_v15 = vadd.f32 %v4228_v56, %v3863_v63 }
 0x73e   : > { %v3865_v17 = vpop.f32.mrf.mxu1 }
 0x73f   : > { %v3894_v30 = vmax.f32 %v3864_v15, 0.0 }
 0x740   : > { %v3866_v0 = vpop.f32.mrf.mxu1 }
 0x741   : > { %v3867_v48 = vadd.f32 %v4228_v56, %v3866_v0  ;;  %3910 = vrot.lane.b32.xlu0 %v3894_v30, %s7295_s0 }
 0x742   : > { %v3868_v28 = vpop.f32.mrf.mxu1 }
 0x743   : > { %v3895_v29 = vmax.f32 %v3867_v48, 0.0 }
 0x745   : > { %3912 = vrot.lane.b32.xlu1 %v3895_v29, %s7295_s0 }
 0x749   : > { %v3871_v36 = vpop.f32.mrf.mxu1 }
 0x74a   : > { %v3872_v6 = vadd.f32 %v4228_v56, %v3871_v36 }
 0x74b   : > { %v3873_v16 = vpop.f32.mrf.mxu1 }
 0x74c   : > { %v3896_v8 = vmax.f32 %v3872_v6, 0.0 }
 0x74d   : > { %v3874_v58 = vpop.f32.mrf.mxu1 }
 0x74e   : > { %v3875_v49 = vadd.f32 %v4228_v56, %v3874_v58  ;;  %3914 = vrot.lane.b32.xlu0 %v3896_v8, %s7295_s0 }
 0x74f   : > { %v3876_v52 = vpop.f32.mrf.mxu1 }
 0x750   : > { %v3897_v3 = vmax.f32 %v3875_v49, 0.0 }
 0x752   : > { %3916 = vrot.lane.b32.xlu1 %v3897_v3, %s7295_s0 }
 0x75c   : > { %v3879_v32 = vpop.f32.mrf.mxu1 }
 0x75d   : > { %v3880_v18 = vadd.f32 %v4228_v56, %v3879_v32 }
 0x75e   : > { %v3881_v23 = vpop.f32.mrf.mxu1 }
 0x75f   : > { %v3898_v59 = vmax.f32 %v3880_v18, 0.0 }
 0x760   : > { %v3882_v9 = vpop.f32.mrf.mxu1 }
 0x761   : > { %v3883_v34 = vadd.f32 %v4228_v56, %v3882_v9  ;;  %3918 = vrot.lane.b32.xlu0 %v3898_v59, %s7295_s0 }
 0x762   : > { %v3884_v33 = vpop.f32.mrf.mxu1 }
 0x763   : > { %v3899_v57 = vmax.f32 %v3883_v34, 0.0 }
 0x765   : > { %3920 = vrot.lane.b32.xlu1 %v3899_v57, %s7295_s0  ;;  %v3887_v37 = vpop.f32.mrf.mxu1 }
 0x766   : > { %v3888_v51 = vadd.f32 %v4228_v56, %v3887_v37 }
 0x767   : > { %v3889_v38 = vpop.f32.mrf.mxu1 }
 0x768   : > { %v3900_v50 = vmax.f32 %v3888_v51, 0.0 }
 0x769   : > { %v3890_v60 = vpop.f32.mrf.mxu1 }
 0x76a   : > { %v3891_v14 = vadd.f32 %v4228_v56, %v3890_v60  ;;  %3922 = vrot.lane.b32.xlu0 %v3900_v50, %s7295_s0 }
 0x76b   : > { %v3892_v13 = vpop.f32.mrf.mxu1 }
 0x76c   : > { %v3901_v25 = vmax.f32 %v3891_v14, 0.0 }
 0x76e   : > { %3924 = vrot.lane.b32.xlu1 %v3901_v25, %s7295_s0  ;;  %s5456_s0 = scalar_lea.vmem %s5455_s16, 512 }
 0x76f   : > { %p5458_p1 = scmp.lt.s32.totalorder %s5456_s0, %s5450_s20 }
 0x771   : > { %p5459_p2 = por %p5458_p1, %p5457_p0 }
 0x773   : > { %p5460_p3 = pnand %p5459_p2, %p5453_p13 }
 0x7b3   : > { %v3911_v40 = vpop.permute.xlu0 %3910 }
 0x7b4   : > { %3935 = vst.msk [vmem:[#allocation4] sm:$0xff] %vm3934_vm6, %v3911_v40 }
 0x7b7   : > { %v3913_v2 = vpop.permute.xlu1 %3912 }
 0x7b8   : > { %3936 = vst.msk [vmem:[#allocation4 + $0x8] sm:$0xff] %vm3934_vm6, %v3913_v2 }
 0x7bb   : > { %v3943_v39 = vld [vmem:[#allocation4] sm:$0xff] }
 0x7bf   : > { %v3944_v4 = vld [vmem:[#allocation4 + $0x8] sm:$0xff] }
 0x7c0   : > { %v3915_v53 = vpop.permute.xlu0 %3914  ;;  %v3951_v19 = vpack.c.bf16 %v3944_v4, %v3943_v39 }
 0x7c1   : > { %3937 = vst.msk [vmem:[#allocation4 + $0x10] sm:$0xff] %vm3934_vm6, %v3915_v53 }
 0x7c2   : > { %4432 = vmatprep.mubr.msk.bf16.mxu0 %vm2983_vm14, %v3951_v19 }
 0x7c4   : > { %v3917_v62 = vpop.permute.xlu1 %3916 }
 0x7c5   : > { %3938 = vst.msk [vmem:[#allocation4 + $0x18] sm:$0xff] %vm3934_vm6, %v3917_v62 }
 0x7c8   : > { %v3945_v20 = vld [vmem:[#allocation4 + $0x10] sm:$0xff] }
 0x7cc   : > { %v3946_v24 = vld [vmem:[#allocation4 + $0x18] sm:$0xff] }
 0x7cd   : > { %v3952_v47 = vpack.c.bf16 %v3946_v24, %v3945_v20 }
 0x7cf   : > { %4433 = vmatmul.mubr.msk.bf16.vlgmr.msra.gmra.mxu0 %vm2983_vm14, %v3952_v47 }
 0x7d3   : > { %v3919_v61 = vpop.permute.xlu0 %3918 }
 0x7d4   : > { %3939 = vst.msk [vmem:[#allocation4 + $0x20] sm:$0xff] %vm3934_vm6, %v3919_v61 }
 0x7d7   : > { %v3921_v41 = vpop.permute.xlu1 %3920 }
 0x7d8   : > { %3940 = vst.msk [vmem:[#allocation4 + $0x28] sm:$0xff] %vm3934_vm6, %v3921_v41 }
 0x7db   : > { %v3947_v21 = vld [vmem:[#allocation4 + $0x20] sm:$0xff] }
 0x7dc   : > { %v3923_v31 = vpop.permute.xlu0 %3922 }
 0x7dd   : > { %3941 = vst.msk [vmem:[#allocation4 + $0x30] sm:$0xff] %vm3934_vm6, %v3923_v31 }
 0x7df   : > { %v3948_v54 = vld [vmem:[#allocation4 + $0x28] sm:$0xff] }
 0x7e0   : > { %v3953_v22 = vpack.c.bf16 %v3948_v54, %v3947_v21  ;;  %v3925_v55 = vpop.permute.xlu1 %3924 }
 0x7e1   : > { %3942 = vst.msk [vmem:[#allocation4 + $0x38] sm:$0xff] %vm3934_vm6, %v3925_v55 }
 0x7e2   : > { %4436 = vmatprep.mubr.msk.bf16.mxu0 %vm2983_vm14, %v3953_v22 }
 0x7e4   : > { %v3949_v26 = vld [vmem:[#allocation4 + $0x30] sm:$0xff] }
 0x7e8   : > { %v3950_v43 = vld [vmem:[#allocation4 + $0x38] sm:$0xff] }
 0x7e9   : > { %v3954_v7 = vpack.c.bf16 %v3950_v43, %v3949_v26 }
 0x7eb   : > { %4437 = vmatmul.mubr.msk.bf16.gmra.mxu0 %vm2983_vm14, %v3954_v7 }
 0x88f   : > { %v4434_v46 = vpop.f32.mrf.mxu0 }
 0x890   : > { %v4033_v44 = vadd.f32 %v4434_v46, %v4242_v27 }
 0x891   : > { %v4024_v45 = vpop.f32.mrf.mxu0 }
 0x892   : > { %v4025_v11 = vadd.f32 %v4242_v27, %v4024_v45  ;;  %v4057_v10 = vmax.f32 %v4033_v44, 0.0 }
 0x893   : > { %v4435_v42 = vpop.f32.mrf.mxu0 }
 0x894   : > { %v4036_v12 = vadd.f32 %v4435_v42, %v4242_v27  ;;  %v4055_v15 = vmax.f32 %v4025_v11, 0.0 }
 0x895   : > { %v4027_v1 = vpop.f32.mrf.mxu0 }
 0x896   : > { %v4058_v56 = vmax.f32 %v4036_v12, 0.0  ;;  %v4028_v63 = vadd.f32 %v4242_v27, %v4027_v1 }
 0x898   : > { %v4064_v17 = vadd.f32 %v4058_v56, %v4057_v10  ;;  %v4056_v30 = vmax.f32 %v4028_v63, 0.0 }
 0x89a   : > { %4068 = vst.msk [vmem:[#allocation6 + $0x8] sm:$0xff] %vm2472_vm12, %v4064_v17  ;;  %v4063_v0 = vadd.f32 %v4056_v30, %v4055_v15 }
 0x89c   : > { %4067 = vst.msk [vmem:[#allocation6] sm:$0xff] %vm2472_vm12, %v4063_v0 }
 0x8a1   : > { %v4073_v48 = vld [vmem:[#allocation6 + $0x8] ss:$2 sm:$0xf]  ;;  %v4081_v28 = vld [vmem:[#allocation6 + $0x9] ss:$2 sm:$0xf] }
 0x8a2   : > { %v4087_v29 = vadd.f32 %v4081_v28, %v4073_v48 }
 0x8a3   : > { %v4071_v35 = vld [vmem:[#allocation6] ss:$2 sm:$0xf]  ;;  %v4079_v5 = vld [vmem:[#allocation6 + $0x1] ss:$2 sm:$0xf] }
 0x8a4   : > { %v4086_v36 = vadd.f32 %v4079_v5, %v4071_v35  ;;  %v4091_v6 = vmul.f32 0.25, %v4087_v29 }
 0x8a6   : > { %v4090_v16 = vmul.f32 0.25, %v4086_v36  ;;  %4096 = vst.msk [vmem:[%s7180_s24 + $0x4] sm:$0xf] %vm4094_vm7, %v4091_v6 }
 0x8a8   : > { %4095 = vst.msk [vmem:[%s7180_s24] sm:$0xf] %vm4094_vm7, %v4090_v16 }
 0x8ab   : > { %v4438_v8 = vpop.f32.mrf.mxu0 }
 0x8ac   : > { %v4049_v49 = vadd.f32 %v4438_v8, %v4242_v27 }
 0x8ad   : > { %v4040_v58 = vpop.f32.mrf.mxu0 }
 0x8ae   : > { %v4041_v3 = vadd.f32 %v4242_v27, %v4040_v58  ;;  %v4061_v23 = vmax.f32 %v4049_v49, 0.0 }
 0x8af   : > { %v4439_v52 = vpop.f32.mrf.mxu0 }
 0x8b0   : > { %v4052_v32 = vadd.f32 %v4439_v52, %v4242_v27  ;;  %v4059_v34 = vmax.f32 %v4041_v3, 0.0 }
 0x8b1   : > { %v4043_v18 = vpop.f32.mrf.mxu0 }
 0x8b2   : > { %v4062_v59 = vmax.f32 %v4052_v32, 0.0  ;;  %v4044_v9 = vadd.f32 %v4242_v27, %v4043_v18 }
 0x8b4   : > { %v4066_v33 = vadd.f32 %v4062_v59, %v4061_v23  ;;  %v4060_v57 = vmax.f32 %v4044_v9, 0.0 }
 0x8b6   : > { %4070 = vst.msk [vmem:[#allocation6 + $0x18] sm:$0xff] %vm2472_vm12, %v4066_v33  ;;  %v4065_v37 = vadd.f32 %v4060_v57, %v4059_v34 }
 0x8b8   : > { %4069 = vst.msk [vmem:[#allocation6 + $0x10] sm:$0xff] %vm2472_vm12, %v4065_v37 }
 0x8bd   : > { %v4077_v51 = vld [vmem:[#allocation6 + $0x18] ss:$2 sm:$0xf]  ;;  %v4085_v38 = vld [vmem:[#allocation6 + $0x19] ss:$2 sm:$0xf] }
 0x8be   : > { %v4089_v50 = vadd.f32 %v4085_v38, %v4077_v51 }
 0x8bf   : > { %v4075_v60 = vld [vmem:[#allocation6 + $0x10] ss:$2 sm:$0xf]  ;;  %v4083_v14 = vld [vmem:[#allocation6 + $0x11] ss:$2 sm:$0xf] }
 0x8c0   : > { %v4088_v13 = vadd.f32 %v4083_v14, %v4075_v60  ;;  %v4093_v25 = vmul.f32 0.25, %v4089_v50 }
 0x8c2   : > { %v4092_v40 = vmul.f32 0.25, %v4088_v13  ;;  %4098 = vst.msk [vmem:[%s7180_s24 + $0xc] sm:$0xf] %vm4094_vm7, %v4093_v25 }
 0x8c4   : > { %4097 = vst.msk [vmem:[%s7180_s24 + $0x8] sm:$0xf] %vm4094_vm7, %v4092_v40 }
 0x8c5   : > { %5463 = shalt.err (!%p5460_p3)
}
 0x8c6   : > { %s5464_s15 = scalar_lea.hbm %s7193_s22, 256  ;;  %s5468_s21 = scalar_lea.hbm %s7258_s13, 512 }
 0x8c7   : > { %p5465_p4 = scmp.ne.s32.totalorder %s7193_s22, %s5464_s15  ;;  %p5469_p9 = scmp.lt.s32.totalorder %s7193_s22, %s7258_s13 }
 0x8c8   : > { %p5470_p10 = scmp.lt.s32.totalorder %s5468_s21, %s5464_s15 }
 0x8c9   : > { %p5466_p7 = pnand %p5465_p4, %p5640_p5 }
 0x8ca   : > { %p5471_p11 = por %p5470_p10, %p5469_p9 }
 0x8cb   : > { %p5467_p8 = pneg %p5466_p7 }
 0x8cd   : > { %p5472_p12 = pnand %p5471_p11, %p5467_p8 }
 0x8cf   : > { %5475 = shalt.err (!%p5472_p12)
}
 0x8d0   : > { %s5531_s20 = smov 4  }
 0x8d1   : > { %4441 = dma.vmem_to_hbm [thread:$0]  (%p5640_p5), %s7197_s30, 256, %s7193_s22, %s7203_s29, %s7301_s23, %s7301_s23, %s5531_s20  }
 0x8d2 PF: > { %p4447_p13 = scmp.ge.s32.totalorder %s5510_s28, 2  ;;  %s4128_s1 = sand.u32 1, %s5498_s25  }
 0x8d3   : > { %s4129_s2 = scalar_lea.sflag [#allocation8], %s4128_s1 }
 0x8d4   : > { %p4444_p0 = pnand %p4447_p13, %p5644_p6 }
 0x8d6   : > { %p4445_p1 = pneg %p4444_p0 }
 0x8d8   : > { %5493 = dma.done.wait (%p4445_p1), %s4129_s2, 256  }
 0x8d9   : > { %5495 = vsyncadd (%p4445_p1), %s4129_s2, 4294967040  ;;  %p23_p2 = scmp.ge.s32.totalorder %s5627_s14, 4   ;;  %s7305_s25 = smov %s5502_s26 }
 0x8da   : > { %s7306_s26 = smov %s5506_s27  ;;  %s7307_s27 = smov %s5638_s17 }
 0x8db   : > { %s7308_s28 = smov %s5627_s14  ;;  %25 = sbr.rel (!%p23_p2) target bundleno = 8 (0x8), region = 133 }
 0x8e0   :  { %4134 = vsyncpa [#allocation8], 1 }
 0x8e1   :  { %4136 = vsyncpa [#allocation8 + $0x1], 1 }

</bundles_post_ra>
